<compile_context>
chip_gen: v7x
topology: tpu7x:2x2x1
jax: 0.10.0
libtpu: 0.0.40
codegen_flags: <defaults>
</compile_context>

<pallas_src>
import functools

import jax
import jax.numpy as jnp
import numpy as np
from jax.experimental import pallas as pl
from jax.experimental.pallas import tpu as pltpu


def _round_up(v, m):
    return ((v + m - 1) // m) * m


def _bottleneck_kernel(xb_ref, xt_ref, xbt_ref, w1_ref, s1_ref, b1_ref,
                       w2_ref, s2_ref, b2_ref, out_ref, *,
                       TH, W, C1p, Chp, C2p, add):
    r = pl.program_id(1)
    R = pl.num_programs(1)
    L = (TH + 2) * W          # rows in the hidden slab (tile rows + 2 halo rows)
    M = TH * W                # output rows of this tile

    # ---- assemble the x row slab (halo above, body, halo below) in bf16 ------
    xs = jnp.concatenate([
        xt_ref[0, 0].astype(jnp.bfloat16),                    # (W, C1p)
        xb_ref[0].reshape(M, C1p).astype(jnp.bfloat16),       # (TH*W, C1p)
        xbt_ref[0, 0].astype(jnp.bfloat16),                   # (W, C1p)
    ], axis=0)                                                # (L, C1p)

    # ---- cv1: 1x1 conv == channel matmul (bf16 MXU, f32 acc) + BN + SiLU -----
    h = jnp.dot(xs, w1_ref[...], preferred_element_type=jnp.float32)   # (L, Chp)
    h = h * s1_ref[...] + b1_ref[...]
    h = h * jax.nn.sigmoid(h)                                 # SiLU (EUP)

    # Zero the halo rows that fall outside the image (cv2's zero padding acts on
    # the *hidden* map).  Interior tiles keep real neighbor-tile hidden rows.
    rows = jax.lax.broadcasted_iota(jnp.int32, (L, 1), 0)
    keep = ((rows >= W) | (r > 0)) & ((rows < L - W) | (r < R - 1))
    h = jnp.where(keep, h, 0.0).astype(jnp.bfloat16)

    # ---- cv2: 3x3 conv as ONE matmul with K = 9*Chp (im2col of the slab) -----
    # Pad W zero rows on each end so all 9 shifted slices have static, in-range
    # starts (W-row pad keeps the big h body sublane-aligned for bf16).
    zpad = jnp.zeros((W, Chp), jnp.bfloat16)
    hp = jnp.concatenate([zpad, h, zpad], axis=0)             # (L + 2W, Chp)

    xcol = jax.lax.broadcasted_iota(jnp.int32, (M, 1), 0) % W  # column index

    taps = []
    for dy in (-1, 0, 1):
        for dx in (-1, 0, 1):
            start = (2 + dy) * W + dx                         # static slice start
            tap = hp[start:start + M]                         # (M, Chp)
            if dx:                                            # horizontal border
                valid = (xcol + dx >= 0) & (xcol + dx < W)
                tap = jnp.where(valid, tap, jnp.bfloat16(0.0))
            taps.append(tap)
    lhs = jnp.concatenate(taps, axis=1)                       # (M, 9*Chp), lane concat

    acc = jnp.dot(lhs, w2_ref[...], preferred_element_type=jnp.float32)  # (M, C2p)
    acc = acc * s2_ref[...] + b2_ref[...]                     # folded BN
    acc = acc * jax.nn.sigmoid(acc)                           # SiLU

    if add:
        acc = acc + xb_ref[0].reshape(M, C1p)                 # residual, f32 re-read

    out_ref[0] = acc.reshape(TH, W, C2p).astype(out_ref.dtype)


def make_bottleneck_params(key, c1, c2, e=0.5):
    """Deterministic synthetic parameters (shapes match the PyTorch module)."""
    h = int(c2 * e)
    k = jax.random.split(key, 10)
    # PyTorch conv weights are (out, in, kh, kw); stored here pre-transposed for
    # matmul: w1 (c1, h), w2 (9, h, c2) where 9 = 3x3 taps in row-major order.
    w1 = jax.random.normal(k[0], (c1, h), jnp.float32) / np.sqrt(c1)
    w2 = jax.random.normal(k[1], (9, h, c2), jnp.float32) / np.sqrt(9 * h)
    return dict(
        w1=w1,
        g1=1.0 + 0.1 * jax.random.normal(k[2], (h,), jnp.float32),
        b1=0.1 * jax.random.normal(k[3], (h,), jnp.float32),
        m1=0.1 * jax.random.normal(k[4], (h,), jnp.float32),
        v1=1.0 + 0.1 * jax.random.uniform(k[5], (h,), jnp.float32),
        w2=w2,
        g2=1.0 + 0.1 * jax.random.normal(k[6], (c2,), jnp.float32),
        b2=0.1 * jax.random.normal(k[7], (c2,), jnp.float32),
        m2=0.1 * jax.random.normal(k[8], (c2,), jnp.float32),
        v2=1.0 + 0.1 * jax.random.uniform(k[9], (c2,), jnp.float32),
    )


def _fold_bn(gamma, beta, mean, var, eps=1e-5):
    scale = gamma / jnp.sqrt(var + eps)
    bias = beta - mean * scale
    return scale, bias


def _pick_tile_h(H):
    """Largest divisor of H that is <= 8 (keeps per-step VMEM small, many steps)."""
    for t in (8, 4, 2, 1):
        if H % t == 0:
            return t
    return H


def bottleneck_pallas(x_nchw, params, *, shortcut=True, eps=1e-5, tile_h=None):
    # TODO(synk): grouped conv (g > 1) not implemented; default Bottleneck has g=1.
    N, C1, H, W = x_nchw.shape
    Ch = params["w1"].shape[1]
    C2 = params["w2"].shape[2]
    add = bool(shortcut) and (C1 == C2)

    # Lane-dense channel padding.
    LANE = 128
    C1p = _round_up(C1, LANE)
    Chp = _round_up(Ch, LANE)
    C2p = _round_up(C2, LANE)
    if add:
        assert C1p == C2p

    # Row-tile height: must divide H.  Sized so double-buffered in/out tiles fit
    # the per-chip VMEM budget (halve vs v6e on v7x's 64 MiB).
    if tile_h is None:
        tile_h = _pick_tile_h(H)
    assert H % tile_h == 0
    R = H // tile_h

    # NCHW -> NHWC + zero channel pad.  TODO(synk): in an end-to-end NHWC model
    # these boundary transposes/pads would not exist (pure layout plumbing).
    x = jnp.transpose(x_nchw, (0, 2, 3, 1))
    x = jnp.pad(x, ((0, 0), (0, 0), (0, 0), (0, C1p - C1)))

    s1, b1 = _fold_bn(params["g1"], params["b1"], params["m1"], params["v1"], eps)
    s2, b2 = _fold_bn(params["g2"], params["b2"], params["m2"], params["v2"], eps)

    # Weights: zero-pad channels (keeps padded lanes exactly zero) and cast to
    # bf16 for the MXU.  w2 is flattened to (9*Chp, C2p) for the single matmul.
    w1 = jnp.zeros((C1p, Chp), jnp.float32).at[:C1, :Ch].set(params["w1"])
    w1 = w1.astype(jnp.bfloat16)
    w2 = jnp.zeros((9, Chp, C2p), jnp.float32).at[:, :Ch, :C2].set(params["w2"])
    w2 = w2.reshape(9 * Chp, C2p).astype(jnp.bfloat16)
    s1p = jnp.zeros((1, Chp), jnp.float32).at[0, :Ch].set(s1)
    b1p = jnp.zeros((1, Chp), jnp.float32).at[0, :Ch].set(b1)
    s2p = jnp.zeros((1, C2p), jnp.float32).at[0, :C2].set(s2)
    b2p = jnp.zeros((1, C2p), jnp.float32).at[0, :C2].set(b2)

    kernel = functools.partial(_bottleneck_kernel, TH=tile_h, W=W,
                               C1p=C1p, Chp=Chp, C2p=C2p, add=add)

    out_nhwc = pl.pallas_call(
        kernel,
        out_shape=jax.ShapeDtypeStruct((N, H, W, C2p), x.dtype),
        grid_spec=pltpu.PrefetchScalarGridSpec(
            num_scalar_prefetch=0,
            grid=(N, R),                                      # image x row-tile
            in_specs=[
                # body rows of the tile
                pl.BlockSpec((1, tile_h, W, C1p), lambda n, r: (n, r, 0, 0)),
                # one halo row above (clamped at the top; zeroed in-kernel)
                pl.BlockSpec((1, 1, W, C1p),
                             lambda n, r: (n, jnp.maximum(r * tile_h - 1, 0), 0, 0)),
                # one halo row below (clamped at the bottom; zeroed in-kernel)
                pl.BlockSpec((1, 1, W, C1p),
                             lambda n, r: (n, jnp.minimum(r * tile_h + tile_h, H - 1), 0, 0)),
                pl.BlockSpec((C1p, Chp), lambda n, r: (0, 0)),
                pl.BlockSpec((1, Chp), lambda n, r: (0, 0)),
                pl.BlockSpec((1, Chp), lambda n, r: (0, 0)),
                pl.BlockSpec((9 * Chp, C2p), lambda n, r: (0, 0)),
                pl.BlockSpec((1, C2p), lambda n, r: (0, 0)),
                pl.BlockSpec((1, C2p), lambda n, r: (0, 0)),
            ],
            out_specs=pl.BlockSpec((1, tile_h, W, C2p), lambda n, r: (n, r, 0, 0)),
        ),
        compiler_params=pltpu.CompilerParams(
            dimension_semantics=("parallel", "parallel")),
    )(x, x, x, w1, s1p, b1p, w2, s2p, b2p)

    out_nhwc = out_nhwc[..., :C2]                             # drop padded lanes
    return jnp.transpose(out_nhwc, (0, 3, 1, 2))              # NHWC -> NCHW


def bottleneck_ref(x_nchw, params, *, shortcut=True, eps=1e-5,
                   mxu_dtype=jnp.bfloat16):
    """Pure-JAX reference with the same bf16-operand / f32-accumulate math."""
    x = jnp.transpose(x_nchw, (0, 2, 3, 1)).astype(jnp.float32)
    N, H, W, C1 = x.shape
    Ch = params["w1"].shape[1]
    C2 = params["w2"].shape[2]
    add = bool(shortcut) and (C1 == C2)

    s1, b1 = _fold_bn(params["g1"], params["b1"], params["m1"], params["v1"], eps)
    s2, b2 = _fold_bn(params["g2"], params["b2"], params["m2"], params["v2"], eps)

    w1 = params["w1"].astype(mxu_dtype)
    w2 = params["w2"].astype(mxu_dtype)

    h = jnp.einsum("nhwc,cd->nhwd", x.astype(mxu_dtype), w1,
                   preferred_element_type=jnp.float32)
    h = h * s1 + b1
    h = h * jax.nn.sigmoid(h)
    h = h.astype(mxu_dtype)

    hp = jnp.pad(h, ((0, 0), (1, 1), (1, 1), (0, 0)))
    acc = jnp.zeros((N, H, W, C2), jnp.float32)
    for ky in range(3):
        for kx in range(3):
            acc = acc + jnp.einsum("nhwc,cd->nhwd",
                                   hp[:, ky:ky + H, kx:kx + W, :],
                                   w2[ky * 3 + kx],
                                   preferred_element_type=jnp.float32)
    acc = acc * s2 + b2
    acc = acc * jax.nn.sigmoid(acc)
    if add:
        acc = acc + x
    return jnp.transpose(acc, (0, 3, 1, 2))


if __name__ == "__main__":
    N, C1, C2, H, W = 2, 4, 4, 16, 16                        # h = int(C2*0.5) = 2

    x = jax.random.normal(jax.random.PRNGKey(0), (N, C1, H, W), jnp.float32)
    params = make_bottleneck_params(jax.random.PRNGKey(1), C1, C2, e=0.5)

    out = bottleneck_pallas(x, params, shortcut=True)
    out = jax.block_until_ready(out)

    ref = bottleneck_ref(x, params, shortcut=True)
    assert out.shape == (N, C2, H, W), out.shape
    np.testing.assert_allclose(np.asarray(out), np.asarray(ref),
                               rtol=1e-2, atol=1e-2)
    print("KERNEL_OK")
</pallas_src>

<mosaic_0001>
module attributes {stable_mosaic.version = 11 : i64} {
  func.func @_bottleneck_kernel(%arg0: i32, %arg1: i32, %arg2: memref<1x8x16x128xf32, #tpu.memory_space<vmem>>, %arg3: memref<1x1x16x128xf32, #tpu.memory_space<vmem>>, %arg4: memref<1x1x16x128xf32, #tpu.memory_space<vmem>>, %arg5: memref<128x128xbf16, #tpu.memory_space<vmem>>, %arg6: memref<1x128xf32, #tpu.memory_space<vmem>>, %arg7: memref<1x128xf32, #tpu.memory_space<vmem>>, %arg8: memref<1152x128xbf16, #tpu.memory_space<vmem>>, %arg9: memref<1x128xf32, #tpu.memory_space<vmem>>, %arg10: memref<1x128xf32, #tpu.memory_space<vmem>>, %arg11: memref<1x8x16x128xf32, #tpu.memory_space<vmem>>) attributes {dimension_semantics = [#tpu.dimension_semantics<parallel>, #tpu.dimension_semantics<parallel>], iteration_bounds = array<i64: 2, 2>, scalar_prefetch = 0 : i64, scratch_operands = 0 : i64, tpu.core_type = #tpu.core_type<tc>, window_params = [{transform_indices = @transform_0, window_bounds = array<i64: 1, 8, 16, 128>}, {transform_indices = @transform_1, window_bounds = array<i64: 1, 1, 16, 128>}, {transform_indices = @transform_2, window_bounds = array<i64: 1, 1, 16, 128>}, {pipeline_mode = #tpu.pipeline_mode<synchronous>, transform_indices = @transform_3, window_bounds = array<i64: 128, 128>}, {pipeline_mode = #tpu.pipeline_mode<synchronous>, transform_indices = @transform_4, window_bounds = array<i64: 1, 128>}, {pipeline_mode = #tpu.pipeline_mode<synchronous>, transform_indices = @transform_5, window_bounds = array<i64: 1, 128>}, {pipeline_mode = #tpu.pipeline_mode<synchronous>, transform_indices = @transform_6, window_bounds = array<i64: 1152, 128>}, {pipeline_mode = #tpu.pipeline_mode<synchronous>, transform_indices = @transform_7, window_bounds = array<i64: 1, 128>}, {pipeline_mode = #tpu.pipeline_mode<synchronous>, transform_indices = @transform_8, window_bounds = array<i64: 1, 128>}, {transform_indices = @transform_9, window_bounds = array<i64: 1, 8, 16, 128>}]} {
    %c0 = arith.constant 0 : index
    %c0_0 = arith.constant 0 : index
    %c0_1 = arith.constant 0 : index
    %c0_2 = arith.constant 0 : index
    %0 = vector.load %arg3[%c0, %c0_0, %c0_1, %c0_2] : memref<1x1x16x128xf32, #tpu.memory_space<vmem>>, vector<1x1x16x128xf32>
    %1 = vector.shape_cast %0 : vector<1x1x16x128xf32> to vector<16x128xf32>
    %2 = arith.truncf %1 : vector<16x128xf32> to vector<16x128xbf16>
    %c0_3 = arith.constant 0 : index
    %c0_4 = arith.constant 0 : index
    %c0_5 = arith.constant 0 : index
    %c0_6 = arith.constant 0 : index
    %3 = vector.load %arg2[%c0_3, %c0_4, %c0_5, %c0_6] : memref<1x8x16x128xf32, #tpu.memory_space<vmem>>, vector<1x8x16x128xf32>
    %4 = vector.shape_cast %3 : vector<1x8x16x128xf32> to vector<8x16x128xf32>
    %5 = vector.shape_cast %4 : vector<8x16x128xf32> to vector<128x128xf32>
    %6 = arith.truncf %5 : vector<128x128xf32> to vector<128x128xbf16>
    %c0_7 = arith.constant 0 : index
    %c0_8 = arith.constant 0 : index
    %c0_9 = arith.constant 0 : index
    %c0_10 = arith.constant 0 : index
    %7 = vector.load %arg4[%c0_7, %c0_8, %c0_9, %c0_10] : memref<1x1x16x128xf32, #tpu.memory_space<vmem>>, vector<1x1x16x128xf32>
    %8 = vector.shape_cast %7 : vector<1x1x16x128xf32> to vector<16x128xf32>
    %9 = arith.truncf %8 : vector<16x128xf32> to vector<16x128xbf16>
    %10 = tpu.concatenate %2, %6, %9 in 0 : vector<16x128xbf16>, vector<128x128xbf16>, vector<16x128xbf16> -> vector<160x128xbf16>
    %c0_11 = arith.constant 0 : index
    %c0_12 = arith.constant 0 : index
    %11 = vector.load %arg5[%c0_11, %c0_12] : memref<128x128xbf16, #tpu.memory_space<vmem>>, vector<128x128xbf16>
    %cst = arith.constant dense<0.000000e+00> : vector<160x128xf32>
    %12 = tpu.matmul %10, %11, %cst {dimension_numbers = #tpu.dot_dimension_numbers<[1], [0], [0], [1], [0, 0, 1, 1], [], []>} : vector<160x128xbf16>, vector<128x128xbf16>, vector<160x128xf32> -> vector<160x128xf32>
    %c0_13 = arith.constant 0 : index
    %c0_14 = arith.constant 0 : index
    %13 = vector.load %arg6[%c0_13, %c0_14] : memref<1x128xf32, #tpu.memory_space<vmem>>, vector<1x128xf32>
    %14 = vector.broadcast %13 : vector<1x128xf32> to vector<160x128xf32>
    %15 = arith.mulf %12, %14 : vector<160x128xf32>
    %c0_15 = arith.constant 0 : index
    %c0_16 = arith.constant 0 : index
    %16 = vector.load %arg7[%c0_15, %c0_16] : memref<1x128xf32, #tpu.memory_space<vmem>>, vector<1x128xf32>
    %17 = vector.broadcast %16 : vector<1x128xf32> to vector<160x128xf32>
    %18 = arith.addf %15, %17 : vector<160x128xf32>
    %19 = arith.negf %18 : vector<160x128xf32>
    %20 = math.exp %19 : vector<160x128xf32>
    %cst_17 = arith.constant 1.000000e+00 : f32
    %21 = vector.broadcast %cst_17 : f32 to vector<160x128xf32>
    %22 = arith.addf %21, %20 : vector<160x128xf32>
    %23 = arith.divf %21, %22 : vector<160x128xf32>
    %24 = arith.mulf %18, %23 : vector<160x128xf32>
    %25 = tpu.iota {dimensions = array<i32: 0>} : vector<160x1xi32>
    %c16_i32 = arith.constant 16 : i32
    %26 = vector.broadcast %c16_i32 : i32 to vector<160x1xi32>
    %27 = arith.cmpi sge, %25, %26 : vector<160x1xi32>
    %c0_i32 = arith.constant 0 : i32
    %28 = arith.cmpi sgt, %arg1, %c0_i32 : i32
    %29 = vector.broadcast %28 : i1 to vector<160x1xi1>
    %30 = arith.ori %27, %29 : vector<160x1xi1>
    %c144_i32 = arith.constant 144 : i32
    %31 = vector.broadcast %c144_i32 : i32 to vector<160x1xi32>
    %32 = arith.cmpi slt, %25, %31 : vector<160x1xi32>
    %c1_i32 = arith.constant 1 : i32
    %33 = arith.cmpi slt, %arg1, %c1_i32 : i32
    %34 = vector.broadcast %33 : i1 to vector<160x1xi1>
    %35 = arith.ori %32, %34 : vector<160x1xi1>
    %36 = arith.andi %30, %35 : vector<160x1xi1>
    %cst_18 = arith.constant 0.000000e+00 : f32
    %37 = vector.shape_cast %36 : vector<160x1xi1> to vector<160x1xi1>
    %38 = vector.broadcast %37 : vector<160x1xi1> to vector<160x128xi1>
    %39 = vector.broadcast %cst_18 : f32 to vector<160x128xf32>
    %40 = arith.select %38, %24, %39 : vector<160x128xi1>, vector<160x128xf32>
    %41 = arith.truncf %40 : vector<160x128xf32> to vector<160x128xbf16>
    %cst_19 = arith.constant 0.000000e+00 : bf16
    %42 = vector.broadcast %cst_19 : bf16 to vector<16x128xbf16>
    %43 = tpu.concatenate %42, %41, %42 in 0 : vector<16x128xbf16>, vector<160x128xbf16>, vector<16x128xbf16> -> vector<192x128xbf16>
    %44 = tpu.iota {dimensions = array<i32: 0>} : vector<128x1xi32>
    %c16_i32_20 = arith.constant 16 : i32
    %c0_i32_21 = arith.constant 0 : i32
    %45 = arith.cmpi eq, %c16_i32_20, %c0_i32_21 : i32
    %c1_i32_22 = arith.constant 1 : i32
    %46 = arith.select %45, %c1_i32_22, %c16_i32_20 : i32
    %47 = vector.broadcast %46 : i32 to vector<128x1xi32>
    %48 = arith.remsi %44, %47 : vector<128x1xi32>
    %c0_i32_23 = arith.constant 0 : i32
    %49 = vector.broadcast %c0_i32_23 : i32 to vector<128x1xi32>
    %50 = arith.cmpi ne, %48, %49 : vector<128x1xi32>
    %c0_i32_24 = arith.constant 0 : i32
    %51 = vector.broadcast %c0_i32_24 : i32 to vector<128x1xi32>
    %52 = arith.cmpi slt, %48, %51 : vector<128x1xi32>
    %c0_i32_25 = arith.constant 0 : i32
    %53 = arith.cmpi slt, %46, %c0_i32_25 : i32
    %54 = vector.broadcast %53 : i1 to vector<128x1xi1>
    %55 = vector.broadcast %54 : vector<128x1xi1> to vector<128x1xi1>
    %56 = arith.xori %52, %55 : vector<128x1xi1>
    %57 = arith.andi %56, %50 : vector<128x1xi1>
    %58 = vector.broadcast %46 : i32 to vector<128x1xi32>
    %59 = arith.addi %48, %58 : vector<128x1xi32>
    %60 = arith.select %57, %59, %48 : vector<128x1xi1>, vector<128x1xi32>
    %61 = vector.extract_strided_slice %43 {offsets = [15, 0], sizes = [128, 128], strides = [1, 1]} : vector<192x128xbf16> to vector<128x128xbf16>
    %c-1_i32 = arith.constant -1 : i32
    %62 = vector.broadcast %c-1_i32 : i32 to vector<128x1xi32>
    %63 = arith.addi %60, %62 : vector<128x1xi32>
    %c0_i32_26 = arith.constant 0 : i32
    %64 = vector.broadcast %c0_i32_26 : i32 to vector<128x1xi32>
    %65 = arith.cmpi sge, %63, %64 : vector<128x1xi32>
    %c-1_i32_27 = arith.constant -1 : i32
    %66 = vector.broadcast %c-1_i32_27 : i32 to vector<128x1xi32>
    %67 = arith.addi %60, %66 : vector<128x1xi32>
    %c16_i32_28 = arith.constant 16 : i32
    %68 = vector.broadcast %c16_i32_28 : i32 to vector<128x1xi32>
    %69 = arith.cmpi slt, %67, %68 : vector<128x1xi32>
    %70 = arith.andi %65, %69 : vector<128x1xi1>
    %cst_29 = arith.constant 0.000000e+00 : bf16
    %71 = vector.shape_cast %70 : vector<128x1xi1> to vector<128x1xi1>
    %72 = vector.broadcast %71 : vector<128x1xi1> to vector<128x128xi1>
    %73 = vector.broadcast %cst_29 : bf16 to vector<128x128xbf16>
    %74 = arith.select %72, %61, %73 : vector<128x128xi1>, vector<128x128xbf16>
    %75 = vector.extract_strided_slice %43 {offsets = [16, 0], sizes = [128, 128], strides = [1, 1]} : vector<192x128xbf16> to vector<128x128xbf16>
    %76 = vector.extract_strided_slice %43 {offsets = [17, 0], sizes = [128, 128], strides = [1, 1]} : vector<192x128xbf16> to vector<128x128xbf16>
    %c1_i32_30 = arith.constant 1 : i32
    %77 = vector.broadcast %c1_i32_30 : i32 to vector<128x1xi32>
    %78 = arith.addi %60, %77 : vector<128x1xi32>
    %c0_i32_31 = arith.constant 0 : i32
    %79 = vector.broadcast %c0_i32_31 : i32 to vector<128x1xi32>
    %80 = arith.cmpi sge, %78, %79 : vector<128x1xi32>
    %c1_i32_32 = arith.constant 1 : i32
    %81 = vector.broadcast %c1_i32_32 : i32 to vector<128x1xi32>
    %82 = arith.addi %60, %81 : vector<128x1xi32>
    %c16_i32_33 = arith.constant 16 : i32
    %83 = vector.broadcast %c16_i32_33 : i32 to vector<128x1xi32>
    %84 = arith.cmpi slt, %82, %83 : vector<128x1xi32>
    %85 = arith.andi %80, %84 : vector<128x1xi1>
    %cst_34 = arith.constant 0.000000e+00 : bf16
    %86 = vector.shape_cast %85 : vector<128x1xi1> to vector<128x1xi1>
    %87 = vector.broadcast %86 : vector<128x1xi1> to vector<128x128xi1>
    %88 = vector.broadcast %cst_34 : bf16 to vector<128x128xbf16>
    %89 = arith.select %87, %76, %88 : vector<128x128xi1>, vector<128x128xbf16>
    %90 = vector.extract_strided_slice %43 {offsets = [31, 0], sizes = [128, 128], strides = [1, 1]} : vector<192x128xbf16> to vector<128x128xbf16>
    %c-1_i32_35 = arith.constant -1 : i32
    %91 = vector.broadcast %c-1_i32_35 : i32 to vector<128x1xi32>
    %92 = arith.addi %60, %91 : vector<128x1xi32>
    %c0_i32_36 = arith.constant 0 : i32
    %93 = vector.broadcast %c0_i32_36 : i32 to vector<128x1xi32>
    %94 = arith.cmpi sge, %92, %93 : vector<128x1xi32>
    %c-1_i32_37 = arith.constant -1 : i32
    %95 = vector.broadcast %c-1_i32_37 : i32 to vector<128x1xi32>
    %96 = arith.addi %60, %95 : vector<128x1xi32>
    %c16_i32_38 = arith.constant 16 : i32
    %97 = vector.broadcast %c16_i32_38 : i32 to vector<128x1xi32>
    %98 = arith.cmpi slt, %96, %97 : vector<128x1xi32>
    %99 = arith.andi %94, %98 : vector<128x1xi1>
    %cst_39 = arith.constant 0.000000e+00 : bf16
    %100 = vector.shape_cast %99 : vector<128x1xi1> to vector<128x1xi1>
    %101 = vector.broadcast %100 : vector<128x1xi1> to vector<128x128xi1>
    %102 = vector.broadcast %cst_39 : bf16 to vector<128x128xbf16>
    %103 = arith.select %101, %90, %102 : vector<128x128xi1>, vector<128x128xbf16>
    %104 = vector.extract_strided_slice %43 {offsets = [32, 0], sizes = [128, 128], strides = [1, 1]} : vector<192x128xbf16> to vector<128x128xbf16>
    %105 = vector.extract_strided_slice %43 {offsets = [33, 0], sizes = [128, 128], strides = [1, 1]} : vector<192x128xbf16> to vector<128x128xbf16>
    %c1_i32_40 = arith.constant 1 : i32
    %106 = vector.broadcast %c1_i32_40 : i32 to vector<128x1xi32>
    %107 = arith.addi %60, %106 : vector<128x1xi32>
    %c0_i32_41 = arith.constant 0 : i32
    %108 = vector.broadcast %c0_i32_41 : i32 to vector<128x1xi32>
    %109 = arith.cmpi sge, %107, %108 : vector<128x1xi32>
    %c1_i32_42 = arith.constant 1 : i32
    %110 = vector.broadcast %c1_i32_42 : i32 to vector<128x1xi32>
    %111 = arith.addi %60, %110 : vector<128x1xi32>
    %c16_i32_43 = arith.constant 16 : i32
    %112 = vector.broadcast %c16_i32_43 : i32 to vector<128x1xi32>
    %113 = arith.cmpi slt, %111, %112 : vector<128x1xi32>
    %114 = arith.andi %109, %113 : vector<128x1xi1>
    %cst_44 = arith.constant 0.000000e+00 : bf16
    %115 = vector.shape_cast %114 : vector<128x1xi1> to vector<128x1xi1>
    %116 = vector.broadcast %115 : vector<128x1xi1> to vector<128x128xi1>
    %117 = vector.broadcast %cst_44 : bf16 to vector<128x128xbf16>
    %118 = arith.select %116, %105, %117 : vector<128x128xi1>, vector<128x128xbf16>
    %119 = vector.extract_strided_slice %43 {offsets = [47, 0], sizes = [128, 128], strides = [1, 1]} : vector<192x128xbf16> to vector<128x128xbf16>
    %c-1_i32_45 = arith.constant -1 : i32
    %120 = vector.broadcast %c-1_i32_45 : i32 to vector<128x1xi32>
    %121 = arith.addi %60, %120 : vector<128x1xi32>
    %c0_i32_46 = arith.constant 0 : i32
    %122 = vector.broadcast %c0_i32_46 : i32 to vector<128x1xi32>
    %123 = arith.cmpi sge, %121, %122 : vector<128x1xi32>
    %c-1_i32_47 = arith.constant -1 : i32
    %124 = vector.broadcast %c-1_i32_47 : i32 to vector<128x1xi32>
    %125 = arith.addi %60, %124 : vector<128x1xi32>
    %c16_i32_48 = arith.constant 16 : i32
    %126 = vector.broadcast %c16_i32_48 : i32 to vector<128x1xi32>
    %127 = arith.cmpi slt, %125, %126 : vector<128x1xi32>
    %128 = arith.andi %123, %127 : vector<128x1xi1>
    %cst_49 = arith.constant 0.000000e+00 : bf16
    %129 = vector.shape_cast %128 : vector<128x1xi1> to vector<128x1xi1>
    %130 = vector.broadcast %129 : vector<128x1xi1> to vector<128x128xi1>
    %131 = vector.broadcast %cst_49 : bf16 to vector<128x128xbf16>
    %132 = arith.select %130, %119, %131 : vector<128x128xi1>, vector<128x128xbf16>
    %133 = vector.extract_strided_slice %43 {offsets = [48, 0], sizes = [128, 128], strides = [1, 1]} : vector<192x128xbf16> to vector<128x128xbf16>
    %134 = vector.extract_strided_slice %43 {offsets = [49, 0], sizes = [128, 128], strides = [1, 1]} : vector<192x128xbf16> to vector<128x128xbf16>
    %c1_i32_50 = arith.constant 1 : i32
    %135 = vector.broadcast %c1_i32_50 : i32 to vector<128x1xi32>
    %136 = arith.addi %60, %135 : vector<128x1xi32>
    %c0_i32_51 = arith.constant 0 : i32
    %137 = vector.broadcast %c0_i32_51 : i32 to vector<128x1xi32>
    %138 = arith.cmpi sge, %136, %137 : vector<128x1xi32>
    %c1_i32_52 = arith.constant 1 : i32
    %139 = vector.broadcast %c1_i32_52 : i32 to vector<128x1xi32>
    %140 = arith.addi %60, %139 : vector<128x1xi32>
    %c16_i32_53 = arith.constant 16 : i32
    %141 = vector.broadcast %c16_i32_53 : i32 to vector<128x1xi32>
    %142 = arith.cmpi slt, %140, %141 : vector<128x1xi32>
    %143 = arith.andi %138, %142 : vector<128x1xi1>
    %cst_54 = arith.constant 0.000000e+00 : bf16
    %144 = vector.shape_cast %143 : vector<128x1xi1> to vector<128x1xi1>
    %145 = vector.broadcast %144 : vector<128x1xi1> to vector<128x128xi1>
    %146 = vector.broadcast %cst_54 : bf16 to vector<128x128xbf16>
    %147 = arith.select %145, %134, %146 : vector<128x128xi1>, vector<128x128xbf16>
    %148 = tpu.concatenate %74, %75, %89, %103, %104, %118, %132, %133, %147 in 1 : vector<128x128xbf16>, vector<128x128xbf16>, vector<128x128xbf16>, vector<128x128xbf16>, vector<128x128xbf16>, vector<128x128xbf16>, vector<128x128xbf16>, vector<128x128xbf16>, vector<128x128xbf16> -> vector<128x1152xbf16>
    %c0_55 = arith.constant 0 : index
    %c0_56 = arith.constant 0 : index
    %149 = vector.load %arg8[%c0_55, %c0_56] : memref<1152x128xbf16, #tpu.memory_space<vmem>>, vector<1152x128xbf16>
    %cst_57 = arith.constant dense<0.000000e+00> : vector<128x128xf32>
    %150 = tpu.matmul %148, %149, %cst_57 {dimension_numbers = #tpu.dot_dimension_numbers<[1], [0], [0], [1], [0, 0, 1, 1], [], []>} : vector<128x1152xbf16>, vector<1152x128xbf16>, vector<128x128xf32> -> vector<128x128xf32>
    %c0_58 = arith.constant 0 : index
    %c0_59 = arith.constant 0 : index
    %151 = vector.load %arg9[%c0_58, %c0_59] : memref<1x128xf32, #tpu.memory_space<vmem>>, vector<1x128xf32>
    %152 = vector.broadcast %151 : vector<1x128xf32> to vector<128x128xf32>
    %153 = arith.mulf %150, %152 : vector<128x128xf32>
    %c0_60 = arith.constant 0 : index
    %c0_61 = arith.constant 0 : index
    %154 = vector.load %arg10[%c0_60, %c0_61] : memref<1x128xf32, #tpu.memory_space<vmem>>, vector<1x128xf32>
    %155 = vector.broadcast %154 : vector<1x128xf32> to vector<128x128xf32>
    %156 = arith.addf %153, %155 : vector<128x128xf32>
    %157 = arith.negf %156 : vector<128x128xf32>
    %158 = math.exp %157 : vector<128x128xf32>
    %cst_62 = arith.constant 1.000000e+00 : f32
    %159 = vector.broadcast %cst_62 : f32 to vector<128x128xf32>
    %160 = arith.addf %159, %158 : vector<128x128xf32>
    %161 = arith.divf %159, %160 : vector<128x128xf32>
    %162 = arith.mulf %156, %161 : vector<128x128xf32>
    %c0_63 = arith.constant 0 : index
    %c0_64 = arith.constant 0 : index
    %c0_65 = arith.constant 0 : index
    %c0_66 = arith.constant 0 : index
    %163 = vector.load %arg2[%c0_63, %c0_64, %c0_65, %c0_66] : memref<1x8x16x128xf32, #tpu.memory_space<vmem>>, vector<1x8x16x128xf32>
    %164 = vector.shape_cast %163 : vector<1x8x16x128xf32> to vector<8x16x128xf32>
    %165 = vector.shape_cast %164 : vector<8x16x128xf32> to vector<128x128xf32>
    %166 = arith.addf %162, %165 : vector<128x128xf32>
    %167 = vector.shape_cast %166 : vector<128x128xf32> to vector<8x16x128xf32>
    %c0_67 = arith.constant 0 : index
    %c0_68 = arith.constant 0 : index
    %c0_69 = arith.constant 0 : index
    %c0_70 = arith.constant 0 : index
    %168 = vector.load %arg11[%c0_67, %c0_68, %c0_69, %c0_70] : memref<1x8x16x128xf32, #tpu.memory_space<vmem>>, vector<1x8x16x128xf32>
    %169 = vector.shape_cast %168 : vector<1x8x16x128xf32> to vector<8x16x128xf32>
    %170 = vector.shape_cast %167 : vector<8x16x128xf32> to vector<1x8x16x128xf32>
    tpu.vector_store %arg11[%c0_67, %c0_68, %c0_69, %c0_70], %170 {strides = array<i32>} : memref<1x8x16x128xf32, #tpu.memory_space<vmem>>, vector<1x8x16x128xf32>,
    return
  }
  func.func @transform_0(%arg0: i32, %arg1: i32) -> (i32, i32, i32, i32) {
    %c0_i32 = arith.constant 0 : i32
    %c0_i32_0 = arith.constant 0 : i32
    %c0_i32_1 = arith.constant 0 : i32
    return %arg0, %arg1, %c0_i32, %c0_i32_0 : i32, i32, i32, i32
  }
  func.func @transform_1(%arg0: i32, %arg1: i32) -> (i32, i32, i32, i32) {
    %c8_i32 = arith.constant 8 : i32
    %0 = arith.muli %arg1, %c8_i32 : i32
    %c1_i32 = arith.constant 1 : i32
    %1 = arith.subi %0, %c1_i32 : i32
    %c0_i32 = arith.constant 0 : i32
    %2 = arith.maxsi %1, %c0_i32 : i32
    %c0_i32_0 = arith.constant 0 : i32
    %c0_i32_1 = arith.constant 0 : i32
    %c0_i32_2 = arith.constant 0 : i32
    return %arg0, %2, %c0_i32_0, %c0_i32_1 : i32, i32, i32, i32
  }
  func.func @transform_2(%arg0: i32, %arg1: i32) -> (i32, i32, i32, i32) {
    %c8_i32 = arith.constant 8 : i32
    %0 = arith.muli %arg1, %c8_i32 : i32
    %c8_i32_0 = arith.constant 8 : i32
    %1 = arith.addi %0, %c8_i32_0 : i32
    %c15_i32 = arith.constant 15 : i32
    %2 = arith.minsi %1, %c15_i32 : i32
    %c0_i32 = arith.constant 0 : i32
    %c0_i32_1 = arith.constant 0 : i32
    %c0_i32_2 = arith.constant 0 : i32
    return %arg0, %2, %c0_i32, %c0_i32_1 : i32, i32, i32, i32
  }
  func.func @transform_3(%arg0: i32, %arg1: i32) -> (i32, i32) {
    %c0_i32 = arith.constant 0 : i32
    %c0_i32_0 = arith.constant 0 : i32
    %c0_i32_1 = arith.constant 0 : i32
    return %c0_i32, %c0_i32_0 : i32, i32
  }
  func.func @transform_4(%arg0: i32, %arg1: i32) -> (i32, i32) {
    %c0_i32 = arith.constant 0 : i32
    %c0_i32_0 = arith.constant 0 : i32
    %c0_i32_1 = arith.constant 0 : i32
    return %c0_i32, %c0_i32_0 : i32, i32
  }
  func.func @transform_5(%arg0: i32, %arg1: i32) -> (i32, i32) {
    %c0_i32 = arith.constant 0 : i32
    %c0_i32_0 = arith.constant 0 : i32
    %c0_i32_1 = arith.constant 0 : i32
    return %c0_i32, %c0_i32_0 : i32, i32
  }
  func.func @transform_6(%arg0: i32, %arg1: i32) -> (i32, i32) {
    %c0_i32 = arith.constant 0 : i32
    %c0_i32_0 = arith.constant 0 : i32
    %c0_i32_1 = arith.constant 0 : i32
    return %c0_i32, %c0_i32_0 : i32, i32
  }
  func.func @transform_7(%arg0: i32, %arg1: i32) -> (i32, i32) {
    %c0_i32 = arith.constant 0 : i32
    %c0_i32_0 = arith.constant 0 : i32
    %c0_i32_1 = arith.constant 0 : i32
    return %c0_i32, %c0_i32_0 : i32, i32
  }
  func.func @transform_8(%arg0: i32, %arg1: i32) -> (i32, i32) {
    %c0_i32 = arith.constant 0 : i32
    %c0_i32_0 = arith.constant 0 : i32
    %c0_i32_1 = arith.constant 0 : i32
    return %c0_i32, %c0_i32_0 : i32, i32
  }
  func.func @transform_9(%arg0: i32, %arg1: i32) -> (i32, i32, i32, i32) {
    %c0_i32 = arith.constant 0 : i32
    %c0_i32_0 = arith.constant 0 : i32
    %c0_i32_1 = arith.constant 0 : i32
    return %arg0, %arg1, %c0_i32, %c0_i32_0 : i32, i32, i32, i32
  }
}

</mosaic_0001>

<bundles_post_ra>
// kernel: tpu_custom_call.1
= control target key start
LH: loop header
LB: loop body
LE: loop exit
PB: predicated region body
PF: predicated region fallthrough
CT: control target
= control target key end

     0   :  { %s6952_s0 = inlined_call_operand.hbm [shape: f32[2,16,16,128], index: 0, kind: input, shape index: {}]   ;;  %s6953_s1 = inlined_call_operand.hbm [shape: f32[2,16,16,128], index: 1, kind: input, shape index: {}]   ;;  %s6954_s2 = inlined_call_operand.hbm [shape: f32[2,16,16,128], index: 2, kind: input, shape index: {}]   ;;  %s6955_s3 = inlined_call_operand.hbm [shape: bf16[128,128], index: 3, kind: input, shape index: {}]   ;;  %s6956_s4 = inlined_call_operand.vmem [shape: f32[1,128], index: 4, kind: input, shape index: {}]   ;;  %s6957_s5 = inlined_call_operand.vmem [shape: f32[1,128], index: 5, kind: input, shape index: {}]   ;;  %s6958_s6 = inlined_call_operand.hbm [shape: bf16[1152,128], index: 6, kind: input, shape index: {}]   ;;  %s6959_s7 = inlined_call_operand.vmem [shape: f32[1,128], index: 7, kind: input, shape index: {}]   ;;  %s6960_s8 = inlined_call_operand.vmem [shape: f32[1,128], index: 8, kind: input, shape index: {}]   ;;  %s6961_s9 = inlined_call_operand.hbm [shape: f32[2,16,16,128], index: 9, kind: output, shape index: {}]  }
   0x1   :  { %6998 = sst [smem:[#allocation31_spill]] %s6952_s0 }
   0x2   :  { %6999 = sst [smem:[#allocation32_spill]] %s6953_s1 }
   0x3   :  { %7000 = sst [smem:[#allocation33_spill]] %s6954_s2 }
   0x4   :  { %7001 = sst [smem:[#allocation34_spill]] %s6955_s3 }
   0x5   :  { %7002 = sst [smem:[#allocation35_spill]] %s6956_s4 }
   0x6   :  { %7003 = sst [smem:[#allocation36_spill]] %s6957_s5 }
   0x7   :  { %7004 = sst [smem:[#allocation37_spill]] %s6958_s6 }
   0x8   :  { %7005 = sst [smem:[#allocation38_spill]] %s6959_s7 }
   0x9   :  { %7006 = sst [smem:[#allocation39_spill]] %s6960_s8 }
   0xa   :  { %7007 = sst [smem:[#allocation40_spill]] %s6961_s9 }
   0xb   :  { %14 = vsyncpa [#allocation3], 0 }
   0xc   :  { %16 = vsyncpa [#allocation3 + $0x1], 0 }
   0xd   :  { %17 = vsyncpa [#allocation6], 0 }
   0xe   :  { %19 = vsyncpa [#allocation6 + $0x1], 0 }
   0xf   :  { %20 = vsyncpa [#allocation9], 0 }
  0x10   :  { %21 = vsyncpa [#allocation4], 0 }
  0x11   :  { %23 = vsyncpa [#allocation4 + $0x1], 0  ;;  %s5292_s30 = smov 0   ;;  %s5294_s10 = smov 0  }
  0x12   :  { %s5296_s11 = smov 0   ;;  %s5298_s12 = smov 0  }
  0x13   :  { %s5300_s13 = smov 0   ;;  %s5302_s14 = smov 0  }
  0x14   :  { %s5304_s15 = smov 0   ;;  %s5306_s16 = smov 0  }
  0x15   :  { %s5308_s17 = smov 0   ;;  %s5310_s18 = smov 0  }
  0x16   :  { %s5312_s19 = smov 0   ;;  %s5314_s20 = smov 0  }
  0x17   :  { %s5316_s21 = smov 0   ;;  %s5318_s22 = smov 0  }
  0x18 LB: > { %7008 = sst [smem:[#allocation17_spill]] %s5174_s30  ;;  %s5363_s23 = sadd.s32 4294967295, %s5226_s22   ;;  %s5226_s22 = sphi %s5318_s22, %s29_s22   ;;  %s5222_s21 = sphi %s5316_s21, %s7119_s21   ;;  %s5218_s20 = sphi %s5314_s20, %s7118_s20   ;;  %s5214_s19 = sphi %s5312_s19, %s7117_s19   ;;  %s5210_s18 = sphi %s5310_s18, %s7116_s18   ;;  %s5206_s17 = sphi %s5308_s17, %s7115_s17   ;;  %s5202_s16 = sphi %s5306_s16, %s7114_s16   ;;  %s5198_s15 = sphi %s5304_s15, %s7113_s15   ;;  %s5194_s14 = sphi %s5302_s14, %s7112_s14   ;;  %s5190_s13 = sphi %s5300_s13, %s7111_s13   ;;  %s5186_s12 = sphi %s5298_s12, %s7110_s12   ;;  %s5182_s11 = sphi %s5296_s11, %s7109_s11   ;;  %s5178_s10 = sphi %s5294_s10, %s7108_s10   ;;  %s5174_s30 = sphi %s5292_s30, %s7099_s30  }
  0x19   : > { %7009 = sst [smem:[#allocation18_spill]] %s5178_s10  ;;  %p3987_p0 = scmp.ge.s32.totalorder %s5226_s22, 1 }
  0x1a   : > { %7010 = sst [smem:[#allocation19_spill]] %s5182_s11  ;;  %p6963_p1 = scmp.eq.s32.totalorder %s5363_s23, 0 }
  0x1b   : > { %7011 = sst [smem:[#allocation20_spill]] %s5190_s13  ;;  %p300_p3 = scmp.lt.s32.totalorder %s5226_s22, 5 }
  0x1c   : > { %7012 = sst [smem:[#allocation21_spill]] %s5210_s18  ;;  %s5228_s25 = smov [#allocation8]  }
  0x1d   : > { %7013 = sst [smem:[#allocation22_spill]] %s5214_s19  ;;  %p5369_p4 = pnand %p3987_p0, %p300_p3 }
  0x1e   : > { %7014 = sst [smem:[#allocation23_spill]] %s5218_s20  ;;  %s312_s26 = sshll.u32 %s5228_s25, 4  ;;  %s313_s26 = int_to_ptr.vmem [resolvable:$true] %s312_s26 }
  0x1f   : > { %7015 = sst [smem:[#allocation24_spill]] %s5222_s21  ;;  %p4533_p5 = pneg %p5369_p4 }
  0x20   : > { %s7016_s24 = scalar_select %p5369_p4, 1, 0 }
  0x21   : > { %p5377_p6 = pnand %p4533_p5, %p6963_p1  ;;  %s7019_s3 = sld [smem:[#allocation34_spill]] }
  0x22   : > { %7017 = sst [smem:[#allocation25_spill]] %s7016_s24 }
  0x23   : > { %p6980_p8 = pneg %p5377_p6 }
  0x27   : > { %s4922_s9 = scalar_lea.hbm %s7019_s3, 1024 }
  0x28   : > { %p4923_p7 = scmp.ne.s32.totalorder %s7019_s3, %s4922_s9  ;;  %p4929_p11 = scmp.lt.u32.totalorder %s4922_s9, %s7019_s3 }
  0x2a   : > { %p4925_p9 = pnand %p6980_p8, %p4923_p7 }
  0x2c   : > { %p4926_p10 = pneg %p4925_p9 }
  0x2e   : > { %p4931_p12 = pnand %p4929_p11, %p4926_p10 }
  0x30   : > { %4934 = shalt.err (!%p4931_p12)
}
  0x31   : > { %s4935_s28 = scalar_lea.vmem %s313_s26, 1024  ;;  %p4943_p5 = scmp.lt.s32.totalorder %s313_s26, %s313_s26 }
  0x32   : > { %p4936_p13 = scmp.ne.s32.totalorder %s313_s26, %s4935_s28  ;;  %p4944_p2 = scmp.lt.s32.totalorder %s4935_s28, %s4935_s28 }
  0x34   : > { %p4938_p0 = pnand %p4936_p13, %p6980_p8  ;;  %p4945_p1 = por %p4944_p2, %p4943_p5 }
  0x36   : > { %p4939_p3 = pneg %p4938_p0 }
  0x38   : > { %p4946_p4 = pnand %p4945_p1, %p4939_p3 }
  0x3a   : > { %4949 = shalt.err (!%p4946_p4)
}
  0x3b   : > { %s6966_s8 = smov 64   ;;  %s6967_s7 = smov 4  }
  0x3c   : > { %4536 = dma.hbm_to_vmem [thread:$0]  (!%p5377_p6), %s7019_s3, 1024, %s313_s26, [#allocation9], %s6966_s8, %s6966_s8, %s6967_s7  }
  0x3d   : > { %s38_s29 = sadd.s32 1, %s5218_s20  ;;  %s41_s25 = sadd.s32 1, %s5222_s21 }
  0x3e   : > { %p39_p1 = scmp.ge.s32.totalorder %s38_s29, 2  ;;  %p6979_p2 = scmp.eq.s32.totalorder %s5226_s22, 0 }
  0x3f   : > { %s3981_s28 = sshll.u32 %s5218_s20, 3  ;;  %s86_s5 = sadd.s32 1, %s5194_s14 }
  0x40   : > { %s7121_s29 = smov (%p39_p1, %s38_s29), 0  ;;  %s7123_s25 = smov (!%p39_p1, %s41_s25), %s5222_s21 }
  0x41   : > { %7020 = sst [smem:[#allocation26_spill]] %s7121_s29  ;;  %s46_s4 = ssub.s32 %s5218_s20, %s7121_s29 }
  0x42   : > { %s3982_s18 = sadd.s32 4294967295, %s3981_s28  ;;  %p43_p4 = scmp.ge.s32.totalorder %s7123_s25, 2 }
  0x43   : > { %p75_p7 = scmp.gt.s32.totalorder %s3982_s18, 0  ;;  %s3983_s26 = sshll.u32 %s7121_s29, 3 }
  0x44   : > { %p93_p9 = scmp.ne.s32.totalorder %s5194_s14, %s5190_s13  ;;  %s7125_s25 = smov (%p43_p4, %s7123_s25), 0 }
  0x45   : > { %7021 = sst [smem:[#allocation27_spill]] %s7125_s25  ;;  %s7127_s18 = smov (!%p75_p7, %s3982_s18), 0 }
  0x46   : > { %s5423_s9 = ssub.s32 %s5222_s21, %s7125_s25  ;;  %s3984_s19 = sadd.s32 4294967295, %s3983_s26 }
  0x47   : > { %7022 = sst [smem:[#allocation28_spill]] %s5423_s9  ;;  %s5426_s8 = sor.u32 %s46_s4, %s5423_s9 }
  0x48   : > { %p79_p10 = scmp.gt.s32.totalorder %s3984_s19, 0  ;;  %p5431_p12 = por %p93_p9, %p6979_p2 }
  0x49   : > { %p99_p13 = scmp.ne.s32.totalorder %s5190_s13, %s5186_s12  ;;  %s5437_s3 = sadd.s32 8, %s3981_s28 }
  0x4a   : > { %s7129_s19 = smov (!%p79_p10, %s3984_s19), 0  ;;  %p7024_p3 = scmp.eq.s32.totalorder %s5363_s23, 0 }
  0x4b   : > { %s82_s25 = ssub.s32 %s7127_s18, %s7129_s19  ;;  %s5447_s24 = sadd.s32 8, %s3983_s26 }
  0x4c   : > { %s83_s4 = sor.u32 %s82_s25, %s5423_s9  ;;  %p5443_p5 = por %p99_p13, %p7024_p3 }
  0x4d   : > { %p84_p1 = scmp.eq.s32.totalorder %s83_s4, 0  ;;  %p6978_p7 = scmp.lt.s32.totalorder %s5226_s22, 4 }
  0x4e   : > { %s7025_s29 = scalar_select %p5443_p5, 1, 0 }
  0x4f   : > { %s5452_s12 = scalar_select %p84_p1, %s5194_s14, %s86_s5  }
  0x50   : > { %7026 = sst [smem:[#allocation29_spill]] %s7025_s29  ;;  %s5455_s28 = sshll.u32 %s5222_s21, 5 }
  0x51   : > { %s375_s19 = sand.u32 1, %s5226_s22   ;;  %s377_s25 = sand.u32 1, %s5194_s14  }
  0x52   : > { %s3996_s13 = sshll.u32 %s377_s25, 4  ;;  %s3999_s2 = sshll.u32 %s7127_s18, 1 }
  0x53   : > { %s389_s9 = sadd.s32 %s3999_s2, %s5455_s28  ;;  %s379_s29 = scalar_lea.vmem [#allocation5], %s3996_s13 }
  0x54   : > { %s4001_s30 = sshll.u32 %s389_s9, 7  ;;  %s392_s4 = sshll.u32 %s379_s29, 4  ;;  %s5465_s4 = int_to_ptr.vmem [resolvable:$true] %s392_s4 }
  0x55   : > { %s7027_s1 = sld [smem:[#allocation32_spill]]  ;;  %p5471_p9 = pnand %p6978_p7, %p5431_p12 }
  0x56   : > { %s5231_s2 = smov [#allocation10]  }
  0x57   : > { %s331_s13 = sshll.u32 %s5231_s2, 4  ;;  %p4952_p13 = pneg %p5471_p9  ;;  %s5475_s13 = int_to_ptr.vmem [resolvable:$true] %s331_s13 }
  0x5b   : > { %s5463_s26 = scalar_lea.hbm %s7027_s1, %s4001_s30  ;;  %s5477_s30 = scalar_lea.sflag [#allocation6], %s375_s19 }
  0x5c   : > { %s4950_s10 = scalar_lea.hbm %s5463_s26, 256  ;;  %s4955_s7 = scalar_lea.hbm %s7027_s1, 8192 }
  0x5d   : > { %p4951_p10 = scmp.ne.s32.totalorder %s5463_s26, %s4950_s10  ;;  %p4956_p12 = scmp.lt.u32.totalorder %s5463_s26, %s7027_s1 }
  0x5e   : > { %p4957_p4 = scmp.lt.u32.totalorder %s4955_s7, %s4950_s10  ;;  %p4959_p7 = scmp.lt.u32.totalorder %s4950_s10, %s5463_s26 }
  0x5f   : > { %p4953_p3 = pnand %p4952_p13, %p4951_p10 }
  0x60   : > { %p4958_p0 = por %p4957_p4, %p4956_p12 }
  0x61   : > { %p4954_p1 = pneg %p4953_p3 }
  0x62   : > { %p4960_p2 = por %p4959_p7, %p4958_p0 }
  0x64   : > { %p4961_p11 = pnand %p4960_p2, %p4954_p1 }
  0x66   : > { %4964 = shalt.err (!%p4961_p11)
}
  0x67   : > { %s4965_s19 = scalar_lea.vmem %s5465_s4, 256  ;;  %s5232_s25 = smov [#allocation5]  }
  0x68   : > { %p4966_p10 = scmp.ne.s32.totalorder %s5465_s4, %s4965_s19  ;;  %s4970_s2 = sshll.u32 %s5232_s25, 4  ;;  %s4971_s2 = int_to_ptr.vmem [resolvable:$false] %s4970_s2 }
  0x69   : > { %s4972_s11 = scalar_lea.vmem %s4971_s2, 512  ;;  %p4973_p5 = scmp.lt.s32.totalorder %s5465_s4, %s4971_s2 }
  0x6a   : > { %p4968_p3 = pnand %p4966_p10, %p4952_p13  ;;  %p4974_p4 = scmp.lt.s32.totalorder %s4972_s11, %s4965_s19 }
  0x6c   : > { %p4969_p8 = pneg %p4968_p3  ;;  %p4975_p12 = por %p4974_p4, %p4973_p5 }
  0x6e   : > { %p4976_p0 = pnand %p4975_p12, %p4969_p8 }
  0x70   : > { %4979 = shalt.err (!%p4976_p0)
}
  0x71   : > { %s6982_s10 = smov 128   ;;  %s6984_s18 = smov 8  }
  0x72   : > { %4546 = dma.hbm_to_vmem [thread:$0]  (!%p5471_p9), %s5463_s26, 256, %s5465_s4, %s5477_s30, %s6982_s10, %s6982_s10, %s6984_s18  }
  0x73   : > { %s7029_s6 = sld [smem:[#allocation37_spill]]  ;;  %p7030_p2 = pneg %p5377_p6 }
  0x79   : > { %s4980_s9 = scalar_lea.hbm %s7029_s6, 9216 }
  0x7a   : > { %p4981_p8 = scmp.ne.s32.totalorder %s7029_s6, %s4980_s9  ;;  %p4987_p7 = scmp.lt.u32.totalorder %s4980_s9, %s7029_s6 }
  0x7c   : > { %p4983_p11 = pnand %p4981_p8, %p7030_p2 }
  0x7e   : > { %p4984_p5 = pneg %p4983_p11 }
  0x80   : > { %p4989_p13 = pnand %p4987_p7, %p4984_p5 }
  0x82   : > { %4992 = shalt.err (!%p4989_p13)
}
  0x83   : > { %s4993_s4 = scalar_lea.vmem %s5475_s13, 9216  ;;  %p7031_p1 = pmov %p7030_p2 }
  0x84   : > { %p4994_p9 = scmp.ne.s32.totalorder %s5475_s13, %s4993_s4  ;;  %p5001_p4 = scmp.lt.s32.totalorder %s5475_s13, %s5475_s13 }
  0x85   : > { %p5002_p12 = scmp.lt.s32.totalorder %s4993_s4, %s4993_s4 }
  0x86   : > { %p4996_p10 = pnand %p4994_p9, %p7031_p1 }
  0x87   : > { %p5003_p0 = por %p5002_p12, %p5001_p4 }
  0x88   : > { %p4997_p3 = pneg %p4996_p10 }
  0x8a   : > { %p5004_p8 = pnand %p5003_p0, %p4997_p3 }
  0x8c   : > { %5007 = shalt.err (!%p5004_p8)
}
  0x8d   : > { %s7032_s26 = smov 4   ;;  %s7033_s5 = smov 64  }
  0x8e   : > { %4539 = dma.hbm_to_vmem [thread:$0]  (!%p5377_p6), %s7029_s6, 9216, %s5475_s13, [#allocation9], %s7033_s5, %s7033_s5, %s7032_s26  }
  0x8f   : > { %s3980_s27 = sadd.s32 4294967294, %s5226_s22   ;;  %s50_s9 = sadd.s32 1, %s5206_s17 }
  0x90   : > { %p57_p2 = scmp.ne.s32.totalorder %s5206_s17, %s5202_s16  ;;  %p7034_p11 = scmp.eq.s32.totalorder %s5426_s8, 0 }
  0x91   : > { %p7035_p5 = scmp.eq.s32.totalorder %s5226_s22, 0  ;;  %p63_p13 = scmp.ne.s32.totalorder %s5202_s16, %s5198_s15 }
  0x92   : > { %s5543_s19 = scalar_select %p7034_p11, %s5206_s17, %s50_s9  }
  0x93   : > { %p5547_p7 = por %p7035_p5, %p57_p2  ;;  %p7037_p9 = scmp.eq.s32.totalorder %s5363_s23, 3 }
  0x94   : > { %p293_p6 = scmp.eq.s32.totalorder %s3980_s27, 3  ;;  %p7040_p10 = scmp.eq.s32.totalorder %s5363_s23, 0 }
  0x95   : > { %p5555_p1 = por %p7037_p9, %p57_p2  ;;  %s351_s8 = sand.u32 1, %s5206_s17  }
  0x96   : > { %p5561_p3 = por %p7040_p10, %p63_p13  ;;  %p5566_p4 = por %p293_p6, %p63_p13 }
  0x97   : > { %s7038_s2 = scalar_select %p5555_p1, 1, 0 }
  0x98   : > { %s7042_s11 = scalar_select %p5566_p4, 1, 0 }
  0x99   : > { %7039 = sst [smem:[#allocation30_spill]] %s7038_s2  ;;  %s3991_s4 = sshll.u32 %s351_s8, 7 }
  0x9a   : > { %s4157_s26 = sshll.u32 %s5218_s20, 4  ;;  %s355_s29 = scalar_lea.vmem [#allocation2], %s3991_s4 }
  0x9b   : > { %s362_s5 = sadd.s32 %s4157_s26, %s5455_s28  ;;  %s365_s9 = sshll.u32 %s355_s29, 4  ;;  %s5577_s9 = int_to_ptr.vmem [resolvable:$true] %s365_s9 }
  0x9c   : > { %s3995_s7 = sshll.u32 %s362_s5, 7  ;;  %s7043_s0 = sld [smem:[#allocation31_spill]] }
  0x9d   : > { %p7044_p12 = scmp.lt.s32.totalorder %s5226_s22, 4  ;;  %s5587_s4 = scalar_lea.sflag [#allocation3], %s351_s8 }
  0x9f   : > { %p5583_p0 = pnand %p7044_p12, %p5547_p7 }
  0xa1   : > { %p5010_p2 = pneg %p5583_p0 }
  0xa2   : > { %s5575_s27 = scalar_lea.hbm %s7043_s0, %s3995_s7  ;;  %s5013_s25 = scalar_lea.hbm %s7043_s0, 8192 }
  0xa3   : > { %s5008_s26 = scalar_lea.hbm %s5575_s27, 2048  ;;  %p5014_p7 = scmp.lt.u32.totalorder %s5575_s27, %s7043_s0 }
  0xa4   : > { %p5009_p8 = scmp.ne.s32.totalorder %s5575_s27, %s5008_s26  ;;  %p5015_p13 = scmp.lt.u32.totalorder %s5013_s25, %s5008_s26 }
  0xa5   : > { %p5017_p6 = scmp.lt.u32.totalorder %s5008_s26, %s5575_s27 }
  0xa6   : > { %p5011_p11 = pnand %p5010_p2, %p5009_p8  ;;  %p5016_p9 = por %p5015_p13, %p5014_p7 }
  0xa8   : > { %p5012_p5 = pneg %p5011_p11  ;;  %p5018_p10 = por %p5017_p6, %p5016_p9 }
  0xaa   : > { %p5019_p12 = pnand %p5018_p10, %p5012_p5 }
  0xac   : > { %5022 = shalt.err (!%p5019_p12)
}
  0xad   : > { %s5023_s8 = scalar_lea.vmem %s5577_s9, 2048  ;;  %s5235_s29 = smov [#allocation2]  }
  0xae   : > { %p5024_p8 = scmp.ne.s32.totalorder %s5577_s9, %s5023_s8  ;;  %s5028_s10 = sshll.u32 %s5235_s29, 4  ;;  %s5029_s10 = int_to_ptr.vmem [resolvable:$false] %s5028_s10 }
  0xaf   : > { %s5030_s18 = scalar_lea.vmem %s5029_s10, 4096  ;;  %p5031_p1 = scmp.lt.s32.totalorder %s5577_s9, %s5029_s10 }
  0xb0   : > { %p5026_p11 = pnand %p5024_p8, %p5010_p2  ;;  %p5032_p7 = scmp.lt.s32.totalorder %s5030_s18, %s5023_s8 }
  0xb2   : > { %p5027_p4 = pneg %p5026_p11  ;;  %p5033_p13 = por %p5032_p7, %p5031_p1 }
  0xb4   : > { %p5034_p9 = pnand %p5033_p13, %p5027_p4 }
  0xb6   : > { %5037 = shalt.err (!%p5034_p9)
}
  0xb7   : > { %s7046_s26 = smov 8   ;;  %s7047_s25 = smov 128  }
  0xb8   : > { %s7048_s5 = sld [smem:[#allocation19_spill]]  ;;  %s7049_s7 = sld [smem:[#allocation18_spill]] }
  0xb9   : > { %s7050_s29 = sld [smem:[#allocation17_spill]]  ;;  %s7051_s8 = sld [smem:[#allocation28_spill]] }
  0xba   : > { %4543 = dma.hbm_to_vmem [thread:$0]  (!%p5583_p0), %s5575_s27, 2048, %s5577_s9, %s5587_s4, %s7047_s25, %s7047_s25, %s7046_s26  }
  0xbb   : > { %p7052_p1 = scmp.lt.s32.totalorder %s5437_s3, 15  ;;  %p7053_p4 = scmp.lt.s32.totalorder %s5447_s24, 15 }
  0xbc   : > { %p7054_p6 = scmp.eq.s32.totalorder %s5226_s22, 0  ;;  %p7056_p8 = scmp.eq.s32.totalorder %s5363_s23, 0 }
  0xbd   : > { %s7131_s3 = smov (!%p7052_p1, %s5437_s3), 15  ;;  %s7133_s24 = smov (!%p7053_p4, %s5447_s24), 15 }
  0xbe   : > { %s122_s1 = sadd.s32 1, %s7048_s5  ;;  %p129_p2 = scmp.ne.s32.totalorder %s7048_s5, %s7049_s7 }
  0xbf   : > { %s118_s10 = ssub.s32 %s7131_s3, %s7133_s24  ;;  %p135_p5 = scmp.ne.s32.totalorder %s7049_s7, %s7050_s29 }
  0xc0   : > { %s119_s18 = sor.u32 %s118_s10, %s7051_s8  ;;  %p5632_p10 = por %p129_p2, %p7054_p6 }
  0xc1   : > { %p120_p12 = scmp.eq.s32.totalorder %s119_s18, 0  ;;  %p5638_p11 = por %p135_p5, %p7056_p8 }
  0xc2   : > { %s404_s27 = sand.u32 1, %s7048_s5   ;;  %s4004_s4 = sshll.u32 %s7131_s3, 1 }
  0xc3   : > { %s7057_s9 = scalar_select %p5638_p11, 1, 0 }
  0xc4   : > { %s7135_s5 = smov (!%p120_p12, %s7048_s5), %s122_s1  ;;  %s4002_s24 = sshll.u32 %s404_s27, 4 }
  0xc5   : > { %s416_s6 = sadd.s32 %s4004_s4, %s5455_s28  ;;  %s7058_s10 = sld [smem:[#allocation33_spill]] }
  0xc6   : > { %s4006_s7 = sshll.u32 %s416_s6, 7  ;;  %s406_s18 = scalar_lea.vmem [#allocation7], %s4002_s24 }
  0xc7   : > { %s419_s20 = sshll.u32 %s406_s18, 4  ;;  %p7060_p0 = scmp.lt.s32.totalorder %s5226_s22, 4  ;;  %s5652_s20 = int_to_ptr.vmem [resolvable:$true] %s419_s20 }
  0xc9   : > { %p5658_p7 = pnand %p7060_p0, %p5632_p10 }
  0xcb   : > { %s7059_s2 = smov %s7058_s10  ;;  %s5650_s21 = scalar_lea.hbm %s7058_s10, %s4006_s7 }
  0xcc   : > { %s5038_s6 = scalar_lea.hbm %s5650_s21, 256  ;;  %p5040_p9 = pneg %p5658_p7 }
  0xcd   : > { %p5039_p13 = scmp.ne.s32.totalorder %s5650_s21, %s5038_s6  ;;  %s5043_s27 = scalar_lea.hbm %s7059_s2, 8192 }
  0xce   : > { %p5044_p2 = scmp.lt.u32.totalorder %s5650_s21, %s7059_s2  ;;  %p5045_p5 = scmp.lt.u32.totalorder %s5043_s27, %s5038_s6 }
  0xcf   : > { %p5041_p1 = pnand %p5040_p9, %p5039_p13  ;;  %p5047_p10 = scmp.lt.u32.totalorder %s5038_s6, %s5650_s21 }
  0xd0   : > { %p5046_p6 = por %p5045_p5, %p5044_p2 }
  0xd1   : > { %p5042_p4 = pneg %p5041_p1 }
  0xd2   : > { %p5048_p12 = por %p5047_p10, %p5046_p6 }
  0xd4   : > { %p5049_p8 = pnand %p5048_p12, %p5042_p4 }
  0xd6   : > { %5052 = shalt.err (!%p5049_p8)
}
  0xd7   : > { %s5053_s24 = scalar_lea.vmem %s5652_s20, 256  ;;  %s5236_s7 = smov [#allocation7]  }
  0xd8   : > { %p5054_p0 = scmp.ne.s32.totalorder %s5652_s20, %s5053_s24  ;;  %s5058_s29 = sshll.u32 %s5236_s7, 4  ;;  %s5059_s29 = int_to_ptr.vmem [resolvable:$false] %s5058_s29 }
  0xd9   : > { %s5060_s8 = scalar_lea.vmem %s5059_s29, 512  ;;  %p5061_p11 = scmp.lt.s32.totalorder %s5652_s20, %s5059_s29 }
  0xda   : > { %p5056_p13 = pnand %p5054_p0, %p5040_p9  ;;  %p5062_p2 = scmp.lt.s32.totalorder %s5060_s8, %s5053_s24 }
  0xdc   : > { %p5057_p1 = pneg %p5056_p13  ;;  %p5063_p5 = por %p5062_p2, %p5061_p11 }
  0xde   : > { %p5064_p6 = pnand %p5063_p5, %p5057_p1 }
  0xe0   : > { %5067 = shalt.err (!%p5064_p6)
}
  0xe1   : > { %4549 = dma.hbm_to_vmem [thread:$0]  (!%p5658_p7), %s5650_s21, 256, %s5652_s20, %s5477_s30, %s7047_s25, %s7047_s25, %s7046_s26  }
  0xe2   : > { %s7062_s10 = sld [smem:[#allocation25_spill]] }
  0xe8   : > { %p7063_p9 = scmp.ne.s32.totalorder %s7062_s10, 0 }
  0xe9   : > { %s5694_s18 = sand.u32 (!%p7063_p9), 1, %s5202_s16  }
  0xea   : > { %431 = sbr.rel (%p7063_p9) target bundleno = 998 (0x3e6), region = 56  ;;  %s4008_s6 = sshll.u32 (!%p7063_p9), %s5694_s18, 7 }
  0xeb   : > { %s434_s28 = scalar_lea.sflag (!%p7063_p9), [#allocation3], %s5694_s18  ;;  %s5700_s3 = scalar_lea.vmem (!%p7063_p9), [#allocation2], %s4008_s6 }
  0xf1   : > { %5153 = dma.done.wait (%p5561_p3), %s434_s28, 2048  }
  0xf2   : > { %5155 = vsyncadd (%p5561_p3), %s434_s28, 4294965248  ;;  %s7064_s20 = sld [smem:[#allocation20_spill]]  ;;  %s7065_s21 = sld [smem:[#allocation29_spill]] }
  0xf3   : > { %s442_s30 = sand.u32 1, %s5363_s23  }
  0xf4   : > { %s443_s1 = scalar_lea.sflag [#allocation6], %s442_s30 }
  0xf8   : > { %s444_s26 = sand.u32 1, %s7064_s20   ;;  %p7066_p11 = scmp.ne.s32.totalorder %s7065_s21, 0 }
  0xf9   : > { %s4009_s25 = sshll.u32 %s444_s26, 4 }
  0xfa   : > { %s446_s27 = scalar_lea.vmem [#allocation5], %s4009_s25 }
  0xfb   : > { %5157 = dma.done.wait (%p7066_p11), %s443_s1, 256  }
  0xfc   : > { %5159 = vsyncadd (%p7066_p11), %s443_s1, 4294967040  ;;  %s7067_s0 = sld [smem:[#allocation18_spill]]  ;;  %p7068_p3 = scmp.ne.s32.totalorder %s7057_s9, 0 }
 0x102   : > { %s453_s4 = sand.u32 1, %s7067_s0  }
 0x103   : > { %s5713_s24 = sshll.u32 %s453_s4, 4 }
 0x104   : > { %s455_s13 = scalar_lea.vmem [#allocation7], %s5713_s24 }
 0x105   : > { %5161 = dma.done.wait (%p7068_p3), %s443_s1, 256  }
 0x106   : > { %5163 = vsyncadd (%p7068_p3), %s443_s1, 4294967040  ;;  %p7069_p7 = scmp.eq.s32.totalorder %s5363_s23, 0 }
 0x108   : > { %5165 = dma.done.wait (%p7069_p7), [#allocation9], 10240   ;;  %p7070_p4 = pmov %p7069_p7 }
 0x109   : > { %v4682_v0 = vld [vmem:[#allocation8] sm:$0xff]   ;;  %v4683_v1 = vld [vmem:[#allocation8 + $0x8] sm:$0xff]   ;;  %v4684_v2 = vld [vmem:[#allocation8 + $0x10] sm:$0xff]   ;;  %s7071_s23 = sld [smem:[#allocation21_spill]]  ;;  %vm5237_vm3 = vmmov 1   ;;  %s7072_s10 = sld [smem:[#allocation35_spill]] }
 0x10a   : > { %5167 = vsyncadd (%p7070_p4), [#allocation9], 4294957056  ;;  %4449 = vmatprep.subr.bf16.mxu0 %v4682_v0  ;;  %v4685_v3 = vld [vmem:[#allocation8 + $0x18] sm:$0xff]   ;;  %v521_v4 = vld [vmem:[%s446_s27] sm:$0xff]  ;;  %s7073_s21 = sld [smem:[#allocation36_spill]]  ;;  %s7091_s25 = sld [smem:[#allocation38_spill]] }
 0x10b   : > { %4450 = vmatpush3.bf16.msra.mxu0 %v4682_v0  ;;  %v522_v5 = vld [vmem:[%s446_s27 + $0x8] sm:$0xff]  ;;  %v4686_v7 = vld [vmem:[#allocation8 + $0x20] sm:$0xff]   ;;  %v4688_v9 = vld [vmem:[#allocation8 + $0x30] sm:$0xff]   ;;  %s7092_s0 = sld [smem:[#allocation39_spill]]  ;;  %s6822_s4 = scalar_lea.vmem [#allocation11], %s4008_s6 }
 0x10c   : > { %4451 = vmatprep.subr.bf16.mxu0 %v4683_v1  ;;  %v523_v6 = vpack.c.bf16 %v522_v5, %v521_v4  ;;  %v4687_v8 = vld [vmem:[#allocation8 + $0x28] sm:$0xff]   ;;  %v4689_v10 = vld [vmem:[#allocation8 + $0x38] sm:$0xff]   ;;  %v524_v11 = vld [vmem:[%s5700_s3] sm:$0xff]  ;;  %s7093_s6 = sld [smem:[#allocation22_spill]]  ;;  %s7094_s29 = sld [smem:[#allocation30_spill]] }
 0x10d   : > { %v525_v12 = vld [vmem:[%s5700_s3 + $0x8] sm:$0xff]  ;;  %v526_v13 = vld [vmem:[%s5700_s3 + $0x10] sm:$0xff]  ;;  %v527_v14 = vld [vmem:[%s5700_s3 + $0x18] sm:$0xff]  ;;  %s7095_s28 = sld [smem:[#allocation40_spill]]  ;;  %s5239_s26 = smov [#allocation11]  }
 0x10e   : > { %4465 = vmatprep.mubr.bf16.mxu0 %v523_v6  ;;  %v540_v15 = vpack.c.bf16 %v525_v12, %v524_v11  ;;  %v541_v16 = vpack.c.bf16 %v527_v14, %v526_v13  ;;  %v528_v17 = vld [vmem:[%s5700_s3 + $0x20] sm:$0xff]  ;;  %v529_v18 = vld [vmem:[%s5700_s3 + $0x28] sm:$0xff]  ;;  %v530_v19 = vld [vmem:[%s5700_s3 + $0x30] sm:$0xff] }
 0x10f   : > { %4452 = vmatpush3.bf16.msra.mxu0 %v4683_v1  ;;  %v531_v20 = vld [vmem:[%s5700_s3 + $0x38] sm:$0xff]  ;;  %v542_v21 = vpack.c.bf16 %v529_v18, %v528_v17  ;;  %v532_v23 = vld [vmem:[%s5700_s3 + $0x40] sm:$0xff]  ;;  %v533_v24 = vld [vmem:[%s5700_s3 + $0x48] sm:$0xff]  ;;  %p963_p10 = scmp.gt.s32.totalorder %s7071_s23, 0  ;;  %p1007_p12 = scmp.lt.s32.totalorder %s7071_s23, 1 }
 0x110   : > { %4453 = vmatprep.subr.bf16.mxu0 %v4684_v2  ;;  %v543_v22 = vpack.c.bf16 %v531_v20, %v530_v19  ;;  %v534_v25 = vld [vmem:[%s5700_s3 + $0x50] sm:$0xff]  ;;  %v535_v26 = vld [vmem:[%s5700_s3 + $0x58] sm:$0xff]  ;;  %v544_v27 = vpack.c.bf16 %v533_v24, %v532_v23  ;;  %v536_v29 = vld [vmem:[%s5700_s3 + $0x60] sm:$0xff]  ;;  %s4158_s24 = sshll.u32 %s7071_s23, 4  ;;  %s3821_s23 = sshll.u32 %s6822_s4, 4  ;;  %s6865_s23 = int_to_ptr.vmem [resolvable:$true] %s3821_s23 }
 0x111   : > { %v545_v28 = vpack.c.bf16 %v535_v26, %v534_v25  ;;  %v537_v30 = vld [vmem:[%s5700_s3 + $0x68] sm:$0xff]  ;;  %v538_v31 = vld [vmem:[%s5700_s3 + $0x70] sm:$0xff]  ;;  %v539_v32 = vld [vmem:[%s5700_s3 + $0x78] sm:$0xff]  ;;  %s5765_s9 = scalar_select %p963_p10, 1, 0 }
 0x112   : > { %v546_v33 = vpack.c.bf16 %v537_v30, %v536_v29  ;;  %v547_v34 = vpack.c.bf16 %v539_v32, %v538_v31  ;;  %v548_v35 = vld [vmem:[%s455_s13] sm:$0xff]  ;;  %v549_v36 = vld [vmem:[%s455_s13 + $0x8] sm:$0xff]  ;;  %vm1410_vm4 = vmpackc.low %vm5237_vm3, %vm5237_vm3  ;;  %s5810_s7 = scalar_select %p1007_p12, 1, 0 }
 0x113   : > { %4454 = vmatpush3.bf16.msra.mxu0 %v4684_v2  ;;  %v550_v37 = vpack.c.bf16 %v549_v36, %v548_v35  ;;  %v4690_v38 = vld [vmem:[#allocation10 + $0xc0] sm:$0xff]   ;;  %v4694_v41 = vld [vmem:[#allocation10 + $0xc8] sm:$0xff]   ;;  %v4698_v45 = vld [vmem:[#allocation10 + $0xd0] sm:$0xff]   ;;  %s4153_s13 = sshll.u32 %s7093_s6, 5  ;;  %s5068_s30 = scalar_lea.vmem %s6865_s23, 2048 }
 0x114   : > { %4455 = vmatprep.subr.bf16.mxu0 %v4685_v3  ;;  %v4691_v39 = vld [vmem:[#allocation10 + $0x80] sm:$0xff]   ;;  %v4695_v43 = vld [vmem:[#allocation10 + $0x88] sm:$0xff]   ;;  %v4699_v47 = vld [vmem:[#allocation10 + $0x90] sm:$0xff]   ;;  %p5069_p8 = scmp.ne.s32.totalorder %s6865_s23, %s5068_s30  ;;  %p7096_p0 = scmp.ne.s32.totalorder %s7094_s29, 0 }
 0x115   : > { %v4692_v40 = vld [vmem:[#allocation10 + $0x40] sm:$0xff]   ;;  %v4696_v44 = vld [vmem:[#allocation10 + $0x48] sm:$0xff]   ;;  %v4700_v48 = vld [vmem:[#allocation10 + $0x50] sm:$0xff]  }
 0x116   : > { %v4693_v42 = vld [vmem:[#allocation10] sm:$0xff]   ;;  %4177 = vmatprep.subr.bf16.mxu1 %v4692_v40  ;;  %v4697_v46 = vld [vmem:[#allocation10 + $0x8] sm:$0xff]   ;;  %v4702_v49 = vld [vmem:[#allocation10 + $0xd8] sm:$0xff]   ;;  %p5070_p13 = pnand %p5069_p8, %p7096_p0 }
 0x117   : > { %4456 = vmatpush3.bf16.msra.mxu0 %v4685_v3  ;;  %4178 = vmatpush3.bf16.msra.mxu1 %v4693_v42  ;;  %v4701_v50 = vld [vmem:[#allocation10 + $0x10] sm:$0xff]   ;;  %v4703_v51 = vld [vmem:[#allocation10 + $0x98] sm:$0xff]   ;;  %v4706_v53 = vld [vmem:[#allocation10 + $0xe0] sm:$0xff]  }
 0x118   : > { %4457 = vmatprep.subr.bf16.mxu0 %v4686_v7  ;;  %4179 = vmatprep.subr.bf16.mxu1 %v4696_v44  ;;  %v4704_v52 = vld [vmem:[#allocation10 + $0x58] sm:$0xff]   ;;  %v4707_v55 = vld [vmem:[#allocation10 + $0xa0] sm:$0xff]   ;;  %v4710_v57 = vld [vmem:[#allocation10 + $0xe8] sm:$0xff]   ;;  %p5071_p1 = pneg %p5070_p13 }
 0x119   : > { %v4705_v54 = vld [vmem:[#allocation10 + $0x18] sm:$0xff]   ;;  %v4708_v56 = vld [vmem:[#allocation10 + $0x60] sm:$0xff]   ;;  %v4711_v59 = vld [vmem:[#allocation10 + $0xa8] sm:$0xff]  }
 0x11a   : > { %v4709_v58 = vld [vmem:[#allocation10 + $0x20] sm:$0xff]   ;;  %v4712_v60 = vld [vmem:[#allocation10 + $0x68] sm:$0xff]   ;;  %v4714_v61 = vld [vmem:[#allocation10 + $0xf0] sm:$0xff]  }
 0x11b   : > { %4458 = vmatpush3.bf16.msra.mxu0 %v4686_v7  ;;  %4180 = vmatpush3.bf16.msra.mxu1 %v4697_v46  ;;  %v4713_v62 = vld [vmem:[#allocation10 + $0x28] sm:$0xff]   ;;  %v4715_v63 = vld [vmem:[#allocation10 + $0xb0] sm:$0xff]   ;;  %v4718_v1 = vld [vmem:[#allocation10 + $0xf8] sm:$0xff]   ;;  %v922_v7 = vlaneseq }
 0x11c   : > { %4459 = vmatprep.subr.bf16.mxu0 %v4687_v8  ;;  %4181 = vmatprep.subr.bf16.mxu1 %v4700_v48  ;;  %v4716_v0 = vld [vmem:[#allocation10 + $0x70] sm:$0xff]   ;;  %v4719_v3 = vld [vmem:[#allocation10 + $0xb8] sm:$0xff]   ;;  %v4722_v6 = vld [vmem:[#allocation10 + $0x140] sm:$0xff]  }
 0x11d   : > { %v4717_v2 = vld [vmem:[#allocation10 + $0x30] sm:$0xff]   ;;  %v4720_v4 = vld [vmem:[#allocation10 + $0x78] sm:$0xff]  }
 0x11e   : > { %v4721_v5 = vld [vmem:[#allocation10 + $0x38] sm:$0xff]  }
 0x11f   : > { %4460 = vmatpush3.bf16.msra.mxu0 %v4687_v8  ;;  %4182 = vmatpush3.bf16.msra.mxu1 %v4701_v50  ;;  %v5744_v8 = vshrl.u32 %v922_v7, 7  ;;  %v965_v50 = vstv %s5765_s9  ;;  %s3818_s9 = sadd.s32 %s4158_s24, %s4153_s13 }
 0x120   : > { %4461 = vmatprep.subr.bf16.mxu0 %v4688_v9  ;;  %4183 = vmatprep.subr.bf16.mxu1 %v4704_v52 }
 0x121   : > { %v924_v11 = vadd.s32 8, %v5744_v8  ;;  %v926_v13 = vadd.s32 24, %v5744_v8  ;;  %v927_v17 = vadd.s32 32, %v5744_v8  ;;  %v930_v19 = vadd.s32 56, %v5744_v8 }
 0x122   : > { %v929_v24 = vadd.s32 48, %v5744_v8  ;;  %v931_v31 = vadd.s32 64, %v5744_v8  ;;  %v933_v42 = vadd.s32 80, %v5744_v8 }
 0x123   : > { %4462 = vmatpush3.bf16.msra.mxu0 %v4688_v9  ;;  %4184 = vmatpush3.bf16.msra.mxu1 %v4705_v54  ;;  %v925_v9 = vadd.s32 16, %v5744_v8  ;;  %v1146_v20 = vand.u32 15, %v926_v13  ;;  %v1153_v23 = vand.u32 15, %v927_v17  ;;  %v1174_v25 = vand.u32 15, %v930_v19 }
 0x124   : > { %4463 = vmatprep.subr.bf16.mxu0 %v4689_v10  ;;  %4185 = vmatprep.subr.bf16.mxu1 %v4708_v56  ;;  %v1167_v30 = vand.u32 15, %v929_v24  ;;  %v1195_v52 = vand.u32 15, %v933_v42  ;;  %v934_v56 = vadd.s32 88, %v5744_v8 }
 0x125   : > { %v1139_v12 = vand.u32 15, %v925_v9  ;;  %v1548_v26 = vadd.s32 1, %v1146_v20  ;;  %v1317_v29 = vadd.s32 4294967295, %v1153_v23  ;;  %v1552_v32 = vadd.s32 1, %v1174_v25 }
 0x126   : > { %v1202_v7 = vand.u32 15, %v934_v56 }
 0x127   : > { %4464 = vmatpush3.bf16.msra.mxu0 %v4689_v10  ;;  %4186 = vmatpush3.bf16.msra.mxu1 %v4709_v58  ;;  %v1125_v10 = vand.u32 15, %v5744_v8  ;;  %v1315_v18 = vadd.s32 4294967295, %v1139_v12  ;;  %vm1580_vm7 = vcmp.lt.s32.totalorder %v1548_v26, 16  ;;  %vm1333_vm10 = vcmp.ge.s32.totalorder %v1317_v29, 0 }
 0x128   : > { %4241 = vmatprep.subr.bf16.mxu0 %v4690_v38  ;;  %4187 = vmatprep.subr.bf16.mxu1 %v4712_v60  ;;  %v1181_v38 = vand.u32 15, %v931_v31  ;;  %vm1644_vm11 = vmpackc.low %vm1580_vm7, %vm1580_vm7  ;;  %vm1584_vm12 = vcmp.lt.s32.totalorder %v1552_v32, 16  ;;  %v1556_v20 = vadd.s32 1, %v1202_v7 }
 0x129   : > { %v1313_v14 = vadd.s32 4294967295, %v1125_v10  ;;  %vm1331_vm1 = vcmp.ge.s32.totalorder %v1315_v18, 0  ;;  %vm1413_vm14 = vmpackc.low %vm1333_vm10, %vm1333_vm10  ;;  %v935_v10 = vadd.s32 96, %v5744_v8 }
 0x12a   : > { %4466 = vmatmul.mubr.bf16.vlgmr.msra.gmra.mrb[0].mxu0 %v540_v15  ;;  %v928_v15 = vadd.s32 40, %v5744_v8  ;;  %vm1411_vm5 = vmpackc.low %vm1331_vm1, %vm1331_vm1  ;;  %vm1588_vm10 = vcmp.lt.s32.totalorder %v1556_v20, 16 }
 0x12b   : > { %4469 = vmatprep.mubr.bf16.mxu0 %v541_v16  ;;  %4242 = vmatpush3.bf16.msra.mxu0 %v4691_v39  ;;  %v1132_v16 = vand.u32 15, %v924_v11  ;;  %vm1329_vm0 = vcmp.ge.s32.totalorder %v1313_v14, 0  ;;  %v932_v39 = vadd.s32 72, %v5744_v8  ;;  %v1209_v24 = vand.u32 15, %v935_v10 }
 0x12c   : > { %4243 = vmatprep.subr.bf16.mxu0 %v4694_v41  ;;  %4188 = vmatpush3.bf16.msra.mxu1 %v4713_v62  ;;  %vm1409_vm2 = vmpackc.low %vm1329_vm0, %vm1329_vm0 }
 0x12d   : > { %4189 = vmatprep.subr.bf16.mxu1 %v4716_v0  ;;  %vm1648_vm0 = vmpackc.low %vm1584_vm12, %vm1584_vm12  ;;  %v1188_v46 = vand.u32 15, %v932_v39 }
 0x12f   : > { %4244 = vmatpush3.bf16.msra.mxu0 %v4695_v43 }
 0x130   : > { %4245 = vmatprep.subr.bf16.mxu0 %v4698_v45  ;;  %4190 = vmatpush3.bf16.msra.mxu1 %v4717_v2  ;;  %v1321_v45 = vadd.s32 4294967295, %v1181_v38  ;;  %v1323_v2 = vadd.s32 4294967295, %v1195_v52 }
 0x131   : > { %4191 = vmatprep.subr.bf16.mxu1 %v4720_v4 }
 0x132   : > { %4470 = vmatmul.mubr.bf16.gmra.mrb[4].mxu0 %v542_v21  ;;  %v1160_v21 = vand.u32 15, %v928_v15  ;;  %vm1339_vm7 = vcmp.ge.s32.totalorder %v1323_v2, 0 }
 0x133   : > { %4473 = vmatprep.mubr.bf16.mxu0 %v543_v22  ;;  %4246 = vmatpush3.bf16.msra.mxu0 %v4699_v47  ;;  %v1546_v22 = vadd.s32 1, %v1132_v16 }
 0x134   : > { %4247 = vmatprep.subr.bf16.mxu0 %v4702_v49  ;;  %4192 = vmatpush3.bf16.msra.mxu1 %v4721_v5 }
 0x135   : > { %4305 = vmatprep.subr.bf16.mxu1 %v4722_v6  ;;  %vm1578_vm6 = vcmp.lt.s32.totalorder %v1546_v22, 16 }
 0x136   : > { %vm1642_vm8 = vmpackc.low %vm1578_vm6, %vm1578_vm6  ;;  %vm1697_vm6 = vsmask.f32 256 }
 0x137   : > { %4248 = vmatpush3.bf16.msra.mxu0 %v4703_v51 }
 0x138   : > { %4249 = vmatprep.subr.bf16.mxu0 %v4706_v53 }
 0x13a   : > { %4474 = vmatmul.mubr.bf16.gmra.mrb[8].mxu0 %v544_v27  ;;  %v4730_v27 = vld [vmem:[#allocation10 + $0x1c0] sm:$0xff]  }
 0x13b   : > { %4477 = vmatprep.mubr.bf16.mxu0 %v545_v28  ;;  %4250 = vmatpush3.bf16.msra.mxu0 %v4707_v55  ;;  %v1550_v28 = vadd.s32 1, %v1160_v21 }
 0x13c   : > { %4251 = vmatprep.subr.bf16.mxu0 %v4710_v57 }
 0x13d   : > { %vm1582_vm9 = vcmp.lt.s32.totalorder %v1550_v28, 16  ;;  %v937_v28 = vadd.s32 112, %v5744_v8 }
 0x13e   : > { %vm1646_vm13 = vmpackc.low %vm1582_vm9, %vm1582_vm9 }
 0x13f   : > { %4252 = vmatpush3.bf16.msra.mxu0 %v4711_v59  ;;  %v1554_v59 = vadd.s32 1, %v1188_v46  ;;  %vm1419_vm9 = vmpackc.low %vm1339_vm7, %vm1339_vm7 }
 0x140   : > { %4253 = vmatprep.subr.bf16.mxu0 %v4714_v61 }
 0x142   : > { %4478 = vmatmul.mubr.bf16.gmra.mrb[12].mxu0 %v546_v33  ;;  %v6997_v33 = vmov 0  }
 0x143   : > { %4481 = vmatprep.mubr.bf16.mxu0 %v547_v34  ;;  %4254 = vmatpush3.bf16.msra.mxu0 %v4715_v63  ;;  %v1425_v34 = vsel %vm1409_vm2, 65537, %v6997_v33  ;;  %v5758_v35 = vsel %vm1410_vm4, 65537, %v6997_v33  ;;  %v1427_v36 = vsel %vm1411_vm5, 65537, %v6997_v33  ;;  %v1658_v41 = vsel %vm1642_vm8, 65537, %v6997_v33 }
 0x144   : > { %4255 = vmatprep.subr.bf16.mxu0 %v4718_v1  ;;  %v4044_v40 = vcombine.low %v1425_v34, %v5758_v35  ;;  %v5770_v43 = vcombine.low %v1427_v36, %v5758_v35  ;;  %v1660_v44 = vsel %vm1644_vm11, 65537, %v6997_v33  ;;  %v5774_v48 = vcombine.low %v5758_v35, %v1658_v41  ;;  %vm1652_vm11 = vmpackc.low %vm1588_vm10, %vm1588_vm10 }
 0x145   : > { %v1662_v49 = vsel %vm1646_vm13, 65537, %v6997_v33  ;;  %v1429_v51 = vsel %vm1413_vm14, 65537, %v6997_v33  ;;  %v4053_v54 = vcombine.low %v5758_v35, %v1660_v44  ;;  %v1664_v55 = vsel %vm1648_vm0, 65537, %v6997_v33 }
 0x146   : > { %v1469_v47 = vshll.u32 %v4044_v40, 16  ;;  %v1474_v53 = vshll.u32 %v5770_v43, 16  ;;  %v1467_v57 = vshrl.u32 %v4044_v40, 16  ;;  %v4054_v58 = vcombine.low %v5758_v35, %v1662_v49  ;;  %v5823_v49 = vld [vmem:[%s7072_s10] ss:$0 sm:$0xff] }
 0x147   : > { %4256 = vmatpush3.bf16.msra.mxu0 %v4719_v3  ;;  %vm1337_vm2 = vcmp.ge.s32.totalorder %v1321_v45, 0  ;;  %v1699_v61 = vshrl.u32 %v5774_v48, 16  ;;  %v1702_v62 = vshll.u32 %v5774_v48, 16  ;;  %v4046_v63 = vcombine.low %v1429_v51, %v5758_v35 }
 0x148   : > { %4369 = vmatprep.subr.bf16.mxu0 %v4730_v27  ;;  %v5784_v60 = vrot.slane %v1469_v47, 1  ;;  %v4055_v1 = vcombine.low %v5758_v35, %v1664_v55  ;;  %v936_v3 = vadd.s32 104, %v5744_v8  ;;  %v1476_v4 = vrot.slane %v1474_v53, 1  ;;  %vm1417_vm3 = vmpackc.low %vm1337_vm2, %vm1337_vm2 }
 0x149   : > { %v1706_v5 = vshrl.u32 %v4053_v54, 16  ;;  %v1709_v6 = vshll.u32 %v4053_v54, 16  ;;  %vm1465_vm4 = vsmask.f32 7424  ;;  %v1714_v9 = vshrl.u32 %v4054_v58, 16 }
 0x14a   : > { %4482 = vmatmul.mubr.bf16.gmra.mrb[16].mxu0 %v550_v37  ;;  %v1319_v37 = vadd.s32 4294967295, %v1167_v30  ;;  %vm1586_vm5 = vcmp.lt.s32.totalorder %v1554_v59, 16  ;;  %v1472_v11 = vor.u32 %v5784_v60, %v1467_v57  ;;  %v1482_v12 = vshll.u32 %v4046_v63, 16  ;;  %v5847_v59 = vld [vmem:[%s7073_s21] ss:$0 sm:$0xff]  ;;  %s3805_s21 = scalar_lea.sflag [#allocation4], %s5694_s18 }
 0x14b   : > { %v1722_v14 = vshrl.u32 %v4055_v1, 16  ;;  %v1433_v15 = vsel %vm1417_vm3, 65537, %v6997_v33  ;;  %v1216_v16 = vand.u32 15, %v936_v3  ;;  %v1701_v17 = vrot.slane %v1699_v61, 7  ;;  %vm1650_vm8 = vmpackc.low %vm1586_vm5, %vm1586_vm5 }
 0x14c   : > { %vm1335_vm15 = vcmp.ge.s32.totalorder %v1319_v37, 0  ;;  %v1708_v18 = vrot.slane %v1706_v5, 7  ;;  %v1478_v19 = vshrl.u32 %v5770_v43, 16  ;;  %v1716_v21 = vrot.slane %v1714_v9, 7 }
 0x14d   : > { %vm1415_vm1 = vmpackc.low %vm1335_vm15, %vm1335_vm15  ;;  %v1717_v22 = vshll.u32 %v4054_v58, 16  ;;  %v1486_v23 = vshrl.u32 %v4046_v63, 16  ;;  %v1484_v25 = vrot.slane %v1482_v12, 1  ;;  %v5799_v27 = vcombine.low %v1433_v15, %v5758_v35 }
 0x14e   : > { %v1431_v0 = vsel %vm1415_vm1, 65537, %v6997_v33  ;;  %v5802_v29 = vrot.slane %v1722_v14, 7  ;;  %v1725_v30 = vshll.u32 %v4055_v1, 16  ;;  %v1666_v31 = vsel %vm1650_vm8, 65537, %v6997_v33 }
 0x14f   : > { %v4047_v13 = vcombine.low %v1431_v0, %v5758_v35  ;;  %v1558_v32 = vadd.s32 1, %v1216_v16  ;;  %v5806_v34 = vsel %vm1465_vm4, %v1472_v11, %v1476_v4  ;;  %v1711_v36 = vor.u32 %v1709_v6, %v1708_v18 }
 0x150   : > { %v1480_v37 = vor.u32 %v1478_v19, %v1476_v4  ;;  %v1719_v38 = vor.u32 %v1717_v22, %v1716_v21  ;;  %v1488_v39 = vor.u32 %v1486_v23, %v1484_v25  ;;  %v1435_v40 = vsel %vm1419_vm9, 65537, %v6997_v33 }
 0x151   : > { %v1490_v26 = vshll.u32 %v4047_v13, 16  ;;  %v1325_v41 = vadd.s32 4294967295, %v1209_v24  ;;  %v1494_v43 = vshrl.u32 %v4047_v13, 16  ;;  %v5814_v44 = vcombine.low %v5758_v35, %v1666_v31 }
 0x152   : > { %v1223_v45 = vand.u32 15, %v937_v28  ;;  %v5816_v46 = vor.u32 %v1702_v62, %v1701_v17  ;;  %v1727_v47 = vor.u32 %v1725_v30, %v5802_v29  ;;  %v1498_v48 = vshll.u32 %v5799_v27, 16 }
 0x153   : > { %v1492_v42 = vrot.slane %v1490_v26, 1  ;;  %vm1590_vm12 = vcmp.lt.s32.totalorder %v1558_v32, 16  ;;  %v5826_v51 = vsel %vm1697_vm6, %v1701_v17, %v1711_v36  ;;  %v5829_v52 = vrot.slane %v6997_v33, 7 }
 0x154   : > { %v5832_v53 = vsel %vm1465_vm4, %v1480_v37, %v1484_v25  ;;  %v5835_v54 = vcombine.low %v1435_v40, %v5758_v35  ;;  %v1009_v55 = vstv %s5810_s7  ;;  %v5839_v56 = vsel %vm1697_vm6, %v1708_v18, %v1719_v38  ;;  %vm5851_vm14 = vmpackc.low %vm1590_vm12, %vm1590_vm12  ;;  %s4154_s7 = sshll.u32 %s3818_s9, 7 }
 0x155   : > { %v5842_v57 = vsel %vm1465_vm4, %v1488_v39, %v1492_v42  ;;  %vm1341_vm13 = vcmp.ge.s32.totalorder %v1325_v41, 0  ;;  %v1496_v61 = vor.u32 %v1494_v43, %v1492_v42  ;;  %v1730_v62 = vshrl.u32 %v5814_v44, 16  ;;  %s6872_s20 = scalar_lea.hbm %s7095_s28, %s4154_s7 }
 0x156   : > { %v1668_v63 = vsel %vm1652_vm11, 65537, %v6997_v33  ;;  %v1327_v1 = vadd.s32 4294967295, %v1223_v45  ;;  %v5857_v4 = vsel %vm1697_vm6, %v1716_v21, %v1727_v47  ;;  %v1500_v5 = vrot.slane %v1498_v48, 1  ;;  %vm1421_vm15 = vmpackc.low %vm1341_vm13, %vm1341_vm13 }
 0x157   : > { %v938_v6 = vadd.s32 120, %v5744_v8  ;;  %v1733_v10 = vshll.u32 %v5814_v44, 16  ;;  %v1502_v11 = vshrl.u32 %v5799_v27, 16  ;;  %v1506_v12 = vshll.u32 %v5835_v54, 16 }
 0x158   : > { %v4057_v8 = vcombine.low %v5758_v35, %v1668_v63  ;;  %v1670_v16 = vsel %vm5851_vm14, 65537, %v6997_v33  ;;  %v5878_v19 = vrot.slane %v1730_v62, 7  ;;  %vm1343_vm0 = vcmp.ge.s32.totalorder %v1327_v1, 0 }
 0x159   : > { %v1437_v22 = vsel %vm1421_vm15, 65537, %v6997_v33  ;;  %v1230_v23 = vand.u32 15, %v938_v6  ;;  %v5890_v26 = vsel %vm1465_vm4, %v1496_v61, %v1500_v5  ;;  %v4058_v27 = vcombine.low %v5758_v35, %v1670_v16  ;;  %vm1423_vm1 = vmpackc.low %vm1343_vm0, %vm1343_vm0 }
 0x15a   : > { %v1504_v30 = vor.u32 %v1502_v11, %v1500_v5  ;;  %v1738_v31 = vshrl.u32 %v4057_v8, 16  ;;  %v1508_v37 = vrot.slane %v1506_v12, 1  ;;  %v5896_v38 = vcombine.low %v1437_v22, %v5758_v35 }
 0x15b   : > { %v5900_v41 = vor.u32 %v1733_v10, %v5878_v19  ;;  %v1560_v42 = vadd.s32 1, %v1230_v23  ;;  %v1746_v45 = vshrl.u32 %v4058_v27, 16  ;;  %v1439_v47 = vsel %vm1423_vm1, 65537, %v6997_v33 }
 0x15c   : > { %v5908_v62 = vrot.slane %v1738_v31, 7  ;;  %v1741_v63 = vshll.u32 %v4057_v8, 16  ;;  %v1749_v12 = vshll.u32 %v4058_v27, 16  ;;  %vm5968_vm5 = vcmp.eq.s32.totalorder %v965_v50, 1 }
 0x15d   : > { %vm1592_vm2 = vcmp.lt.s32.totalorder %v1560_v42, 16  ;;  %v5927_v11 = vrot.slane %v1746_v45, 7  ;;  %vm1529_vm7 = vcmp.ne.s16.totalorder %v5806_v34, 0  ;;  %vm1779_vm8 = vcmp.ne.s16.totalorder %v5784_v60, 0 }
 0x15e   : > { %vm5935_vm3 = vmpackc.low %vm1592_vm2, %vm1592_vm2  ;;  %vm1762_vm9 = vcmp.ne.s16.totalorder %v5826_v51, 0  ;;  %vm1761_vm10 = vcmp.ne.s16.totalorder %v5816_v46, 0  ;;  %vm1887_vm11 = vcmask 1046528   ;;  %vm1530_vm12 = vcmp.ne.s16.totalorder %v5832_v53, 0 }
 0x15f   : > { %vm1763_vm13 = vcmp.ne.s16.totalorder %v5839_v56, 0  ;;  %vm1531_vm14 = vcmp.ne.s16.totalorder %v5842_v57, 0  ;;  %vm6120_vm15 = vcmp.eq.s32.totalorder %v1009_v55, 1  ;;  %vm1764_vm0 = vcmp.ne.s16.totalorder %v5857_v4, 0 }
 0x160   : > { %vm6992_vm1 = vcmp.ne.s16.totalorder %v5890_v26, 0 }
 0x1fd   : > { %v4467_v58 = vpop.f32.mrb[0].mxu0 }
 0x1fe   : > { %v737_v2 = vmul.f32 %v4467_v58, %v5823_v49  ;;  %v649_v3 = vpop.f32.mrb[1].mxu0 }
 0x1ff   : > { %v735_v7 = vmul.f32 %v5823_v49, %v649_v3  ;;  %v4468_v9 = vpop.f32.mrb[2].mxu0  ;;  %v1514_v3 = vshll.u32 %v5896_v38, 16 }
 0x200   : > { %v5867_v13 = vadd.f32 %v5847_v59, %v737_v2  ;;  %v738_v14 = vmul.f32 %v4468_v9, %v5823_v49  ;;  %v652_v15 = vpop.f32.mrb[3].mxu0  ;;  %v1510_v2 = vshrl.u32 %v5835_v54, 16 }
 0x201   : > { %v5875_v17 = vadd.f32 %v5847_v59, %v735_v7  ;;  %v736_v18 = vmul.f32 %v5823_v49, %v652_v15  ;;  %v5921_v7 = vcombine.low %v1439_v47, %v5758_v35  ;;  %v1743_v15 = vor.u32 %v1741_v63, %v5908_v62 }
 0x202   : > { %v4026_v20 = vmul.f32 -1.442695, %v5867_v13  ;;  %v5882_v21 = vadd.f32 %v5847_v59, %v738_v14  ;;  %v5931_v14 = vsel %vm1465_vm4, %v1504_v30, %v1508_v37 }
 0x203   : > { %v4024_v24 = vmul.f32 -1.442695, %v5875_v17  ;;  %v5887_v25 = vadd.f32 %v5847_v59, %v736_v18  ;;  %v1512_v18 = vor.u32 %v1510_v2, %v1508_v37  ;;  %v1522_v30 = vshll.u32 %v5921_v7, 16 }
 0x204   : > { %4762 = vpow2.f32 %v4026_v20  ;;  %v4027_v28 = vmul.f32 -1.442695, %v5882_v21  ;;  %v1516_v20 = vrot.slane %v1514_v3, 1  ;;  %v5980_v22 = vsel %vm1697_vm6, %v5878_v19, %v1743_v15 }
 0x205   : > { %4764 = vpow2.f32 %v4024_v24  ;;  %v4025_v32 = vmul.f32 -1.442695, %v5887_v25  ;;  %v4471_v36 = vpop.f32.mrb[4].mxu0 }
 0x206   : > { %4766 = vpow2.f32 %v4027_v28  ;;  %v741_v39 = vmul.f32 %v4471_v36, %v5823_v49  ;;  %v665_v40 = vpop.f32.mrb[5].mxu0  ;;  %v1518_v28 = vshrl.u32 %v5896_v38, 16  ;;  %v1672_v38 = vsel %vm5935_vm3, 65537, %v6997_v33 }
 0x207   : > { %4768 = vpow2.f32 %v4025_v32  ;;  %v739_v43 = vmul.f32 %v5823_v49, %v665_v40  ;;  %v4472_v44 = vpop.f32.mrb[6].mxu0  ;;  %v5984_v50 = vsel %vm1465_vm4, %v1512_v18, %v1516_v20  ;;  %vm6995_vm3 = vcmp.ne.s16.totalorder %v5931_v14, 0 }
 0x208   : > { %v5905_v48 = vadd.f32 %v5847_v59, %v741_v39  ;;  %v742_v58 = vmul.f32 %v4472_v44, %v5823_v49  ;;  %v668_v61 = vpop.f32.mrb[7].mxu0  ;;  %v1751_v39 = vor.u32 %v1749_v12, %v5927_v11  ;;  %v5964_v12 = vcombine.low %v5758_v35, %v1672_v38 }
 0x209   : > { %v5911_v0 = vadd.f32 %v5847_v59, %v739_v43  ;;  %v740_v1 = vmul.f32 %v5823_v49, %v668_v61 }
 0x20a   : > { %v4030_v5 = vmul.f32 -1.442695, %v5905_v48  ;;  %v5918_v6 = vadd.f32 %v5847_v59, %v742_v58  ;;  %v1754_v18 = vshrl.u32 %v5964_v12, 16 }
 0x20b   : > { %v4028_v9 = vmul.f32 -1.442695, %v5911_v0  ;;  %v5925_v10 = vadd.f32 %v5847_v59, %v740_v1 }
 0x20c   : > { %4770 = vpow2.f32 %v4030_v5  ;;  %v4031_v54 = vmul.f32 -1.442695, %v5918_v6 }
 0x20d   : > { %4772 = vpow2.f32 %v4028_v9  ;;  %v4029_v8 = vmul.f32 -1.442695, %v5925_v10  ;;  %v4475_v16 = vpop.f32.mrb[8].mxu0 }
 0x20e   : > { %v4763_v23 = vpop.eup %4762  ;;  %4774 = vpow2.f32 %v4031_v54  ;;  %v745_v24 = vmul.f32 %v4475_v16, %v5823_v49  ;;  %v681_v27 = vpop.f32.mrb[9].mxu0  ;;  %v5976_v16 = vsel %vm1697_vm6, %v5802_v29, %v5900_v41  ;;  %v5989_v29 = vsel %vm1697_vm6, %v5908_v62, %v1751_v39 }
 0x20f   : > { %v4765_v31 = vpop.eup %4764  ;;  %v844_v32 = vadd.f32 1.0, %v4763_v23  ;;  %4776 = vpow2.f32 %v4029_v8  ;;  %v743_v36 = vmul.f32 %v5823_v49, %v681_v27  ;;  %v4476_v37 = vpop.f32.mrb[10].mxu0  ;;  %v5991_v41 = vrot.slane %v1522_v30, 1 }
 0x210   : > { %v4767_v40 = vpop.eup %4766  ;;  %v842_v42 = vadd.f32 1.0, %v4765_v31  ;;  %v5945_v43 = vadd.f32 %v5847_v59, %v745_v24  ;;  %v746_v44 = vmul.f32 %v4476_v37, %v5823_v49  ;;  %v684_v45 = vpop.f32.mrb[11].mxu0  ;;  %v1520_v24 = vor.u32 %v1518_v28, %v1516_v20 }
 0x211   : > { %v4769_v47 = vpop.eup %4768  ;;  %4778 = vrcp.f32 %v844_v32  ;;  %v845_v58 = vadd.f32 1.0, %v4767_v40  ;;  %v5952_v61 = vadd.f32 %v5847_v59, %v743_v36  ;;  %v744_v63 = vmul.f32 %v5823_v49, %v684_v45 }
 0x212   : > { %4780 = vrcp.f32 %v842_v42  ;;  %v843_v1 = vadd.f32 1.0, %v4769_v47  ;;  %v4034_v2 = vmul.f32 -1.442695, %v5945_v43  ;;  %v5957_v3 = vadd.f32 %v5847_v59, %v746_v44 }
 0x213   : > { %4782 = vrcp.f32 %v845_v58  ;;  %v4032_v5 = vmul.f32 -1.442695, %v5952_v61  ;;  %v5961_v9 = vadd.f32 %v5847_v59, %v744_v63  ;;  %vm6993_vm2 = vcmp.ne.s16.totalorder %v5976_v16, 0 }
 0x214   : > { %4784 = vrcp.f32 %v843_v1  ;;  %v4035_v8 = vmul.f32 -1.442695, %v5957_v3 }
 0x215   : > { %4786 = vpow2.f32 %v4034_v2  ;;  %v4033_v35 = vmul.f32 -1.442695, %v5961_v9  ;;  %v4479_v23 = vpop.f32.mrb[12].mxu0 }
 0x216   : > { %v4771_v27 = vpop.eup %4770  ;;  %4788 = vpow2.f32 %v4032_v5  ;;  %v749_v31 = vmul.f32 %v4479_v23, %v5823_v49  ;;  %v697_v32 = vpop.f32.mrb[13].mxu0  ;;  %v6015_v5 = vsel %vm1465_vm4, %v1520_v24, %v5991_v41  ;;  %v6018_v23 = vrot.slane %v1754_v18, 7 }
 0x217   : > { %v4773_v19 = vpop.eup %4772  ;;  %v848_v15 = vadd.f32 1.0, %v4771_v27  ;;  %4790 = vpow2.f32 %v4035_v8  ;;  %v747_v36 = vmul.f32 %v5823_v49, %v697_v32  ;;  %v4480_v37 = vpop.f32.mrb[14].mxu0  ;;  %v1757_v27 = vshll.u32 %v5964_v12, 16 }
 0x218   : > { %v4775_v20 = vpop.eup %4774  ;;  %v846_v28 = vadd.f32 1.0, %v4773_v19  ;;  %4792 = vpow2.f32 %v4033_v35  ;;  %v5996_v40 = vadd.f32 %v5847_v59, %v749_v31  ;;  %v750_v42 = vmul.f32 %v4480_v37, %v5823_v49  ;;  %v700_v62 = vpop.f32.mrb[15].mxu0 }
 0x219   : > { %v4777_v39 = vpop.eup %4776  ;;  %4794 = vrcp.f32 %v848_v15  ;;  %v849_v30 = vadd.f32 1.0, %v4775_v20  ;;  %v6000_v44 = vadd.f32 %v5847_v59, %v747_v36  ;;  %v748_v45 = vmul.f32 %v5823_v49, %v700_v62 }
 0x21a   : > { %4796 = vrcp.f32 %v846_v28  ;;  %v847_v38 = vadd.f32 1.0, %v4777_v39  ;;  %v4038_v47 = vmul.f32 -1.442695, %v5996_v40  ;;  %v6005_v58 = vadd.f32 %v5847_v59, %v750_v42 }
 0x21b   : > { %v4779_v63 = vpop.eup %4778  ;;  %4798 = vrcp.f32 %v849_v30  ;;  %v4036_v1 = vmul.f32 -1.442695, %v6000_v44  ;;  %v6010_v2 = vadd.f32 %v5847_v59, %v748_v45  ;;  %v1526_v36 = vshrl.u32 %v5921_v7, 16 }
 0x21c   : > { %v4781_v8 = vpop.eup %4780  ;;  %4800 = vrcp.f32 %v847_v38  ;;  %v4039_v35 = vmul.f32 -1.442695, %v6005_v58  ;;  %v904_v24 = vmul.f32 %v4779_v63, %v5867_v13 }
 0x21d   : > { %v4783_v31 = vpop.eup %4782  ;;  %v902_v32 = vmul.f32 %v4781_v8, %v5875_v17  ;;  %4802 = vpow2.f32 %v4038_v47  ;;  %v4037_v19 = vmul.f32 -1.442695, %v6010_v2  ;;  %v4483_v15 = vpop.f32.mrb[16].mxu0 }
 0x21e   : > { %v4785_v37 = vpop.eup %4784  ;;  %v905_v20 = vmul.f32 %v4783_v31, %v5882_v21  ;;  %4804 = vpow2.f32 %v4036_v1  ;;  %v753_v18 = vmul.f32 %v4483_v15, %v5823_v49  ;;  %v713_v28 = vpop.f32.mrb[17].mxu0 }
 0x21f   : > { %v4787_v42 = vpop.eup %4786  ;;  %v1091_v12 = vsel %vm5968_vm5, %v902_v32, 0.0  ;;  %v903_v17 = vmul.f32 %v4785_v37, %v5887_v25  ;;  %4806 = vpow2.f32 %v4039_v35  ;;  %v751_v62 = vmul.f32 %v5823_v49, %v713_v28  ;;  %v4484_v39 = vpop.f32.mrb[18].mxu0 }
 0x220   : > { %v4789_v7 = vpop.eup %4788  ;;  %v6031_v30 = vpack.c.bf16 %v905_v20, %v904_v24  ;;  %v852_v13 = vadd.f32 1.0, %v4787_v42  ;;  %4808 = vpow2.f32 %v4037_v19  ;;  %v6034_v21 = vadd.f32 %v5847_v59, %v753_v18  ;;  %v716_v45 = vpop.f32.mrb[19].mxu0 }
 0x221   : > { %v4791_v38 = vpop.eup %4790  ;;  %v1092_v47 = vsel %vm5968_vm5, %v903_v17, 0.0  ;;  %v850_v25 = vadd.f32 1.0, %v4789_v7  ;;  %v6040_v63 = vadd.f32 %v5847_v59, %v751_v62  ;;  %v754_v1 = vmul.f32 %v4484_v39, %v5823_v49 }
 0x222   : > { %v4793_v8 = vpop.eup %4792  ;;  %v6043_v35 = vpack.c.bf16 %v1092_v47, %v1091_v12  ;;  %4810 = vrcp.f32 %v852_v13  ;;  %v853_v31 = vadd.f32 1.0, %v4791_v38  ;;  %v4042_v32 = vmul.f32 -1.442695, %v6034_v21 }
 0x223   : > { %v4795_v19 = vpop.eup %4794  ;;  %4812 = vrcp.f32 %v850_v25  ;;  %v851_v15 = vadd.f32 1.0, %v4793_v8  ;;  %v4040_v54 = vmul.f32 -1.442695, %v6040_v63  ;;  %v6049_v37 = vadd.f32 %v5847_v59, %v754_v1 }
 0x224   : > { %v4797_v24 = vpop.eup %4796  ;;  %4814 = vrcp.f32 %v853_v31  ;;  %v752_v20 = vmul.f32 %v5823_v49, %v716_v45  ;;  %v1780_v18 = vsel %vm1779_vm8, %v6043_v35, 0  ;;  %v1759_v28 = vor.u32 %v1757_v27, %v6018_v23 }
 0x225   : > { %v4799_v42 = vpop.eup %4798  ;;  %v908_v12 = vmul.f32 %v4795_v19, %v5905_v48  ;;  %4816 = vrcp.f32 %v851_v15  ;;  %v4043_v17 = vmul.f32 -1.442695, %v6049_v37  ;;  %v1781_v62 = vsel %vm1529_vm7, %v6031_v30, 0 }
 0x226   : > { %v4801_v39 = vpop.eup %4800  ;;  %v906_v49 = vmul.f32 %v4797_v24, %v5911_v0  ;;  %v909_v7 = vmul.f32 %v4799_v42, %v5918_v6  ;;  %4818 = vpow2.f32 %v4042_v32  ;;  %v6064_v13 = vadd.f32 %v5847_v59, %v752_v20 }
 0x227   : > { %v4803_v27 = vpop.eup %4802  ;;  %v907_v45 = vmul.f32 %v4801_v39, %v5925_v10  ;;  %4820 = vpow2.f32 %v4040_v54  ;;  %v2154_v48 = vshrl.u32 %v1780_v18, 16  ;;  %v2158_v38 = vshrl.u32 %v1781_v62, 16 }
 0x228   : > { %v4805_v47 = vpop.eup %4804  ;;  %v6067_v25 = vpack.c.bf16 %v909_v7, %v908_v12  ;;  %v856_v1 = vadd.f32 1.0, %v4803_v27  ;;  %4822 = vpow2.f32 %v4043_v17  ;;  %v6070_v8 = vor.u32 %v1526_v36, %v5991_v41 }
 0x229   : > { %v4807_v0 = vpop.eup %4806  ;;  %v6072_v6 = vpack.c.bf16 %v907_v45, %v906_v49  ;;  %v854_v31 = vadd.f32 1.0, %v4805_v47  ;;  %v4041_v59 = vmul.f32 -1.442695, %v6064_v13  ;;  %v6075_v32 = vrot.slane %v2158_v38, 7 }
 0x22a   : > { %v4809_v10 = vpop.eup %4808  ;;  %4824 = vrcp.f32 %v856_v1  ;;  %v857_v19 = vadd.f32 1.0, %v4807_v0  ;;  %v2156_v15 = vrot.slane %v2154_v48, 7  ;;  %v2161_v54 = vshll.u32 %v1781_v62, 16 }
 0x22b   : > { %4826 = vrcp.f32 %v854_v31  ;;  %v855_v24 = vadd.f32 1.0, %v4809_v10  ;;  %v1770_v41 = vsel %vm1761_vm10, %v6043_v35, 0  ;;  %v6083_v36 = vsel %vm1762_vm9, %v6031_v30, 0 }
 0x22c   : > { %v4811_v20 = vpop.eup %4810  ;;  %4828 = vrcp.f32 %v857_v19  ;;  %v2163_v18 = vor.u32 %v2161_v54, %v6075_v32  ;;  %v1888_v42 = vrot.slane %v1770_v41, 1  ;;  %v6088_v12 = vsel %vm1697_vm6, %v5927_v11, %v1759_v28 }
 0x22d   : > { %v4813_v17 = vpop.eup %4812  ;;  %v912_v62 = vmul.f32 %v4811_v20, %v5945_v43  ;;  %4830 = vrcp.f32 %v855_v24  ;;  %v1889_v39 = vrot.slane %v6083_v36, 1  ;;  %v1816_v49 = vshll.u32 %v6043_v35, 16  ;;  %v4726_v36 = vld [vmem:[#allocation10 + $0x150] sm:$0xff]  }
 0x22e   : > { %v4815_v7 = vpop.eup %4814  ;;  %v910_v27 = vmul.f32 %v4813_v17, %v5952_v61  ;;  %4832 = vpow2.f32 %v4041_v59  ;;  %v2164_v45 = vsel %vm1697_vm6, %v2156_v15, %v2163_v18  ;;  %v2142_v48 = vshrl.u32 %v1888_v42, 16 }
 0x22f   : > { %v4817_v38 = vpop.eup %4816  ;;  %v913_v11 = vmul.f32 %v4815_v7, %v5957_v3  ;;  %3258 = vmatprep.mubr.bf16.mxu0 %v2164_v45  ;;  %v1890_v43 = vsel %vm1887_vm11, %v1888_v42, %v1889_v39  ;;  %v1818_v28 = vrot.slane %v1816_v49, 1  ;;  %v1819_v47 = vshrl.u32 %v6043_v35, 16 }
 0x230   : > { %v4819_v1 = vpop.eup %4818  ;;  %v911_v61 = vmul.f32 %v4817_v38, %v5961_v9  ;;  %v2144_v0 = vrot.slane %v2142_v48, 7  ;;  %v2146_v31 = vshrl.u32 %v1890_v43, 16  ;;  %v2149_v59 = vshll.u32 %v1890_v43, 16  ;;  %v4731_v48 = vld [vmem:[#allocation10 + $0x180] sm:$0xff]   ;;  %v4727_v43 = vld [vmem:[#allocation10 + $0x110] sm:$0xff]  }
 0x231   : > { %v4821_v10 = vpop.eup %4820  ;;  %v6104_v3 = vpack.c.bf16 %v913_v11, %v912_v62  ;;  %v860_v19 = vadd.f32 1.0, %v4819_v1  ;;  %v1821_v15 = vor.u32 %v1819_v47, %v1818_v28  ;;  %v1823_v54 = vshll.u32 %v6031_v30, 16  ;;  %v4734_v47 = vld [vmem:[#allocation10 + $0x1c8] sm:$0xff]  }
 0x232   : > { %v4823_v24 = vpop.eup %4822  ;;  %v6107_v41 = vpack.c.bf16 %v911_v61, %v910_v27  ;;  %v858_v20 = vadd.f32 1.0, %v4821_v10  ;;  %v6109_v9 = vrot.slane %v2146_v31, 7  ;;  %v2130_v18 = vshrl.u32 %v1818_v28, 16 }
 0x233   : > { %4834 = vrcp.f32 %v860_v19  ;;  %v861_v42 = vadd.f32 1.0, %v4823_v24  ;;  %v6111_v17 = vrot.slane %v1823_v54, 1  ;;  %v1537_v62 = vsel %vm1529_vm7, %v6043_v35, 0 }
 0x234   : > { %v4825_v49 = vpop.eup %4824  ;;  %4836 = vrcp.f32 %v858_v20  ;;  %v2151_v7 = vor.u32 %v2149_v59, %v6109_v9  ;;  %v2132_v45 = vrot.slane %v2130_v18, 7  ;;  %v2122_v27 = vshrl.u32 %v1537_v62, 16 }
 0x235   : > { %v4827_v38 = vpop.eup %4826  ;;  %v916_v11 = vmul.f32 %v4825_v49, %v5996_v40  ;;  %4838 = vrcp.f32 %v861_v42  ;;  %v1826_v28 = vsel %vm1465_vm4, %v1821_v15, %v6111_v17  ;;  %v2125_v35 = vshll.u32 %v1537_v62, 16  ;;  %v4735_v42 = vld [vmem:[#allocation10 + $0x188] sm:$0xff]  }
 0x236   : > { %v4829_v1 = vpop.eup %4828  ;;  %v914_v61 = vmul.f32 %v4827_v38, %v6000_v44  ;;  %v2152_v31 = vsel %vm1697_vm6, %v2144_v0, %v2151_v7  ;;  %v2134_v59 = vshrl.u32 %v1826_v28, 16  ;;  %v2137_v10 = vshll.u32 %v1826_v28, 16 }
 0x237   : > { %v4831_v19 = vpop.eup %4830  ;;  %v917_v40 = vmul.f32 %v4829_v1, %v6005_v58  ;;  %3259 = vmatmul.mubr.bf16.vlgmr.msra.gmra.mrb[20].mxu0 %v2152_v31  ;;  %v6129_v55 = vrot.slane %v2122_v27, 7  ;;  %v1782_v54 = vsel %vm1530_vm12, %v6072_v6, 0  ;;  %v1827_v15 = vshrl.u32 %v6031_v30, 16  ;;  %v4736_v27 = vld [vmem:[#allocation10 + $0x1d0] sm:$0xff]   ;;  %v4723_v1 = vld [vmem:[#allocation10 + $0x100] sm:$0xff]  }
 0x238   : > { %v4833_v24 = vpop.eup %4832  ;;  %v915_v20 = vmul.f32 %v4831_v19, %v6010_v2  ;;  %v6136_v44 = vrot.slane %v2134_v59, 7  ;;  %v2243_v0 = vshrl.u32 %v1782_v54, 16  ;;  %v2246_v18 = vshll.u32 %v1782_v54, 16  ;;  %4370 = vmatpush3.bf16.msra.mxu0 %v4731_v48  ;;  %v4737_v19 = vld [vmem:[#allocation10 + $0x190] sm:$0xff]  }
 0x239   : > { %v6138_v62 = vpack.c.bf16 %v917_v40, %v916_v11  ;;  %v859_v58 = vadd.f32 1.0, %v4833_v24  ;;  %v2127_v49 = vor.u32 %v2125_v35, %v6129_v55  ;;  %v1829_v7 = vor.u32 %v1827_v15, %v6111_v17  ;;  %4371 = vmatprep.subr.bf16.mxu0 %v4734_v47 }
 0x23a   : > { %v6143_v38 = vpack.c.bf16 %v915_v20, %v914_v61  ;;  %v2139_v2 = vor.u32 %v2137_v10, %v6136_v44  ;;  %v6146_v28 = vrot.slane %v2243_v0, 7  ;;  %v1831_v48 = vshll.u32 %v6072_v6, 16  ;;  %v4724_v10 = vld [vmem:[#allocation10 + $0x148] sm:$0xff]  }
 0x23b   : > { %4840 = vrcp.f32 %v859_v58  ;;  %v2128_v11 = vsel %vm1697_vm6, %v5829_v52, %v2127_v49  ;;  %v6154_v35 = vsel %vm1763_vm13, %v6072_v6, 0  ;;  %v1783_v47 = vsel %vm1531_vm14, %v6067_v25, 0 }
 0x23c   : > { %v2140_v61 = vsel %vm1697_vm6, %v2132_v45, %v2139_v2  ;;  %v2248_v31 = vor.u32 %v2246_v18, %v6146_v28  ;;  %v6162_v59 = vrot.slane %v1831_v48, 1  ;;  %v1891_v52 = vrot.slane %v6154_v35, 1  ;;  %4372 = vmatpush3.bf16.msra.mxu0 %v4735_v42  ;;  %v4740_v45 = vld [vmem:[#allocation10 + $0x1d8] sm:$0xff]  }
 0x23d   : > { %v4835_v40 = vpop.eup %4834  ;;  %3161 = vmatprep.mubr.bf16.mxu1 %v2140_v61  ;;  %v2300_v54 = vshrl.u32 %v1783_v47, 16  ;;  %v2303_v15 = vshll.u32 %v1783_v47, 16  ;;  %v1538_v24 = vsel %vm1530_vm12, %v6031_v30, 0  ;;  %v1835_v20 = vshrl.u32 %v6072_v6, 16  ;;  %4373 = vmatprep.subr.bf16.mxu0 %v4736_v27  ;;  %v4725_v47 = vld [vmem:[#allocation10 + $0x108] sm:$0xff]  }
 0x23e   : > { %v4837_v0 = vpop.eup %4836  ;;  %v920_v18 = vmul.f32 %v4835_v40, %v6034_v21  ;;  %3162 = vmatmul.mubr.bf16.vlgmr.msra.gmra.mrb[0].mxu1 %v2128_v11  ;;  %v2249_v42 = vsel %vm1697_vm6, %v6075_v32, %v2248_v31  ;;  %v1834_v58 = vsel %vm1465_vm4, %v1829_v7, %v6162_v59  ;;  %v1892_v49 = vsel %vm1887_vm11, %v1889_v39, %v1891_v52 }
 0x23f   : > { %v4839_v2 = vpop.eup %4838  ;;  %v918_v27 = vmul.f32 %v4837_v0, %v6040_v63  ;;  %3266 = vmatprep.mubr.bf16.mxu0 %v2249_v42  ;;  %4306 = vmatpush3.bf16.msra.mxu1 %v4723_v1  ;;  %v2170_v48 = vshrl.u32 %v1834_v58, 16  ;;  %v2173_v21 = vshll.u32 %v1834_v58, 16  ;;  %v2235_v11 = vshrl.u32 %v1892_v49, 16  ;;  %v4741_v63 = vld [vmem:[#allocation10 + $0x198] sm:$0xff]   ;;  %v4742_v42 = vld [vmem:[#allocation10 + $0x1e0] sm:$0xff]  }
 0x240   : > { %v1109_v32 = vsel %vm6120_vm15, %v920_v18, 0.0  ;;  %v921_v7 = vmul.f32 %v4839_v2, %v6049_v37  ;;  %v2238_v61 = vshll.u32 %v1892_v49, 16  ;;  %v6183_v31 = vrot.slane %v2300_v54, 7  ;;  %4307 = vmatprep.subr.bf16.mxu1 %v4724_v10  ;;  %4374 = vmatpush3.bf16.msra.mxu0 %v4737_v19 }
 0x241   : > { %v6186_v39 = vrot.slane %v2170_v48, 7  ;;  %v6188_v1 = vrot.slane %v2235_v11, 7  ;;  %v2226_v40 = vshrl.u32 %v1538_v24, 16  ;;  %v2229_v0 = vshll.u32 %v1538_v24, 16  ;;  %4375 = vmatprep.subr.bf16.mxu0 %v4740_v45  ;;  %v4728_v48 = vld [vmem:[#allocation10 + $0x158] sm:$0xff]  }
 0x242   : > { %v1110_v37 = vsel %vm6120_vm15, %v921_v7, 0.0  ;;  %v2305_v54 = vor.u32 %v2303_v15, %v6183_v31  ;;  %v1837_v10 = vor.u32 %v1835_v20, %v6162_v59  ;;  %v1839_v18 = vshll.u32 %v6067_v25, 16  ;;  %v4743_v7 = vld [vmem:[#allocation10 + $0x1a0] sm:$0xff]  }
 0x243   : > { %v6196_v19 = vpack.c.bf16 %v1110_v37, %v1109_v32  ;;  %v6199_v58 = vor.u32 %v2173_v21, %v6186_v39  ;;  %v2240_v24 = vor.u32 %v2238_v61, %v6188_v1  ;;  %v6202_v45 = vrot.slane %v2226_v40, 7  ;;  %4308 = vmatpush3.bf16.msra.mxu1 %v4725_v47  ;;  %v4746_v37 = vld [vmem:[#allocation10 + $0x1e8] sm:$0xff]  }
 0x244   : > { %v2306_v15 = vsel %vm1697_vm6, %v6146_v28, %v2305_v54  ;;  %v1841_v49 = vrot.slane %v1839_v18, 1  ;;  %v6209_v20 = vsel %vm1764_vm0, %v6067_v25, 0  ;;  %v1784_v2 = vsel %vm6992_vm1, %v6107_v41, 0  ;;  %4309 = vmatprep.subr.bf16.mxu1 %v4726_v36  ;;  %4376 = vmatpush3.bf16.msra.mxu0 %v4741_v63 }
 0x245   : > { %v4841_v21 = vpop.eup %4840  ;;  %v2233_v11 = vsel %vm1697_vm6, %v6136_v44, %v6199_v58  ;;  %v2241_v28 = vsel %vm1697_vm6, %v6109_v9, %v2240_v24  ;;  %v2231_v47 = vor.u32 %v2229_v0, %v6202_v45  ;;  %v1893_v32 = vrot.slane %v6209_v20, 1  ;;  %4377 = vmatprep.subr.bf16.mxu0 %v4742_v42 }
 0x246   : > { %v919_v61 = vmul.f32 %v4841_v21, %v6064_v13  ;;  %3169 = vmatprep.mubr.bf16.mxu1 %v2233_v11  ;;  %3267 = vmatmul.mubr.bf16.gmra.mrb[24].mxu0 %v2241_v28  ;;  %v1842_v36 = vsel %vm1465_vm4, %v1837_v10, %v1841_v49  ;;  %v2356_v63 = vshrl.u32 %v1784_v2, 16  ;;  %v2359_v40 = vshll.u32 %v1784_v2, 16  ;;  %v4729_v13 = vld [vmem:[#allocation10 + $0x118] sm:$0xff]  }
 0x247   : > { %3274 = vmatprep.mubr.bf16.mxu0 %v2306_v15  ;;  %v2232_v44 = vsel %vm1697_vm6, %v6129_v55, %v2231_v47  ;;  %v2206_v9 = vshrl.u32 %v1842_v36, 16  ;;  %v2209_v54 = vshll.u32 %v1842_v36, 16  ;;  %v1894_v0 = vsel %vm1887_vm11, %v1891_v52, %v1893_v32  ;;  %4310 = vmatpush3.bf16.msra.mxu1 %v4727_v43  ;;  %v4732_v55 = vld [vmem:[#allocation10 + $0x160] sm:$0xff]  }
 0x248   : > { %vm6994_vm5 = vcmp.ne.s16.totalorder %v5980_v22, 0  ;;  %v6231_v42 = vpack.c.bf16 %v919_v61, %v918_v27  ;;  %3170 = vmatmul.mubr.bf16.gmra.mrb[4].mxu1 %v2232_v44  ;;  %v2292_v10 = vshrl.u32 %v1894_v0, 16  ;;  %v2295_v18 = vshll.u32 %v1894_v0, 16  ;;  %4311 = vmatprep.subr.bf16.mxu1 %v4728_v48  ;;  %v4747_v27 = vld [vmem:[#allocation10 + $0x1a8] sm:$0xff]   ;;  %v4748_v48 = vld [vmem:[#allocation10 + $0x1f0] sm:$0xff]  }
 0x249   : > { %v6233_v24 = vrot.slane %v2356_v63, 7  ;;  %v6235_v15 = vrot.slane %v2206_v9, 7  ;;  %v1539_v35 = vsel %vm1531_vm14, %v6072_v6, 0  ;;  %v1843_v52 = vshrl.u32 %v6067_v25, 16  ;;  %4378 = vmatpush3.bf16.msra.mxu0 %v4743_v7  ;;  %v4733_v7 = vld [vmem:[#allocation10 + $0x120] sm:$0xff]  }
 0x24a   : > { %v1847_v43 = vshll.u32 %v6107_v41, 16  ;;  %v6242_v2 = vrot.slane %v2292_v10, 7  ;;  %v2284_v11 = vshrl.u32 %v1539_v35, 16  ;;  %v2287_v28 = vshll.u32 %v1539_v35, 16  ;;  %4379 = vmatprep.subr.bf16.mxu0 %v4746_v37  ;;  %v4749_v10 = vld [vmem:[#allocation10 + $0x1b0] sm:$0xff]  }
 0x24b   : > { %v2361_v21 = vor.u32 %v2359_v40, %v6233_v24  ;;  %v6246_v47 = vor.u32 %v2209_v54, %v6235_v15  ;;  %v1845_v61 = vor.u32 %v1843_v52, %v1841_v49  ;;  %v6251_v63 = vsel %vm6993_vm2, %v6107_v41, 0  ;;  %4312 = vmatpush3.bf16.msra.mxu1 %v4729_v13  ;;  %v4738_v49 = vld [vmem:[#allocation10 + $0x168] sm:$0xff]   ;;  %v4752_v52 = vld [vmem:[#allocation10 + $0x1f8] sm:$0xff]  }
 0x24c   : > { %v1849_v36 = vrot.slane %v1847_v43, 1  ;;  %vm1534_vm15 = vcmp.ne.s16.totalorder %v5984_v50, 0  ;;  %v2297_v40 = vor.u32 %v2295_v18, %v6242_v2  ;;  %v2286_v44 = vrot.slane %v2284_v11, 7  ;;  %4313 = vmatprep.subr.bf16.mxu1 %v4732_v55 }
 0x24d   : > { %v2362_v37 = vsel %vm1697_vm6, %v6183_v31, %v2361_v21  ;;  %v1895_v9 = vrot.slane %v6251_v63, 1  ;;  %v6261_v54 = vsel %vm1697_vm6, %v6186_v39, %v6246_v47  ;;  %v1785_v13 = vsel %vm6995_vm3, %v6104_v3, 0  ;;  %4380 = vmatpush3.bf16.msra.mxu0 %v4747_v27  ;;  %v4739_v27 = vld [vmem:[#allocation10 + $0x128] sm:$0xff]  }
 0x24e   : > { %v1850_v0 = vsel %vm1465_vm4, %v1845_v61, %v1849_v36  ;;  %v1540_v31 = vsel %vm6992_vm1, %v6067_v25, 0  ;;  %3177 = vmatprep.mubr.bf16.mxu1 %v6261_v54  ;;  %v2298_v18 = vsel %vm1697_vm6, %v6188_v1, %v2297_v40  ;;  %v2289_v55 = vor.u32 %v2287_v28, %v2286_v44  ;;  %4381 = vmatprep.subr.bf16.mxu0 %v4748_v48  ;;  %v4744_v40 = vld [vmem:[#allocation10 + $0x170] sm:$0xff]  }
 0x24f   : > { %v2268_v39 = vshrl.u32 %v1850_v0, 16  ;;  %v2271_v35 = vshll.u32 %v1850_v0, 16  ;;  %3275 = vmatmul.mubr.bf16.gmra.mrb[28].mxu0 %v2298_v18  ;;  %v1896_v43 = vsel %vm1887_vm11, %v1893_v32, %v1895_v9  ;;  %v2412_v21 = vshrl.u32 %v1785_v13, 16  ;;  %4314 = vmatpush3.bf16.msra.mxu1 %v4733_v7 }
 0x250   : > { %v2415_v11 = vshll.u32 %v1785_v13, 16  ;;  %v2340_v61 = vshrl.u32 %v1540_v31, 16  ;;  %vm1767_vm1 = vcmp.ne.s16.totalorder %v5989_v29, 0  ;;  %3282 = vmatprep.mubr.bf16.mxu0 %v2362_v37  ;;  %v2290_v1 = vsel %vm1697_vm6, %v6202_v45, %v2289_v55  ;;  %4315 = vmatprep.subr.bf16.mxu1 %v4738_v49  ;;  %v4753_v37 = vld [vmem:[#allocation10 + $0x1b8] sm:$0xff]  }
 0x251   : > { %v6279_v28 = vrot.slane %v2268_v39, 7  ;;  %v2348_v48 = vshrl.u32 %v1896_v43, 16  ;;  %v2351_v63 = vshll.u32 %v1896_v43, 16  ;;  %3178 = vmatmul.mubr.bf16.gmra.mrb[8].mxu1 %v2290_v1  ;;  %v2414_v20 = vrot.slane %v2412_v21, 7  ;;  %4382 = vmatpush3.bf16.msra.mxu0 %v4749_v10  ;;  %v4745_v10 = vld [vmem:[#allocation10 + $0x130] sm:$0xff]  }
 0x252   : > { %v6281_v32 = vrot.slane %v2340_v61, 7  ;;  %v2343_v0 = vshll.u32 %v1540_v31, 16  ;;  %v1851_v7 = vshrl.u32 %v6107_v41, 16  ;;  %vm1535_vm2 = vcmp.ne.s16.totalorder %v6015_v5, 0  ;;  %4383 = vmatprep.subr.bf16.mxu0 %v4752_v52  ;;  %v4750_v52 = vld [vmem:[#allocation10 + $0x178] sm:$0xff]  }
 0x253   : > { %v2273_v13 = vor.u32 %v2271_v35, %v6279_v28  ;;  %v2350_v45 = vrot.slane %v2348_v48, 7  ;;  %v1855_v18 = vshll.u32 %v6104_v3, 16  ;;  %v6290_v49 = vsel %vm6994_vm5, %v6104_v3, 0  ;;  %4316 = vmatpush3.bf16.msra.mxu1 %v4739_v27 }
 0x254   : > { %v2417_v55 = vor.u32 %v2415_v11, %v2414_v20  ;;  %v2345_v31 = vor.u32 %v2343_v0, %v6281_v32  ;;  %v1853_v39 = vor.u32 %v1851_v7, %v1849_v36  ;;  %v1897_v43 = vrot.slane %v6290_v49, 1  ;;  %4317 = vmatprep.subr.bf16.mxu1 %v4744_v40 }
 0x255   : > { %v6296_v35 = vsel %vm1697_vm6, %v6235_v15, %v2273_v13  ;;  %v2353_v21 = vor.u32 %v2351_v63, %v2350_v45  ;;  %v1857_v61 = vrot.slane %v1855_v18, 1  ;;  %v1786_v1 = vsel %vm1534_vm15, %v6143_v38, 0  ;;  %4384 = vmatpush3.bf16.msra.mxu0 %v4753_v37 }
 0x256   : > { %3185 = vmatprep.mubr.bf16.mxu1 %v6296_v35  ;;  %v2418_v36 = vsel %vm1697_vm6, %v6233_v24, %v2417_v55  ;;  %v2346_v11 = vsel %vm1697_vm6, %v2286_v44, %v2345_v31  ;;  %v1898_v27 = vsel %vm1887_vm11, %v1895_v9, %v1897_v43  ;;  %v2468_v48 = vshrl.u32 %v1786_v1, 16  ;;  %v4751_v44 = vld [vmem:[#allocation10 + $0x138] sm:$0xff]   ;;  %v6319_v55 = vld [vmem:[#allocation10 + $0x200] sm:$0xff]  }
 0x257   : > { %v2354_v15 = vsel %vm1697_vm6, %v6242_v2, %v2353_v21  ;;  %v1858_v63 = vsel %vm1465_vm4, %v1853_v39, %v1857_v61  ;;  %v2404_v0 = vshrl.u32 %v1898_v27, 16  ;;  %v2407_v7 = vshll.u32 %v1898_v27, 16  ;;  %4318 = vmatpush3.bf16.msra.mxu1 %v4745_v10 }
 0x258   : > { %vm6996_vm5 = vcmp.ne.s16.totalorder %v6088_v12, 0  ;;  %3283 = vmatmul.mubr.bf16.gmra.mrb[32].mxu0 %v2354_v15  ;;  %v2324_v40 = vshrl.u32 %v1858_v63, 16  ;;  %v2327_v13 = vshll.u32 %v1858_v63, 16  ;;  %v6310_v18 = vrot.slane %v2468_v48, 7  ;;  %4319 = vmatprep.subr.bf16.mxu1 %v4750_v52 }
 0x259   : > { %v2471_v24 = vshll.u32 %v1786_v1, 16  ;;  %3290 = vmatprep.mubr.bf16.mxu0 %v2418_v36  ;;  %v6312_v9 = vrot.slane %v2404_v0, 7  ;;  %v1541_v2 = vsel %vm6995_vm3, %v6107_v41, 0  ;;  %v1859_v37 = vshrl.u32 %v6104_v3, 16  ;;  %3186 = vmatmul.mubr.bf16.gmra.mrb[12].mxu1 %v2346_v11 }
 0x25a   : > { %v1863_v49 = vshll.u32 %v6143_v38, 16  ;;  %v2326_v31 = vrot.slane %v2324_v40, 7  ;;  %v2396_v10 = vshrl.u32 %v1541_v2, 16  ;;  %v2399_v21 = vshll.u32 %v1541_v2, 16 }
 0x25b   : > { %v2473_v39 = vor.u32 %v2471_v24, %v6310_v18  ;;  %v2409_v1 = vor.u32 %v2407_v7, %v6312_v9  ;;  %v1861_v36 = vor.u32 %v1859_v37, %v1857_v61  ;;  %v1776_v48 = vsel %vm1767_vm1, %v6143_v38, 0  ;;  %4320 = vmatpush3.bf16.msra.mxu1 %v4751_v44 }
 0x25c   : > { %v1865_v27 = vrot.slane %v1863_v49, 1  ;;  %vm1536_vm3 = vcmp.ne.s16.totalorder %v6070_v8, 0  ;;  %v2329_v15 = vor.u32 %v2327_v13, %v2326_v31  ;;  %v2398_v63 = vrot.slane %v2396_v10, 7  ;;  %4485 = vmatprep.subr.bf16.mxu1 %v6319_v55 }
 0x25d   : > { %v2474_v52 = vsel %vm1697_vm6, %v2414_v20, %v2473_v39  ;;  %v1899_v11 = vrot.slane %v1776_v48, 1  ;;  %v2410_v0 = vsel %vm1697_vm6, %v2350_v45, %v2409_v1  ;;  %v1787_v61 = vsel %vm1535_vm2, %v6138_v62, 0 }
 0x25e   : > { %v1866_v40 = vsel %vm1465_vm4, %v1861_v36, %v1865_v27  ;;  %v1542_v7 = vsel %vm1534_vm15, %v6104_v3, 0  ;;  %v6339_v20 = vsel %vm1697_vm6, %v6279_v28, %v2329_v15  ;;  %v2401_v13 = vor.u32 %v2399_v21, %v2398_v63 }
 0x25f   : > { %v2380_v24 = vshrl.u32 %v1866_v40, 16  ;;  %v2383_v44 = vshll.u32 %v1866_v40, 16  ;;  %3193 = vmatprep.mubr.bf16.mxu1 %v6339_v20  ;;  %v1900_v45 = vsel %vm1887_vm11, %v1897_v43, %v1899_v11  ;;  %v2524_v2 = vshrl.u32 %v1787_v61, 16 }
 0x260   : > { %v2527_v37 = vshll.u32 %v1787_v61, 16  ;;  %v2452_v49 = vshrl.u32 %v1542_v7, 16  ;;  %3291 = vmatmul.mubr.bf16.gmra.mrb[36].mxu0 %v2410_v0  ;;  %v2402_v39 = vsel %vm1697_vm6, %v6281_v32, %v2401_v13  ;;  %v2460_v1 = vshrl.u32 %v1900_v45, 16 }
 0x261   : > { %v2382_v10 = vrot.slane %v2380_v24, 7  ;;  %v2463_v36 = vshll.u32 %v1900_v45, 16  ;;  %3298 = vmatprep.mubr.bf16.mxu0 %v2474_v52  ;;  %v2526_v28 = vrot.slane %v2524_v2, 7  ;;  %v2455_v21 = vshll.u32 %v1542_v7, 16  ;;  %3194 = vmatmul.mubr.bf16.gmra.mrb[16].mxu1 %v2402_v39 }
 0x262   : > { %v6345_v48 = vrot.slane %v2452_v49, 7  ;;  %v1867_v15 = vshrl.u32 %v6143_v38, 16  ;;  %v2462_v43 = vrot.slane %v2460_v1, 7  ;;  %v1871_v61 = vshll.u32 %v6138_v62, 16 }
 0x263   : > { %v2385_v40 = vor.u32 %v2383_v44, %v2382_v10  ;;  %v1777_v0 = vsel %vm6996_vm5, %v6138_v62, 0  ;;  %v2529_v32 = vor.u32 %v2527_v37, %v2526_v28  ;;  %v1788_v44 = vsel %vm1536_vm3, %v6231_v42, 0 }
 0x264   : > { %v2457_v13 = vor.u32 %v2455_v21, %v6345_v48  ;;  %v1869_v24 = vor.u32 %v1867_v15, %v1865_v27  ;;  %v1901_v52 = vrot.slane %v1777_v0, 1  ;;  %v2465_v7 = vor.u32 %v2463_v36, %v2462_v43 }
 0x265   : > { %v6354_v45 = vsel %vm1697_vm6, %v2326_v31, %v2385_v40  ;;  %v1873_v2 = vrot.slane %v1871_v61, 1  ;;  %v2530_v49 = vsel %vm1697_vm6, %v6310_v18, %v2529_v32  ;;  %v2588_v39 = vshrl.u32 %v1788_v44, 16 }
 0x266   : > { %3201 = vmatprep.mubr.bf16.mxu1 %v6354_v45  ;;  %v1902_v37 = vsel %vm1887_vm11, %v1899_v11, %v1901_v52  ;;  %vm1769_vm5 = vcmp.ne.s16.totalorder %v6018_v23, 0  ;;  %v2466_v31 = vsel %vm1697_vm6, %v6312_v9, %v2465_v7  ;;  %v2458_v27 = vsel %vm1697_vm6, %v2398_v63, %v2457_v13 }
 0x267   : > { %v1874_v1 = vsel %vm1465_vm4, %v1869_v24, %v1873_v2  ;;  %v2516_v36 = vshrl.u32 %v1902_v37, 16  ;;  %v2519_v15 = vshll.u32 %v1902_v37, 16  ;;  %v2590_v40 = vrot.slane %v2588_v39, 7 }
 0x268   : > { %v2436_v21 = vshrl.u32 %v1874_v1, 16  ;;  %v2591_v61 = vshll.u32 %v1788_v44, 16  ;;  %3299 = vmatmul.mubr.bf16.gmra.mrb[40].mxu0 %v2466_v31  ;;  %v1543_v18 = vsel %vm1535_vm2, %v6143_v38, 0  ;;  %v1875_v11 = vshrl.u32 %v6138_v62, 16 }
 0x269   : > { %v2518_v0 = vrot.slane %v2516_v36, 7  ;;  %v1778_v9 = vsel %vm1769_vm5, %v6231_v42, 0  ;;  %3306 = vmatprep.mubr.bf16.mxu0 %v2530_v49  ;;  %v2439_v32 = vshll.u32 %v1874_v1, 16  ;;  %v2508_v24 = vshrl.u32 %v1543_v18, 16  ;;  %3202 = vmatmul.mubr.bf16.gmra.mrb[20].mxu1 %v2458_v27 }
 0x26a   : > { %v6375_v63 = vrot.slane %v2436_v21, 7  ;;  %v2593_v13 = vor.u32 %v2591_v61, %v2590_v40  ;;  %v2511_v44 = vshll.u32 %v1543_v18, 16  ;;  %v6377_v37 = vor.u32 %v1875_v11, %v1873_v2 }
 0x26b   : > { %v2521_v7 = vor.u32 %v2519_v15, %v2518_v0  ;;  %v1903_v39 = vrot.slane %v1778_v9, 1  ;;  %v2510_v33 = vrot.slane %v2508_v24, 7  ;;  %v1544_v49 = vsel %vm1536_vm3, %v6138_v62, 0 }
 0x26c   : > { %v2441_v31 = vor.u32 %v2439_v32, %v6375_v63  ;;  %v2594_v36 = vsel %vm1697_vm6, %v2526_v28, %v2593_v13  ;;  %v1798_v1 = vsel %vm1779_vm8, %v6031_v30, 0  ;;  %v2572_v27 = vshrl.u32 %v6377_v37, 16 }
 0x26d   : > { %v1904_v21 = vsel %vm1887_vm11, %v1901_v52, %v1903_v39  ;;  %v2513_v15 = vor.u32 %v2511_v44, %v2510_v33  ;;  %v2202_v28 = vshrl.u32 %v6162_v59, 16  ;;  %v2522_v61 = vsel %vm1697_vm6, %v2462_v43, %v2521_v7 }
 0x26e   : > { %v6390_v2 = vsel %vm1697_vm6, %v2382_v10, %v2441_v31  ;;  %v2580_v40 = vshrl.u32 %v1904_v21, 16  ;;  %v2574_v18 = vrot.slane %v2572_v27, 7  ;;  %v2575_v11 = vshll.u32 %v6377_v37, 16 }
 0x26f   : > { %3209 = vmatprep.mubr.bf16.mxu1 %v6390_v2  ;;  %v2564_v60 = vshrl.u32 %v1544_v49, 16  ;;  %v2583_v32 = vshll.u32 %v1904_v21, 16  ;;  %v1789_v52 = vsel %vm1761_vm10, %v6031_v30, 0  ;;  %v1790_v10 = vsel %vm1762_vm9, %v6072_v6, 0 }
 0x270   : > { %v2582_v9 = vrot.slane %v2580_v40, 7  ;;  %v2190_v13 = vshrl.u32 %v1798_v1, 16  ;;  %3307 = vmatmul.mubr.bf16.gmra.mrb[44].mxu0 %v2522_v61  ;;  %v2514_v59 = vsel %vm1697_vm6, %v6345_v48, %v2513_v15  ;;  %v2577_v43 = vor.u32 %v2575_v11, %v2574_v18 }
 0x271   : > { %v1922_v24 = vrot.slane %v1789_v52, 1  ;;  %3314 = vmatprep.mubr.bf16.mxu0 %v2594_v36  ;;  %v2566_v44 = vrot.slane %v2564_v60, 7  ;;  %v1923_v39 = vrot.slane %v1790_v10, 1  ;;  %v1799_v31 = vsel %vm1529_vm7, %v6072_v6, 0  ;;  %3210 = vmatmul.mubr.bf16.gmra.mrb[24].mxu1 %v2514_v59 }
 0x272   : > { %v2585_v7 = vor.u32 %v2583_v32, %v2582_v9  ;;  %v2578_v30 = vsel %vm1697_vm6, %v6375_v63, %v2577_v43  ;;  %v2204_v27 = vrot.slane %v2202_v28, 7  ;;  %v2567_v1 = vshll.u32 %v1544_v49, 16 }
 0x273   : > { %v2194_v21 = vshrl.u32 %v1799_v31, 16  ;;  %3217 = vmatprep.mubr.bf16.mxu1 %v2578_v30  ;;  %v1924_v15 = vsel %vm1887_vm11, %v1922_v24, %v1923_v39  ;;  %v2178_v36 = vshrl.u32 %v1922_v24, 16  ;;  %v2166_v40 = vshrl.u32 %v6111_v17, 16 }
 0x274   : > { %v2586_v48 = vsel %vm1697_vm6, %v2518_v0, %v2585_v7  ;;  %v2192_v61 = vrot.slane %v2190_v13, 7  ;;  %v2212_v34 = vsel %vm1697_vm6, %v2204_v27, %v6246_v47  ;;  %v2182_v18 = vshrl.u32 %v1924_v15, 16 }
 0x275   : > { %v2569_v11 = vor.u32 %v2567_v1, %v2566_v44  ;;  %v2197_v60 = vshll.u32 %v1799_v31, 16  ;;  %v1791_v49 = vsel %vm1763_vm13, %v6067_v25, 0  ;;  %v1800_v0 = vsel %vm1530_vm12, %v6067_v25, 0 }
 0x276   : > { %v2184_v28 = vrot.slane %v2182_v18, 7  ;;  %v2185_v9 = vshll.u32 %v1924_v15, 16  ;;  %v6420_v32 = vrot.slane %v2194_v21, 7  ;;  %v1925_v17 = vrot.slane %v1791_v49, 1 }
 0x277   : > { %v2180_v52 = vrot.slane %v2178_v36, 7  ;;  %v2168_v10 = vrot.slane %v2166_v40, 7  ;;  %v1792_v47 = vsel %vm1764_vm0, %v6107_v41, 0  ;;  %v1801_v13 = vsel %vm1531_vm14, %v6107_v41, 0 }
 0x278   : > { %3315 = vmatmul.mubr.bf16.gmra.mrb[48].mxu0 %v2586_v48  ;;  %v2187_v59 = vor.u32 %v2185_v9, %v2184_v28  ;;  %v1926_v53 = vsel %vm1887_vm11, %v1923_v39, %v1925_v17  ;;  %v2260_v43 = vshrl.u32 %v1800_v0, 16  ;;  %v1927_v24 = vrot.slane %v1792_v47, 1 }
 0x279   : > { %3452 = vmatprep.mubr.bf16.mxu0 %v2212_v34  ;;  %v2570_v7 = vsel %vm1697_vm6, %v2510_v33, %v2569_v11  ;;  %v2252_v44 = vshrl.u32 %v1926_v53, 16  ;;  %v2316_v31 = vshrl.u32 %v1801_v13, 16  ;;  %vm7082_vm7 = vcmp.ne.s16.totalorder %v5976_v16, 0 }
 0x27a   : > { %v1793_v30 = vsel %vm7082_vm7, %v6104_v3, 0  ;;  %3218 = vmatmul.mubr.bf16.gmra.mrb[28].mxu1 %v2570_v7  ;;  %v2188_v27 = vsel %vm1697_vm6, %v2180_v52, %v2187_v59  ;;  %v2199_v57 = vor.u32 %v2197_v60, %v6420_v32  ;;  %v2255_v1 = vshll.u32 %v1926_v53, 16  ;;  %v4755_v7 = vld [vmem:[#allocation10 + $0x208] sm:$0xff]  }
 0x27b   : > { %v1928_v21 = vsel %vm1887_vm11, %v1925_v17, %v1927_v24  ;;  %3355 = vmatprep.mubr.bf16.mxu1 %v2188_v27  ;;  %v2254_v39 = vrot.slane %v2252_v44, 7  ;;  %v2318_v15 = vrot.slane %v2316_v31, 7  ;;  %v2319_v36 = vshll.u32 %v1801_v13, 16 }
 0x27c   : > { %v2308_v48 = vshrl.u32 %v1928_v21, 16  ;;  %v2262_v33 = vrot.slane %v2260_v43, 7  ;;  %v1929_v40 = vrot.slane %v1793_v30, 1  ;;  %vm7083_vm8 = vcmp.ne.s16.totalorder %v5890_v26, 0 }
 0x27d   : > { %v1802_v34 = vsel %vm7083_vm8, %v6104_v3, 0  ;;  %vm7084_vm12 = vcmp.ne.s16.totalorder %v5980_v22, 0  ;;  %v2257_v11 = vor.u32 %v2255_v1, %v2254_v39  ;;  %v2321_v49 = vor.u32 %v2319_v36, %v2318_v15 }
 0x27e   : > { %v1794_v18 = vsel %vm7084_vm12, %v6143_v38, 0  ;;  %v6442_v60 = vrot.slane %v2308_v48, 7  ;;  %v2372_v9 = vshrl.u32 %v1802_v34, 16  ;;  %v2263_v17 = vshll.u32 %v1800_v0, 16 }
 0x27f   : > { %v1930_v52 = vsel %vm1887_vm11, %v1927_v24, %v1929_v40  ;;  %v1931_v47 = vrot.slane %v1794_v18, 1  ;;  %vm7085_vm14 = vcmp.ne.s16.totalorder %v5931_v14, 0  ;;  %v2200_v26 = vsel %vm1697_vm6, %v2192_v61, %v2199_v57 }
 0x280   : > { %v1803_v13 = vsel %vm7085_vm14, %v6143_v38, 0  ;;  %v2311_v59 = vshll.u32 %v1928_v21, 16  ;;  %v6450_v53 = vsel %vm1697_vm6, %v2262_v33, %v2321_v49  ;;  %v2364_v43 = vshrl.u32 %v1930_v52, 16  ;;  %3453 = vmatmul.mubr.bf16.vlgmr.msra.gmra.mrb[52].mxu0 %v2200_v26 }
 0x281   : > { %v2374_v44 = vrot.slane %v2372_v9, 7  ;;  %v2375_v31 = vshll.u32 %v1802_v34, 16  ;;  %v6453_v0 = vsel %vm1887_vm11, %v1929_v40, %v1931_v47  ;;  %v2428_v24 = vshrl.u32 %v1803_v13, 16  ;;  %3460 = vmatprep.mubr.bf16.mxu0 %v6296_v35 }
 0x282   : > { %v2176_v14 = vsel %vm1697_vm6, %v2168_v10, %v6199_v58  ;;  %v2258_v61 = vsel %vm1697_vm6, %v2184_v28, %v2257_v11  ;;  %v2265_v30 = vor.u32 %v2263_v17, %v2262_v33  ;;  %v2313_v27 = vor.u32 %v2311_v59, %v6442_v60  ;;  %v4756_v10 = vld [vmem:[#allocation10 + $0x210] sm:$0xff]  }
 0x283   : > { %3356 = vmatmul.mubr.bf16.vlgmr.msra.gmra.mrb[32].mxu1 %v2176_v14  ;;  %v2377_v57 = vor.u32 %v2375_v31, %v2374_v44  ;;  %v2430_v1 = vrot.slane %v2428_v24, 7  ;;  %v2431_v21 = vshll.u32 %v1803_v13, 16  ;;  %v1906_v48 = vshll.u32 %v6231_v42, 16 }
 0x284   : > { %4486 = vmatpush3.bf16.msra.mxu1 %v6319_v55  ;;  %3363 = vmatprep.mubr.bf16.mxu1 %v2258_v61  ;;  %v6462_v36 = vrot.slane %v2364_v43, 7  ;;  %v2420_v40 = vshrl.u32 %v6453_v0, 16  ;;  %v1795_v58 = vsel %vm1767_vm1, %v6138_v62, 0  ;;  %v1804_v28 = vsel %vm1534_vm15, %v6138_v62, 0 }
 0x285   : > { %4487 = vmatprep.subr.bf16.mxu1 %v4755_v7  ;;  %v6472_v33 = vsel %vm1697_vm6, %v2318_v15, %v2377_v57  ;;  %v2433_v34 = vor.u32 %v2431_v21, %v2430_v1  ;;  %v1908_v55 = vrot.slane %v1906_v48, 1  ;;  %v1933_v18 = vrot.slane %v1795_v58, 1 }
 0x286   : > { %v2266_v11 = vsel %vm1697_vm6, %v6420_v32, %v2265_v30  ;;  %v2314_v49 = vsel %vm1697_vm6, %v2254_v39, %v2313_v27  ;;  %v2367_v9 = vshll.u32 %v1930_v52, 16  ;;  %v2484_v17 = vshrl.u32 %v1804_v28, 16  ;;  %v4757_v52 = vld [vmem:[#allocation10 + $0x218] sm:$0xff]  }
 0x287   : > { %v6478_v13 = vsel %vm1697_vm6, %v2374_v44, %v2433_v34  ;;  %v1909_v50 = vsel %vm1465_vm4, %v6377_v37, %v1908_v55  ;;  %v6483_v26 = vsel %vm1887_vm11, %v1931_v47, %v1933_v18  ;;  %v1910_v15 = vshrl.u32 %v6231_v42, 16  ;;  %v4758_v34 = vld [vmem:[#allocation10 + $0x220] sm:$0xff]  }
 0x288   : > { %4488 = vmatpush3.bf16.msra.mxu1 %v4755_v7  ;;  %v2369_v59 = vor.u32 %v2367_v9, %v6462_v36  ;;  %v6487_v43 = vrot.slane %v2420_v40, 7  ;;  %v2492_v32 = vshrl.u32 %v1909_v50, 16  ;;  %v2487_v39 = vshll.u32 %v1804_v28, 16  ;;  %3461 = vmatmul.mubr.bf16.gmra.mrb[56].mxu0 %v2266_v11 }
 0x289   : > { %4489 = vmatprep.subr.bf16.mxu1 %v4756_v10  ;;  %v2495_v44 = vshll.u32 %v1909_v50, 16  ;;  %v2486_v31 = vrot.slane %v2484_v17, 7  ;;  %v6489_v24 = vor.u32 %v1910_v15, %v1908_v55  ;;  %v1940_v37 = vshll.u32 %v6196_v19, 16  ;;  %3468 = vmatprep.mubr.bf16.mxu0 %v6339_v20 }
 0x28a   : > { %v6493_v47 = vrot.slane %v2492_v32, 7  ;;  %v2476_v7 = vshrl.u32 %v6483_v26, 16  ;;  %vm7086_vm15 = vcmp.ne.s16.totalorder %v6088_v12, 0  ;;  %v1805_v61 = vsel %vm1535_vm2, %v6231_v42, 0  ;;  %vm7088_vm2 = vmmov %vm7084_vm12 }
 0x28b   : > { %v1796_v14 = vsel %vm7086_vm15, %v6231_v42, 0  ;;  %3364 = vmatmul.mubr.bf16.gmra.mrb[36].mxu1 %v6261_v54  ;;  %v2489_v30 = vor.u32 %v2487_v39, %v2486_v31  ;;  %v1942_v27 = vrot.slane %v1940_v37, 1  ;;  %v2540_v21 = vshrl.u32 %v1805_v61, 16  ;;  %v4759_v39 = vld [vmem:[#allocation10 + $0x228] sm:$0xff]  }
 0x28c   : > { %v1935_v57 = vrot.slane %v1796_v14, 1  ;;  %3371 = vmatprep.mubr.bf16.mxu1 %v2314_v49  ;;  %4490 = vmatpush3.bf16.msra.mxu1 %v4756_v10  ;;  %v2370_v48 = vsel %vm1697_vm6, %v6442_v60, %v2369_v59  ;;  %v2497_v40 = vor.u32 %v2495_v44, %v6493_v47  ;;  %v2543_v58 = vshll.u32 %v1805_v61, 16 }
 0x28d   : > { %v1944_v28 = vshrl.u32 %v6196_v19, 16  ;;  %4491 = vmatprep.subr.bf16.mxu1 %v4757_v52  ;;  %v6508_v5 = vsel %vm1697_vm6, %v2430_v1, %v2489_v30  ;;  %v1943_v54 = vsel %vm1465_vm4, %v6489_v24, %v1942_v27  ;;  %v2542_v11 = vrot.slane %v2540_v21, 7  ;;  %vm7087_vm4 = vmmov %vm7082_vm7 }
 0x28e   : > { %v1936_v55 = vsel %vm1887_vm11, %v1933_v18, %v1935_v57  ;;  %v6515_v10 = vsel %vm1697_vm6, %v6375_v63, %v2497_v40  ;;  %v6517_v60 = vrot.slane %v2476_v7, 7  ;;  %v2548_v49 = vshrl.u32 %v1943_v54, 16 }
 0x28f   : > { %v2551_v9 = vshll.u32 %v1943_v54, 16  ;;  %v2532_v17 = vshrl.u32 %v1936_v55, 16  ;;  %v2535_v50 = vshll.u32 %v1936_v55, 16  ;;  %v2545_v15 = vor.u32 %v2543_v58, %v2542_v11  ;;  %v4760_v55 = vld [vmem:[#allocation10 + $0x230] sm:$0xff]  }
 0x290   : > { %v1946_v59 = vor.u32 %v1944_v28, %v1942_v27  ;;  %4492 = vmatpush3.bf16.msra.mxu1 %v4757_v52  ;;  %v2550_v1 = vrot.slane %v2548_v49, 7  ;;  %v1797_v32 = vsel %vm1769_vm5, %v6196_v19, 0  ;;  %v1806_v18 = vsel %vm1536_vm3, %v6196_v19, 0  ;;  %3469 = vmatmul.mubr.bf16.gmra.mrb[60].mxu0 %v6450_v53 }
 0x291   : > { %v2596_v63 = vshrl.u32 %v6489_v24, 16  ;;  %4493 = vmatprep.subr.bf16.mxu1 %v4758_v34  ;;  %v2534_v44 = vrot.slane %v2532_v17, 7  ;;  %v6528_v37 = vsel %vm1697_vm6, %v2486_v31, %v2545_v15  ;;  %3476 = vmatprep.mubr.bf16.mxu0 %v6354_v45  ;;  %v1937_v14 = vrot.slane %v1797_v32, 1 }
 0x292   : > { %v2620_v52 = vshrl.u32 %v1946_v59, 16  ;;  %v2623_v7 = vshll.u32 %v1946_v59, 16  ;;  %v2553_v23 = vor.u32 %v2551_v9, %v2550_v1  ;;  %v2612_v61 = vshrl.u32 %v1806_v18, 16  ;;  %v4761_v59 = vld [vmem:[#allocation10 + $0x238] sm:$0xff]  }
 0x293   : > { %v2615_v30 = vshll.u32 %v1806_v18, 16  ;;  %3372 = vmatmul.mubr.bf16.gmra.mrb[40].mxu1 %v6296_v35  ;;  %v2537_v8 = vor.u32 %v2535_v50, %v2534_v44  ;;  %v2598_v21 = vrot.slane %v2596_v63, 7  ;;  %v2599_v53 = vshll.u32 %v6489_v24, 16 }
 0x294   : > { %v2622_v27 = vrot.slane %v2620_v52, 7  ;;  %3379 = vmatprep.mubr.bf16.mxu1 %v2370_v48  ;;  %v2423_v40 = vshll.u32 %v6453_v0, 16  ;;  %4494 = vmatpush3.bf16.msra.mxu1 %v4758_v34  ;;  %v6536_v31 = vsel %vm1697_vm6, %v6493_v47, %v2553_v23  ;;  %v1938_v58 = vsel %vm1887_vm11, %v1935_v57, %v1937_v14 }
 0x295   : > { %v2614_v28 = vrot.slane %v2612_v61, 7  ;;  %4495 = vmatprep.subr.bf16.mxu1 %v4759_v39  ;;  %v6541_v35 = vsel %vm1697_vm6, %v6517_v60, %v2537_v8  ;;  %v2604_v49 = vshrl.u32 %v1938_v58, 16  ;;  %v2607_v24 = vshll.u32 %v1938_v58, 16 }
 0x296   : > { %v2625_v54 = vor.u32 %v2623_v7, %v2622_v27  ;;  %v2601_v9 = vor.u32 %v2599_v53, %v2598_v21  ;;  %v2425_v0 = vor.u32 %v2423_v40, %v6487_v43  ;;  %v6558_v32 = vsel %vm7087_vm4, %v6143_v38, 0 }
 0x297   : > { %v2617_v48 = vor.u32 %v2615_v30, %v2614_v28  ;;  %v2606_v17 = vrot.slane %v2604_v49, 7  ;;  %v1813_v16 = vsel %vm1767_vm1, %v6231_v42, 0  ;;  %v2479_v38 = vshll.u32 %v6483_v26, 16  ;;  %vm7089_vm1 = vmmov %vm7086_vm15 }
 0x298   : > { %v6545_v34 = vsel %vm1697_vm6, %v2550_v1, %v2625_v54  ;;  %4496 = vmatpush3.bf16.msra.mxu1 %v4759_v39  ;;  %v6552_v50 = vsel %vm1697_vm6, %v6493_v47, %v2601_v9  ;;  %3477 = vmatmul.mubr.bf16.gmra.mrb[64].mxu0 %v6472_v33  ;;  %v1963_v33 = vrot.slane %v6558_v32, 1  ;;  %v1812_v1 = vsel %vm7088_vm2, %v6138_v62, 0 }
 0x299   : > { %v6548_v57 = vsel %vm1697_vm6, %v2542_v11, %v2617_v48  ;;  %4497 = vmatprep.subr.bf16.mxu1 %v4760_v55  ;;  %v2609_v15 = vor.u32 %v2607_v24, %v2606_v17  ;;  %3484 = vmatprep.mubr.bf16.mxu0 %v6390_v2  ;;  %v2426_v11 = vsel %vm1697_vm6, %v6462_v36, %v2425_v0  ;;  %v1967_v18 = vrot.slane %v1813_v16, 1 }
 0x29a   : > { %v2481_v36 = vor.u32 %v2479_v38, %v6517_v60  ;;  %v1814_v29 = vsel %vm7089_vm1, %v6196_v19, 0  ;;  %v7090_v39 = vmov 0   ;;  %v1807_v12 = vsel %vm1761_vm10, %v6072_v6, 0 }
 0x29b   : > { %3380 = vmatmul.mubr.bf16.gmra.mrb[44].mxu1 %v6339_v20  ;;  %v2610_v47 = vsel %vm1697_vm6, %v2534_v44, %v2609_v15  ;;  %v1965_v20 = vrot.slane %v1812_v1, 1  ;;  %v1969_v60 = vrot.slane %v1814_v29, 1  ;;  %v1971_v44 = vrot.slane %v7090_v39, 1 }
 0x29c   : > { %3387 = vmatprep.mubr.bf16.mxu1 %v2426_v11  ;;  %4498 = vmatpush3.bf16.msra.mxu1 %v4760_v55  ;;  %v2482_v26 = vsel %vm1697_vm6, %v6487_v43, %v2481_v36  ;;  %v1808_v19 = vsel %vm1762_vm9, %v6067_v25, 0  ;;  %v1956_v27 = vrot.slane %v1807_v12, 1  ;;  %v1809_v58 = vsel %vm1763_vm13, %v6107_v41, 0 }
 0x29d   : > { %4499 = vmatprep.subr.bf16.mxu1 %v4761_v59  ;;  %v6577_v63 = vsel %vm1887_vm11, %v1963_v33, %v1965_v20  ;;  %v1968_v22 = vsel %vm1887_vm11, %v1965_v20, %v1967_v18  ;;  %v1970_v7 = vsel %vm1887_vm11, %v1967_v18, %v1969_v60  ;;  %v1957_v21 = vrot.slane %v1808_v19, 1 }
 0x29e   : > { %v2444_v62 = vshrl.u32 %v6577_v63, 16  ;;  %v2500_v42 = vshrl.u32 %v1968_v22, 16  ;;  %v2503_v52 = vshll.u32 %v1968_v22, 16  ;;  %v2556_v14 = vshrl.u32 %v1970_v7, 16 }
 0x29f   : > { %v2559_v61 = vshll.u32 %v1970_v7, 16  ;;  %v1958_v40 = vsel %vm1887_vm11, %v1956_v27, %v1957_v21  ;;  %v1959_v55 = vrot.slane %v1809_v58, 1  ;;  %v2214_v49 = vshrl.u32 %v1956_v27, 16 }
 0x2a0   : > { %4500 = vmatpush3.bf16.msra.mxu1 %v4761_v59  ;;  %3485 = vmatmul.mubr.bf16.gmra.mrb[68].mxu0 %v6478_v13  ;;  %v2502_v13 = vrot.slane %v2500_v42, 7  ;;  %v2446_v23 = vrot.slane %v2444_v62, 7  ;;  %v2558_v46 = vrot.slane %v2556_v14, 7  ;;  %v2218_v54 = vshrl.u32 %v1958_v40, 16 }
 0x2a1   : > { %3492 = vmatprep.mubr.bf16.mxu0 %v6515_v10  ;;  %v1960_v56 = vsel %vm1887_vm11, %v1957_v21, %v1959_v55  ;;  %v2221_v4 = vshll.u32 %v1958_v40, 16  ;;  %v2216_v9 = vrot.slane %v2214_v49, 7  ;;  %v2447_v38 = vshll.u32 %v6577_v63, 16 }
 0x2a2   : > { %v2505_v43 = vor.u32 %v2503_v52, %v2502_v13  ;;  %v2561_v51 = vor.u32 %v2559_v61, %v2558_v46  ;;  %v2279_v17 = vshll.u32 %v1960_v56, 16 }
 0x2a3   : > { %3388 = vmatmul.mubr.bf16.gmra.mrb[48].mxu1 %v6354_v45  ;;  %v1972_v45 = vsel %vm1887_vm11, %v1969_v60, %v1971_v44  ;;  %v2449_v32 = vor.u32 %v2447_v38, %v2446_v23 }
 0x2a4   : > { %3395 = vmatprep.mubr.bf16.mxu1 %v2482_v26  ;;  %v2628_v30 = vshrl.u32 %v1972_v45, 16  ;;  %v2631_v8 = vshll.u32 %v1972_v45, 16  ;;  %v2506_v53 = vsel %vm1697_vm6, %v2446_v23, %v2505_v43  ;;  %v2562_v28 = vsel %vm1697_vm6, %v2502_v13, %v2561_v51 }
 0x2a6   : > { %v2630_v6 = vrot.slane %v2628_v30, 7 }
 0x2a8   : > { %3493 = vmatmul.mubr.bf16.gmra.mrb[72].mxu0 %v6508_v5  ;;  %v2633_v25 = vor.u32 %v2631_v8, %v2630_v6  ;;  %v1810_v5 = vsel %vm1764_vm0, %v6104_v3, 0  ;;  %v2276_v3 = vshrl.u32 %v1960_v56, 16 }
 0x2a9   : > { %3500 = vmatprep.mubr.bf16.mxu0 %v6536_v31 }
 0x2aa   : > { %v2634_v31 = vsel %vm1697_vm6, %v2558_v46, %v2633_v25  ;;  %v2278_v0 = vrot.slane %v2276_v3, 7 }
 0x2ab   : > { %3396 = vmatmul.mubr.bf16.gmra.mrb[52].mxu1 %v6390_v2  ;;  %v1961_v2 = vrot.slane %v1810_v5, 1 }
 0x2ac   : > { %3403 = vmatprep.mubr.bf16.mxu1 %v6541_v35  ;;  %v2220_v35 = vrot.slane %v2218_v54, 7  ;;  %v2281_v59 = vor.u32 %v2279_v17, %v2278_v0 }
 0x2ad   : > { %v1962_v41 = vsel %vm1887_vm11, %v1959_v55, %v1961_v2 }
 0x2ae   : > { %v2223_v24 = vor.u32 %v2221_v4, %v2220_v35  ;;  %v2332_v48 = vshrl.u32 %v1962_v41, 16  ;;  %v2335_v15 = vshll.u32 %v1962_v41, 16  ;;  %v2282_v1 = vsel %vm1697_vm6, %v2220_v35, %v2281_v59 }
 0x2b0   : > { %3501 = vmatmul.mubr.bf16.gmra.mrb[76].mxu0 %v6528_v37  ;;  %v2224_v37 = vsel %vm1697_vm6, %v2216_v9, %v2223_v24 }
 0x2b1   : > { %3508 = vmatprep.mubr.bf16.mxu0 %v6545_v34  ;;  %v1964_v34 = vsel %vm1887_vm11, %v1961_v2, %v1963_v33 }
 0x2b2   : > { %v2388_v11 = vshrl.u32 %v1964_v34, 16 }
 0x2b3   : > { %3404 = vmatmul.mubr.bf16.gmra.mrb[56].mxu1 %v6515_v10  ;;  %v2334_v10 = vrot.slane %v2332_v48, 7 }
 0x2b4   : > { %3411 = vmatprep.mubr.bf16.mxu1 %v2610_v47 }
 0x2b5   : > { %v2337_v47 = vor.u32 %v2335_v15, %v2334_v10 }
 0x2b7   : > { %v2338_v16 = vsel %vm1697_vm6, %v2278_v0, %v2337_v47 }
 0x2b8   : > { %3509 = vmatmul.mubr.bf16.gmra.mrb[80].mxu0 %v6548_v57  ;;  %v2390_v57 = vrot.slane %v2388_v11, 7 }
 0x2ba   : > { %v2450_v18 = vsel %vm1697_vm6, %v2390_v57, %v2449_v32 }
 0x2bb   : > { %3412 = vmatmul.mubr.bf16.gmra.mrb[60].mxu1 %v6552_v50  ;;  %v2391_v50 = vshll.u32 %v1964_v34, 16 }
 0x2bc   : > { %4501 = vmatprep.mubr.bf16.mxu1 %v2224_v37 }
 0x2bd   : > { %v2393_v20 = vor.u32 %v2391_v50, %v2390_v57 }
 0x2bf   : > { %v2394_v33 = vsel %vm1697_vm6, %v2334_v10, %v2393_v20 }
 0x2c3   : > { %4502 = vmatmul.mubr.bf16.vlgmr.msra.gmra.mrb[64].mxu1 %v2282_v1 }
 0x2c4   : > { %4505 = vmatprep.mubr.bf16.mxu1 %v2338_v16 }
 0x2cb   : > { %4506 = vmatmul.mubr.bf16.gmra.mrb[68].mxu1 %v2394_v33 }
 0x2cc   : > { %4509 = vmatprep.mubr.bf16.mxu1 %v2450_v18 }
 0x2d3   : > { %4510 = vmatmul.mubr.bf16.gmra.mrb[72].mxu1 %v2506_v53 }
 0x2d4   : > { %4513 = vmatprep.mubr.bf16.mxu1 %v2562_v28 }
 0x2db   : > { %4514 = vmatmul.mubr.bf16.gmra.mrb[76].mxu1 %v2634_v31 }
 0x30a   : > { %v4257_v36 = vpop.f32.mrb[20].mxu0 }
 0x30b   : > { %v4258_v22 = vpop.f32.mrb[21].mxu0 }
 0x30c   : > { %v4259_v29 = vadd.f32 %v4258_v22, %v4257_v36  ;;  %v4260_v62 = vpop.f32.mrb[22].mxu0 }
 0x30d   : > { %v4261_v42 = vpop.f32.mrb[23].mxu0 }
 0x30e   : > { %v4262_v26 = vadd.f32 %v4261_v42, %v4260_v62 }
 0x311   : > { %v4193_v60 = vpop.f32.mrb[0].mxu1 }
 0x312   : > { %v4194_v39 = vpop.f32.mrb[1].mxu1 }
 0x313   : > { %v4195_v63 = vadd.f32 %v4194_v39, %v4193_v60  ;;  %v4196_v44 = vpop.f32.mrb[2].mxu1 }
 0x314   : > { %v4197_v13 = vpop.f32.mrb[3].mxu1 }
 0x315   : > { %v6628_v52 = vadd.f32 %v4259_v29, %v4195_v63  ;;  %v4198_v12 = vadd.f32 %v4197_v13, %v4196_v44 }
 0x317   : > { %v6630_v19 = vadd.f32 %v4262_v26, %v4198_v12 }
 0x319   : > { %v4263_v7 = vpop.f32.mrb[24].mxu0 }
 0x31a   : > { %v4264_v45 = vpop.f32.mrb[25].mxu0 }
 0x31b   : > { %v4265_v23 = vadd.f32 %v4264_v45, %v4263_v7  ;;  %v4266_v43 = vpop.f32.mrb[26].mxu0  ;;  %v4199_v14 = vpop.f32.mrb[4].mxu1 }
 0x31c   : > { %v4267_v61 = vpop.f32.mrb[27].mxu0  ;;  %v4200_v30 = vpop.f32.mrb[5].mxu1 }
 0x31d   : > { %v4268_v8 = vadd.f32 %v4267_v61, %v4266_v43  ;;  %v4201_v27 = vadd.f32 %v4200_v30, %v4199_v14  ;;  %v4202_v21 = vpop.f32.mrb[6].mxu1 }
 0x31e   : > { %v4203_v53 = vpop.f32.mrb[7].mxu1 }
 0x31f   : > { %v6632_v46 = vadd.f32 %v4265_v23, %v4201_v27  ;;  %v4204_v6 = vadd.f32 %v4203_v53, %v4202_v21 }
 0x321   : > { %v6634_v51 = vadd.f32 %v4268_v8, %v4204_v6 }
 0x322   : > { %v4269_v25 = vpop.f32.mrb[28].mxu0 }
 0x323   : > { %v4270_v40 = vpop.f32.mrb[29].mxu0 }
 0x324   : > { %v4271_v58 = vadd.f32 %v4270_v40, %v4269_v25  ;;  %v4272_v28 = vpop.f32.mrb[30].mxu0  ;;  %v4205_v5 = vpop.f32.mrb[8].mxu1 }
 0x325   : > { %v4273_v31 = vpop.f32.mrb[31].mxu0  ;;  %v4206_v54 = vpop.f32.mrb[9].mxu1 }
 0x326   : > { %v4274_v55 = vadd.f32 %v4273_v31, %v4272_v28  ;;  %v4207_v2 = vadd.f32 %v4206_v54, %v4205_v5  ;;  %v4208_v35 = vpop.f32.mrb[10].mxu1 }
 0x327   : > { %v4209_v56 = vpop.f32.mrb[11].mxu1 }
 0x328   : > { %v6636_v41 = vadd.f32 %v4271_v58, %v4207_v2  ;;  %v4210_v49 = vadd.f32 %v4209_v56, %v4208_v35 }
 0x32a   : > { %v6638_v4 = vadd.f32 %v4274_v55, %v4210_v49 }
 0x32b   : > { %v4275_v3 = vpop.f32.mrb[32].mxu0 }
 0x32c   : > { %v4276_v24 = vpop.f32.mrb[33].mxu0  ;;  %v4211_v0 = vpop.f32.mrb[12].mxu1 }
 0x32d   : > { %v4277_v48 = vadd.f32 %v4276_v24, %v4275_v3  ;;  %v4278_v9 = vpop.f32.mrb[34].mxu0  ;;  %v4212_v10 = vpop.f32.mrb[13].mxu1 }
 0x32e   : > { %v4279_v37 = vpop.f32.mrb[35].mxu0  ;;  %v4213_v17 = vadd.f32 %v4212_v10, %v4211_v0  ;;  %v4214_v15 = vpop.f32.mrb[14].mxu1 }
 0x32f   : > { %v4280_v34 = vadd.f32 %v4279_v37, %v4278_v9  ;;  %v4215_v59 = vpop.f32.mrb[15].mxu1 }
 0x330   : > { %v6640_v11 = vadd.f32 %v4277_v48, %v4213_v17  ;;  %v4216_v47 = vadd.f32 %v4215_v59, %v4214_v15 }
 0x332   : > { %v6642_v1 = vadd.f32 %v4280_v34, %v4216_v47 }
 0x333   : > { %v4281_v57 = vpop.f32.mrb[36].mxu0 }
 0x334   : > { %v4282_v16 = vpop.f32.mrb[37].mxu0  ;;  %v4217_v20 = vpop.f32.mrb[16].mxu1 }
 0x335   : > { %v4283_v50 = vadd.f32 %v4282_v16, %v4281_v57  ;;  %v4284_v38 = vpop.f32.mrb[38].mxu0  ;;  %v4218_v33 = vpop.f32.mrb[17].mxu1 }
 0x336   : > { %v4285_v32 = vpop.f32.mrb[39].mxu0  ;;  %v4219_v36 = vadd.f32 %v4218_v33, %v4217_v20  ;;  %v4220_v22 = vpop.f32.mrb[18].mxu1 }
 0x337   : > { %v4286_v18 = vadd.f32 %v4285_v32, %v4284_v38  ;;  %v4221_v29 = vpop.f32.mrb[19].mxu1 }
 0x338   : > { %v6644_v62 = vadd.f32 %v4283_v50, %v4219_v36  ;;  %v4222_v42 = vadd.f32 %v4221_v29, %v4220_v22 }
 0x33a   : > { %v6646_v26 = vadd.f32 %v4286_v18, %v4222_v42 }
 0x33b   : > { %v4287_v60 = vpop.f32.mrb[40].mxu0 }
 0x33c   : > { %v4288_v39 = vpop.f32.mrb[41].mxu0  ;;  %v4223_v13 = vpop.f32.mrb[20].mxu1 }
 0x33d   : > { %v4289_v63 = vadd.f32 %v4288_v39, %v4287_v60  ;;  %v4290_v44 = vpop.f32.mrb[42].mxu0  ;;  %v4224_v7 = vpop.f32.mrb[21].mxu1 }
 0x33e   : > { %v4291_v12 = vpop.f32.mrb[43].mxu0  ;;  %v4225_v23 = vadd.f32 %v4224_v7, %v4223_v13  ;;  %v4226_v43 = vpop.f32.mrb[22].mxu1 }
 0x33f   : > { %v4292_v45 = vadd.f32 %v4291_v12, %v4290_v44  ;;  %v4227_v14 = vpop.f32.mrb[23].mxu1 }
 0x340   : > { %v6648_v61 = vadd.f32 %v4289_v63, %v4225_v23  ;;  %v4228_v30 = vadd.f32 %v4227_v14, %v4226_v43 }
 0x342   : > { %v6650_v8 = vadd.f32 %v4292_v45, %v4228_v30 }
 0x343   : > { %v4293_v27 = vpop.f32.mrb[44].mxu0 }
 0x344   : > { %v4294_v21 = vpop.f32.mrb[45].mxu0  ;;  %v4229_v25 = vpop.f32.mrb[24].mxu1 }
 0x345   : > { %v4295_v53 = vadd.f32 %v4294_v21, %v4293_v27  ;;  %v4296_v6 = vpop.f32.mrb[46].mxu0  ;;  %v4230_v58 = vpop.f32.mrb[25].mxu1 }
 0x346   : > { %v4297_v40 = vpop.f32.mrb[47].mxu0  ;;  %v4231_v5 = vadd.f32 %v4230_v58, %v4229_v25  ;;  %v4232_v31 = vpop.f32.mrb[26].mxu1 }
 0x347   : > { %v4298_v28 = vadd.f32 %v4297_v40, %v4296_v6  ;;  %v4233_v54 = vpop.f32.mrb[27].mxu1 }
 0x348   : > { %v6652_v55 = vadd.f32 %v4295_v53, %v4231_v5  ;;  %v4234_v2 = vadd.f32 %v4233_v54, %v4232_v31 }
 0x34a   : > { %v6654_v35 = vadd.f32 %v4298_v28, %v4234_v2 }
 0x34b   : > { %v4299_v56 = vpop.f32.mrb[48].mxu0 }
 0x34c   : > { %v4300_v49 = vpop.f32.mrb[49].mxu0 }
 0x34d   : > { %v4301_v3 = vadd.f32 %v4300_v49, %v4299_v56  ;;  %v4302_v24 = vpop.f32.mrb[50].mxu0  ;;  %v4235_v48 = vpop.f32.mrb[28].mxu1 }
 0x34e   : > { %v4303_v9 = vpop.f32.mrb[51].mxu0  ;;  %v4236_v0 = vpop.f32.mrb[29].mxu1 }
 0x34f   : > { %v4304_v37 = vadd.f32 %v4303_v9, %v4302_v24  ;;  %v4237_v10 = vadd.f32 %v4236_v0, %v4235_v48  ;;  %v4238_v34 = vpop.f32.mrb[30].mxu1 }
 0x350   : > { %v4239_v17 = vpop.f32.mrb[31].mxu1 }
 0x351   : > { %v6656_v15 = vadd.f32 %v4301_v3, %v4237_v10  ;;  %v4240_v59 = vadd.f32 %v4239_v17, %v4238_v34 }
 0x353   : > { %v6658_v47 = vadd.f32 %v4304_v37, %v4240_v59  ;;  %v4385_v57 = vpop.f32.mrb[52].mxu0 }
 0x354   : > { %v4386_v16 = vpop.f32.mrb[53].mxu0 }
 0x355   : > { %v4387_v50 = vadd.f32 %v4386_v16, %v4385_v57  ;;  %v4388_v38 = vpop.f32.mrb[54].mxu0 }
 0x356   : > { %v4321_v20 = vpop.f32.mrb[32].mxu1  ;;  %v4389_v32 = vpop.f32.mrb[55].mxu0 }
 0x357   : > { %v4322_v33 = vpop.f32.mrb[33].mxu1  ;;  %v4390_v18 = vadd.f32 %v4389_v32, %v4388_v38 }
 0x358   : > { %v4323_v36 = vadd.f32 %v4322_v33, %v4321_v20  ;;  %v4324_v22 = vpop.f32.mrb[34].mxu1 }
 0x359   : > { %v4325_v29 = vpop.f32.mrb[35].mxu1 }
 0x35a   : > { %v3358_v42 = vadd.f32 %v4323_v36, %v6628_v52  ;;  %v4326_v60 = vadd.f32 %v4325_v29, %v4324_v22 }
 0x35b   : > { %v4391_v63 = vpop.f32.mrb[56].mxu0 }
 0x35c   : > { %v3361_v39 = vadd.f32 %v4326_v60, %v6630_v19  ;;  %v6662_v44 = vadd.f32 %v4387_v50, %v3358_v42  ;;  %v4392_v13 = vpop.f32.mrb[57].mxu0 }
 0x35d   : > { %v4393_v12 = vadd.f32 %v4392_v13, %v4391_v63  ;;  %v4394_v7 = vpop.f32.mrb[58].mxu0 }
 0x35e   : > { %v4327_v45 = vpop.f32.mrb[36].mxu1  ;;  %v6664_v23 = vadd.f32 %v4390_v18, %v3361_v39  ;;  %v4395_v43 = vpop.f32.mrb[59].mxu0 }
 0x35f   : > { %v4328_v14 = vpop.f32.mrb[37].mxu1  ;;  %v4396_v30 = vadd.f32 %v4395_v43, %v4394_v7 }
 0x360   : > { %v4329_v27 = vadd.f32 %v4328_v14, %v4327_v45  ;;  %v4330_v21 = vpop.f32.mrb[38].mxu1 }
 0x361   : > { %v4331_v53 = vpop.f32.mrb[39].mxu1 }
 0x362   : > { %v3366_v52 = vadd.f32 %v4329_v27, %v6632_v46  ;;  %v4332_v6 = vadd.f32 %v4331_v53, %v4330_v21 }
 0x363   : > { %v4397_v25 = vpop.f32.mrb[60].mxu0 }
 0x364   : > { %v3369_v19 = vadd.f32 %v4332_v6, %v6634_v51  ;;  %v6668_v40 = vadd.f32 %v4393_v12, %v3366_v52  ;;  %v4398_v58 = vpop.f32.mrb[61].mxu0 }
 0x365   : > { %v4399_v28 = vadd.f32 %v4398_v58, %v4397_v25  ;;  %v4400_v5 = vpop.f32.mrb[62].mxu0 }
 0x366   : > { %v4333_v31 = vpop.f32.mrb[40].mxu1  ;;  %v6670_v54 = vadd.f32 %v4396_v30, %v3369_v19  ;;  %v4401_v2 = vpop.f32.mrb[63].mxu0 }
 0x367   : > { %v4334_v56 = vpop.f32.mrb[41].mxu1  ;;  %v4402_v49 = vadd.f32 %v4401_v2, %v4400_v5 }
 0x368   : > { %v4335_v3 = vadd.f32 %v4334_v56, %v4333_v31  ;;  %v4336_v24 = vpop.f32.mrb[42].mxu1 }
 0x369   : > { %v4337_v48 = vpop.f32.mrb[43].mxu1 }
 0x36a   : > { %v3374_v46 = vadd.f32 %v4335_v3, %v6636_v41  ;;  %v4338_v9 = vadd.f32 %v4337_v48, %v4336_v24 }
 0x36b   : > { %v4403_v0 = vpop.f32.mrb[64].mxu0 }
 0x36c   : > { %v3377_v51 = vadd.f32 %v4338_v9, %v6638_v4  ;;  %v6674_v37 = vadd.f32 %v4399_v28, %v3374_v46  ;;  %v4404_v10 = vpop.f32.mrb[65].mxu0 }
 0x36d   : > { %v4405_v34 = vadd.f32 %v4404_v10, %v4403_v0  ;;  %v4406_v17 = vpop.f32.mrb[66].mxu0 }
 0x36e   : > { %v4339_v59 = vpop.f32.mrb[44].mxu1  ;;  %v6676_v57 = vadd.f32 %v4402_v49, %v3377_v51  ;;  %v4407_v16 = vpop.f32.mrb[67].mxu0 }
 0x36f   : > { %v4340_v50 = vpop.f32.mrb[45].mxu1  ;;  %v4408_v38 = vadd.f32 %v4407_v16, %v4406_v17 }
 0x370   : > { %v4341_v20 = vadd.f32 %v4340_v50, %v4339_v59  ;;  %v4342_v32 = vpop.f32.mrb[46].mxu1 }
 0x371   : > { %v4343_v33 = vpop.f32.mrb[47].mxu1 }
 0x372   : > { %v3382_v41 = vadd.f32 %v4341_v20, %v6640_v11  ;;  %v4344_v18 = vadd.f32 %v4343_v33, %v4342_v32 }
 0x373   : > { %v4409_v36 = vpop.f32.mrb[68].mxu0 }
 0x374   : > { %v3385_v4 = vadd.f32 %v4344_v18, %v6642_v1  ;;  %v6680_v22 = vadd.f32 %v4405_v34, %v3382_v41  ;;  %v4410_v29 = vpop.f32.mrb[69].mxu0 }
 0x375   : > { %v4411_v42 = vadd.f32 %v4410_v29, %v4409_v36  ;;  %v4412_v60 = vpop.f32.mrb[70].mxu0 }
 0x376   : > { %v4345_v39 = vpop.f32.mrb[48].mxu1  ;;  %v6682_v63 = vadd.f32 %v4408_v38, %v3385_v4  ;;  %v4413_v13 = vpop.f32.mrb[71].mxu0 }
 0x377   : > { %v4346_v12 = vpop.f32.mrb[49].mxu1  ;;  %v4414_v7 = vadd.f32 %v4413_v13, %v4412_v60 }
 0x378   : > { %v4347_v45 = vadd.f32 %v4346_v12, %v4345_v39  ;;  %v4348_v43 = vpop.f32.mrb[50].mxu1 }
 0x379   : > { %v4349_v14 = vpop.f32.mrb[51].mxu1 }
 0x37a   : > { %v3390_v11 = vadd.f32 %v4347_v45, %v6644_v62  ;;  %v4350_v30 = vadd.f32 %v4349_v14, %v4348_v43  ;;  %v6709_v14 = vld [vmem:[%s7091_s25] ss:$0 sm:$0xff]  ;;  %s5072_s25 = sshll.u32 %s5239_s26, 4  ;;  %s5073_s25 = int_to_ptr.vmem [resolvable:$false] %s5072_s25 }
 0x37b   : > { %v4415_v27 = vpop.f32.mrb[72].mxu0  ;;  %s5074_s1 = scalar_lea.vmem %s5073_s25, 4096  ;;  %p5075_p2 = scmp.lt.s32.totalorder %s6865_s23, %s5073_s25 }
 0x37c   : > { %v3393_v1 = vadd.f32 %v4350_v30, %v6646_v26  ;;  %v6686_v21 = vadd.f32 %v4411_v42, %v3390_v11  ;;  %v4416_v53 = vpop.f32.mrb[73].mxu0  ;;  %p5076_p5 = scmp.lt.s32.totalorder %s5074_s1, %s5068_s30 }
 0x37d   : > { %v4417_v52 = vadd.f32 %v4416_v53, %v4415_v27  ;;  %v4418_v6 = vpop.f32.mrb[74].mxu0 }
 0x37e   : > { %v4351_v19 = vpop.f32.mrb[52].mxu1  ;;  %v6688_v25 = vadd.f32 %v4414_v7, %v3393_v1  ;;  %v4419_v58 = vpop.f32.mrb[75].mxu0  ;;  %p5077_p6 = por %p5076_p5, %p5075_p2 }
 0x37f   : > { %v4352_v28 = vpop.f32.mrb[53].mxu1  ;;  %v4420_v5 = vadd.f32 %v4419_v58, %v4418_v6 }
 0x380   : > { %v4353_v31 = vadd.f32 %v4352_v28, %v4351_v19  ;;  %v4354_v2 = vpop.f32.mrb[54].mxu1  ;;  %p5078_p9 = pnand %p5077_p6, %p5071_p1 }
 0x381   : > { %v4355_v56 = vpop.f32.mrb[55].mxu1 }
 0x382   : > { %v3398_v62 = vadd.f32 %v4353_v31, %v6648_v61  ;;  %v4356_v49 = vadd.f32 %v4355_v56, %v4354_v2 }
 0x383   : > { %v4421_v3 = vpop.f32.mrb[76].mxu0 }
 0x384   : > { %v3401_v26 = vadd.f32 %v4356_v49, %v6650_v8  ;;  %v6692_v24 = vadd.f32 %v4417_v52, %v3398_v62  ;;  %v4422_v48 = vpop.f32.mrb[77].mxu0 }
 0x385   : > { %v4423_v46 = vadd.f32 %v4422_v48, %v4421_v3  ;;  %v4424_v9 = vpop.f32.mrb[78].mxu0 }
 0x386   : > { %v4357_v51 = vpop.f32.mrb[56].mxu1  ;;  %v6694_v0 = vadd.f32 %v4420_v5, %v3401_v26  ;;  %v4425_v10 = vpop.f32.mrb[79].mxu0 }
 0x387   : > { %v4358_v34 = vpop.f32.mrb[57].mxu1  ;;  %v4426_v17 = vadd.f32 %v4425_v10, %v4424_v9 }
 0x388   : > { %v4359_v59 = vadd.f32 %v4358_v34, %v4357_v51  ;;  %v4360_v16 = vpop.f32.mrb[58].mxu1 }
 0x389   : > { %v4361_v50 = vpop.f32.mrb[59].mxu1 }
 0x38a   : > { %v3406_v61 = vadd.f32 %v4359_v59, %v6652_v55  ;;  %v4362_v38 = vadd.f32 %v4361_v50, %v4360_v16 }
 0x38b   : > { %v4427_v20 = vpop.f32.mrb[80].mxu0 }
 0x38c   : > { %v3409_v8 = vadd.f32 %v4362_v38, %v6654_v35  ;;  %v6698_v32 = vadd.f32 %v4423_v46, %v3406_v61  ;;  %v4428_v33 = vpop.f32.mrb[81].mxu0 }
 0x38d   : > { %v4429_v41 = vadd.f32 %v4428_v33, %v4427_v20  ;;  %v4430_v18 = vpop.f32.mrb[82].mxu0 }
 0x38e   : > { %v4363_v4 = vpop.f32.mrb[60].mxu1  ;;  %v6700_v36 = vadd.f32 %v4426_v17, %v3409_v8  ;;  %v4431_v29 = vpop.f32.mrb[83].mxu0 }
 0x38f   : > { %v4364_v42 = vpop.f32.mrb[61].mxu1  ;;  %v4432_v60 = vadd.f32 %v4431_v29, %v4430_v18 }
 0x390   : > { %v4365_v39 = vadd.f32 %v4364_v42, %v4363_v4  ;;  %v4366_v13 = vpop.f32.mrb[62].mxu1 }
 0x391   : > { %v4367_v12 = vpop.f32.mrb[63].mxu1 }
 0x392   : > { %v3414_v55 = vadd.f32 %v4365_v39, %v6656_v15  ;;  %v4368_v7 = vadd.f32 %v4367_v12, %v4366_v13  ;;  %v6717_v15 = vld [vmem:[%s7092_s0] ss:$0 sm:$0xff] }
 0x394   : > { %v3417_v35 = vadd.f32 %v4368_v7, %v6658_v47  ;;  %v6704_v45 = vadd.f32 %v4429_v41, %v3414_v55 }
 0x396   : > { %v4503_v43 = vpop.f32.mrb[64].mxu1  ;;  %v6711_v11 = vadd.f32 %v4432_v60, %v3417_v35 }
 0x397   : > { %v3560_v30 = vadd.f32 %v4503_v43, %v6668_v40  ;;  %v3551_v1 = vpop.f32.mrb[65].mxu1 }
 0x398   : > { %v3552_v47 = vadd.f32 %v3551_v1, %v6662_v44  ;;  %v4504_v27 = vpop.f32.mrb[66].mxu1 }
 0x399   : > { %v3623_v53 = vmul.f32 %v6709_v14, %v3560_v30  ;;  %v3563_v52 = vadd.f32 %v4504_v27, %v6670_v54  ;;  %v3554_v6 = vpop.f32.mrb[67].mxu1 }
 0x39a   : > { %v3621_v19 = vmul.f32 %v6709_v14, %v3552_v47  ;;  %v3555_v58 = vadd.f32 %v3554_v6, %v6664_v23 }
 0x39b   : > { %v6725_v40 = vadd.f32 %v6717_v15, %v3623_v53  ;;  %v3624_v28 = vmul.f32 %v6709_v14, %v3563_v52 }
 0x39c   : > { %v6729_v5 = vadd.f32 %v6717_v15, %v3621_v19  ;;  %v3622_v44 = vmul.f32 %v6709_v14, %v3555_v58 }
 0x39d   : > { %v4136_v31 = vmul.f32 -1.442695, %v6725_v40  ;;  %v6734_v2 = vadd.f32 %v6717_v15, %v3624_v28 }
 0x39e   : > { %v4134_v54 = vmul.f32 -1.442695, %v6729_v5  ;;  %v6738_v56 = vadd.f32 %v6717_v15, %v3622_v44  ;;  %v4507_v23 = vpop.f32.mrb[68].mxu1 }
 0x39f   : > { %4842 = vpow2.f32 %v4136_v31  ;;  %v4137_v62 = vmul.f32 -1.442695, %v6734_v2  ;;  %v3576_v49 = vadd.f32 %v4507_v23, %v6680_v22  ;;  %v3567_v26 = vpop.f32.mrb[69].mxu1 }
 0x3a0   : > { %4844 = vpow2.f32 %v4134_v54  ;;  %v4135_v3 = vmul.f32 -1.442695, %v6738_v56  ;;  %v3568_v48 = vadd.f32 %v3567_v26, %v6674_v37  ;;  %v4508_v46 = vpop.f32.mrb[70].mxu1 }
 0x3a1   : > { %4846 = vpow2.f32 %v4137_v62  ;;  %v3627_v9 = vmul.f32 %v6709_v14, %v3576_v49  ;;  %v3579_v51 = vadd.f32 %v4508_v46, %v6682_v63  ;;  %v3570_v10 = vpop.f32.mrb[71].mxu1 }
 0x3a2   : > { %4848 = vpow2.f32 %v4135_v3  ;;  %v3625_v34 = vmul.f32 %v6709_v14, %v3568_v48  ;;  %v3571_v17 = vadd.f32 %v3570_v10, %v6676_v57 }
 0x3a3   : > { %v6749_v22 = vadd.f32 %v6717_v15, %v3627_v9  ;;  %v3628_v59 = vmul.f32 %v6709_v14, %v3579_v51 }
 0x3a4   : > { %v6753_v16 = vadd.f32 %v6717_v15, %v3625_v34  ;;  %v3626_v37 = vmul.f32 %v6709_v14, %v3571_v17 }
 0x3a5   : > { %v4140_v50 = vmul.f32 -1.442695, %v6749_v22  ;;  %v6758_v63 = vadd.f32 %v6717_v15, %v3628_v59 }
 0x3a6   : > { %v4138_v61 = vmul.f32 -1.442695, %v6753_v16  ;;  %v6762_v38 = vadd.f32 %v6717_v15, %v3626_v37  ;;  %v4511_v57 = vpop.f32.mrb[72].mxu1 }
 0x3a7   : > { %4850 = vpow2.f32 %v4140_v50  ;;  %v4141_v8 = vmul.f32 -1.442695, %v6758_v63  ;;  %v3592_v20 = vadd.f32 %v4511_v57, %v6692_v24  ;;  %v3583_v33 = vpop.f32.mrb[73].mxu1 }
 0x3a8   : > { %4852 = vpow2.f32 %v4138_v61  ;;  %v4139_v41 = vmul.f32 -1.442695, %v6762_v38  ;;  %v3584_v18 = vadd.f32 %v3583_v33, %v6686_v21  ;;  %v4512_v4 = vpop.f32.mrb[74].mxu1 }
 0x3a9   : > { %v4843_v29 = vpop.eup %4842  ;;  %4854 = vpow2.f32 %v4141_v8  ;;  %v3631_v42 = vmul.f32 %v6709_v14, %v3592_v20  ;;  %v3595_v60 = vadd.f32 %v4512_v4, %v6694_v0  ;;  %v3586_v39 = vpop.f32.mrb[75].mxu1 }
 0x3aa   : > { %v4845_v13 = vpop.eup %4844  ;;  %v3710_v12 = vadd.f32 1.0, %v4843_v29  ;;  %4856 = vpow2.f32 %v4139_v41  ;;  %v3629_v55 = vmul.f32 %v6709_v14, %v3584_v18  ;;  %v3587_v24 = vadd.f32 %v3586_v39, %v6688_v25 }
 0x3ab   : > { %v4847_v7 = vpop.eup %4846  ;;  %v3708_v35 = vadd.f32 1.0, %v4845_v13  ;;  %v6773_v43 = vadd.f32 %v6717_v15, %v3631_v42  ;;  %v3632_v21 = vmul.f32 %v6709_v14, %v3595_v60  ;;  %v4906_v60 = vld [vmem:[%s5700_s3 + $0x10] sm:$0xff] }
 0x3ac   : > { %v4849_v30 = vpop.eup %4848  ;;  %4858 = vrcp.f32 %v3710_v12  ;;  %v3711_v1 = vadd.f32 1.0, %v4847_v7  ;;  %v6777_v0 = vadd.f32 %v6717_v15, %v3629_v55  ;;  %v3630_v47 = vmul.f32 %v6709_v14, %v3587_v24 }
 0x3ad   : > { %4860 = vrcp.f32 %v3708_v35  ;;  %v3709_v27 = vadd.f32 1.0, %v4849_v30  ;;  %v4144_v53 = vmul.f32 -1.442695, %v6773_v43  ;;  %v6782_v25 = vadd.f32 %v6717_v15, %v3632_v21  ;;  %v4909_v21 = vld [vmem:[%s5700_s3 + $0x8] sm:$0xff] }
 0x3ae   : > { %4862 = vrcp.f32 %v3711_v1  ;;  %v4142_v52 = vmul.f32 -1.442695, %v6777_v0  ;;  %v6786_v6 = vadd.f32 %v6717_v15, %v3630_v47  ;;  %v4515_v19 = vpop.f32.mrb[76].mxu1 }
 0x3af   : > { %4864 = vrcp.f32 %v3709_v27  ;;  %v4145_v58 = vmul.f32 -1.442695, %v6782_v25  ;;  %v3608_v28 = vadd.f32 %v4515_v19, %v6704_v45  ;;  %v3599_v44 = vpop.f32.mrb[77].mxu1 }
 0x3b0   : > { %4866 = vpow2.f32 %v4144_v53  ;;  %v4143_v31 = vmul.f32 -1.442695, %v6786_v6  ;;  %v3600_v54 = vadd.f32 %v3599_v44, %v6698_v32  ;;  %v4516_v23 = vpop.f32.mrb[78].mxu1 }
 0x3b1   : > { %v4851_v62 = vpop.eup %4850  ;;  %4868 = vpow2.f32 %v4142_v52  ;;  %v3635_v49 = vmul.f32 %v6709_v14, %v3608_v28  ;;  %v3611_v26 = vadd.f32 %v4516_v23, %v6711_v11  ;;  %v3602_v3 = vpop.f32.mrb[79].mxu1 }
 0x3b2   : > { %v4853_v48 = vpop.eup %4852  ;;  %v3714_v46 = vadd.f32 1.0, %v4851_v62  ;;  %4870 = vpow2.f32 %v4145_v58  ;;  %v3633_v9 = vmul.f32 %v6709_v14, %v3600_v54  ;;  %v3603_v45 = vadd.f32 %v3602_v3, %v6700_v36 }
 0x3b3   : > { %v4855_v51 = vpop.eup %4854  ;;  %v3712_v10 = vadd.f32 1.0, %v4853_v48  ;;  %4872 = vpow2.f32 %v4143_v31  ;;  %v6797_v32 = vadd.f32 %v6717_v15, %v3635_v49  ;;  %v3636_v34 = vmul.f32 %v6709_v14, %v3611_v26  ;;  %v4910_v31 = vld [vmem:[%s5700_s3 + $0x30] sm:$0xff]  ;;  %v4911_v49 = vld [vmem:[%s5700_s3 + $0x20] sm:$0xff]  ;;  %v4912_v48 = vld [vmem:[%s5700_s3 + $0x38] sm:$0xff] }
 0x3b4   : > { %v4857_v17 = vpop.eup %4856  ;;  %4874 = vrcp.f32 %v3714_v46  ;;  %v3715_v59 = vadd.f32 1.0, %v4855_v51  ;;  %v6801_v11 = vadd.f32 %v6717_v15, %v3633_v9  ;;  %v3634_v37 = vmul.f32 %v6709_v14, %v3603_v45  ;;  %v4913_v45 = vld [vmem:[%s5700_s3 + $0x28] sm:$0xff] }
 0x3b5   : > { %4876 = vrcp.f32 %v3712_v10  ;;  %v3713_v50 = vadd.f32 1.0, %v4857_v17  ;;  %v4148_v36 = vmul.f32 -1.442695, %v6797_v32  ;;  %v6806_v61 = vadd.f32 %v6717_v15, %v3636_v34 }
 0x3b6   : > { %v4859_v57 = vpop.eup %4858  ;;  %4878 = vrcp.f32 %v3715_v59  ;;  %v4146_v8 = vmul.f32 -1.442695, %v6801_v11  ;;  %v6810_v20 = vadd.f32 %v6717_v15, %v3634_v37 }
 0x3b7   : > { %v4861_v33 = vpop.eup %4860  ;;  %v3758_v41 = vmul.f32 %v4859_v57, %v6725_v40  ;;  %4880 = vrcp.f32 %v3713_v50  ;;  %v4149_v14 = vmul.f32 -1.442695, %v6806_v61  ;;  %v4907_v40 = vld [vmem:[%s5700_s3] sm:$0xff] }
 0x3b8   : > { %v4863_v18 = vpop.eup %4862  ;;  %v3756_v4 = vmul.f32 %v4861_v33, %v6729_v5  ;;  %4882 = vpow2.f32 %v4148_v36  ;;  %v4147_v29 = vmul.f32 -1.442695, %v6810_v20  ;;  %v4908_v5 = vld [vmem:[%s5700_s3 + $0x18] sm:$0xff] }
 0x3b9   : > { %v4865_v42 = vpop.eup %4864  ;;  %v3774_v39 = vadd.f32 %v4906_v60, %v3758_v41  ;;  %v3759_v15 = vmul.f32 %v4863_v18, %v6734_v2  ;;  %4884 = vpow2.f32 %v4146_v8  ;;  %v4914_v8 = vld [vmem:[%s5700_s3 + $0x50] sm:$0xff] }
 0x3ba   : > { %v4867_v13 = vpop.eup %4866  ;;  %v3772_v12 = vadd.f32 %v4907_v40, %v3756_v4  ;;  %v3757_v55 = vmul.f32 %v4865_v42, %v6738_v56  ;;  %4886 = vpow2.f32 %v4149_v14  ;;  %v4915_v14 = vld [vmem:[%s5700_s3 + $0x40] sm:$0xff]  ;;  %v4918_v40 = vld [vmem:[%s5700_s3 + $0x70] sm:$0xff] }
 0x3bb   : > { %v4869_v24 = vpop.eup %4868  ;;  %3790 = vst [vmem:[%s6822_s4 + $0x10] sm:$0xff] %v3774_v39  ;;  %v3775_v7 = vadd.f32 %v4908_v5, %v3759_v15  ;;  %v3718_v2 = vadd.f32 1.0, %v4867_v13  ;;  %4888 = vpow2.f32 %v4147_v29 }
 0x3bc   : > { %v4871_v35 = vpop.eup %4870  ;;  %3788 = vst [vmem:[%s6822_s4] sm:$0xff] %v3772_v12  ;;  %v3773_v30 = vadd.f32 %v4909_v21, %v3757_v55  ;;  %v3716_v1 = vadd.f32 1.0, %v4869_v24  ;;  %v4919_v24 = vld [vmem:[%s5700_s3 + $0x60] sm:$0xff] }
 0x3bd   : > { %v4873_v56 = vpop.eup %4872  ;;  %3791 = vst [vmem:[%s6822_s4 + $0x18] sm:$0xff] %v3775_v7  ;;  %4890 = vrcp.f32 %v3718_v2  ;;  %v3719_v47 = vadd.f32 1.0, %v4871_v35  ;;  %v4920_v7 = vld [vmem:[%s5700_s3 + $0x78] sm:$0xff] }
 0x3be   : > { %v4875_v27 = vpop.eup %4874  ;;  %3789 = vst [vmem:[%s6822_s4 + $0x8] sm:$0xff] %v3773_v30  ;;  %4892 = vrcp.f32 %v3716_v1  ;;  %v3717_v53 = vadd.f32 1.0, %v4873_v56 }
 0x3bf   : > { %v4877_v52 = vpop.eup %4876  ;;  %v3762_v19 = vmul.f32 %v4875_v27, %v6749_v22  ;;  %4894 = vrcp.f32 %v3719_v47 }
 0x3c0   : > { %v4879_v58 = vpop.eup %4878  ;;  %v3760_v28 = vmul.f32 %v4877_v52, %v6753_v16  ;;  %4896 = vrcp.f32 %v3717_v53 }
 0x3c1   : > { %v4881_v44 = vpop.eup %4880  ;;  %v3778_v54 = vadd.f32 %v4910_v31, %v3762_v19  ;;  %v3763_v23 = vmul.f32 %v4879_v58, %v6758_v63 }
 0x3c2   : > { %v4883_v62 = vpop.eup %4882  ;;  %v3776_v26 = vadd.f32 %v4911_v49, %v3760_v28  ;;  %v3761_v3 = vmul.f32 %v4881_v44, %v6762_v38 }
 0x3c3   : > { %v4885_v22 = vpop.eup %4884  ;;  %3794 = vst [vmem:[%s6822_s4 + $0x30] sm:$0xff] %v3778_v54  ;;  %v3779_v46 = vadd.f32 %v4912_v48, %v3763_v23  ;;  %v3722_v16 = vadd.f32 1.0, %v4883_v62 }
 0x3c4   : > { %v4887_v9 = vpop.eup %4886  ;;  %3792 = vst [vmem:[%s6822_s4 + $0x20] sm:$0xff] %v3776_v26  ;;  %v3777_v51 = vadd.f32 %v4913_v45, %v3761_v3  ;;  %v3720_v10 = vadd.f32 1.0, %v4885_v22 }
 0x3c5   : > { %v4889_v34 = vpop.eup %4888  ;;  %3795 = vst [vmem:[%s6822_s4 + $0x38] sm:$0xff] %v3779_v46  ;;  %4898 = vrcp.f32 %v3722_v16  ;;  %v3723_v63 = vadd.f32 1.0, %v4887_v9 }
 0x3c6   : > { %3793 = vst [vmem:[%s6822_s4 + $0x28] sm:$0xff] %v3777_v51  ;;  %4900 = vrcp.f32 %v3720_v10  ;;  %v3721_v38 = vadd.f32 1.0, %v4889_v34 }
 0x3c7   : > { %v4891_v17 = vpop.eup %4890  ;;  %4902 = vrcp.f32 %v3723_v63 }
 0x3c8   : > { %v4893_v59 = vpop.eup %4892  ;;  %v3766_v37 = vmul.f32 %v4891_v17, %v6773_v43  ;;  %4904 = vrcp.f32 %v3721_v38  ;;  %v4916_v43 = vld [vmem:[%s5700_s3 + $0x58] sm:$0xff] }
 0x3c9   : > { %v4895_v50 = vpop.eup %4894  ;;  %v3764_v36 = vmul.f32 %v4893_v59, %v6777_v0  ;;  %v4917_v0 = vld [vmem:[%s5700_s3 + $0x48] sm:$0xff] }
 0x3ca   : > { %v4897_v57 = vpop.eup %4896  ;;  %v3782_v33 = vadd.f32 %v4914_v8, %v3766_v37  ;;  %v3767_v41 = vmul.f32 %v4895_v50, %v6782_v25 }
 0x3cb   : > { %v3780_v18 = vadd.f32 %v4915_v14, %v3764_v36  ;;  %v3765_v4 = vmul.f32 %v4897_v57, %v6786_v6 }
 0x3cc   : > { %3798 = vst [vmem:[%s6822_s4 + $0x50] sm:$0xff] %v3782_v33  ;;  %v3783_v29 = vadd.f32 %v4916_v43, %v3767_v41 }
 0x3cd   : > { %3796 = vst [vmem:[%s6822_s4 + $0x40] sm:$0xff] %v3780_v18  ;;  %v3781_v42 = vadd.f32 %v4917_v0, %v3765_v4 }
 0x3ce   : > { %3799 = vst [vmem:[%s6822_s4 + $0x58] sm:$0xff] %v3783_v29 }
 0x3cf   : > { %v4899_v60 = vpop.eup %4898  ;;  %3797 = vst [vmem:[%s6822_s4 + $0x48] sm:$0xff] %v3781_v42 }
 0x3d0   : > { %v4901_v25 = vpop.eup %4900  ;;  %v3770_v6 = vmul.f32 %v4899_v60, %v6797_v32 }
 0x3d1   : > { %v4903_v39 = vpop.eup %4902  ;;  %v3768_v15 = vmul.f32 %v4901_v25, %v6801_v11  ;;  %v4921_v11 = vld [vmem:[%s5700_s3 + $0x68] sm:$0xff] }
 0x3d2   : > { %v4905_v13 = vpop.eup %4904  ;;  %v3786_v12 = vadd.f32 %v4918_v40, %v3770_v6  ;;  %v3771_v55 = vmul.f32 %v4903_v39, %v6806_v61 }
 0x3d3   : > { %v3784_v5 = vadd.f32 %v4919_v24, %v3768_v15  ;;  %v3769_v32 = vmul.f32 %v4905_v13, %v6810_v20 }
 0x3d4   : > { %3802 = vst [vmem:[%s6822_s4 + $0x70] sm:$0xff] %v3786_v12  ;;  %v3787_v2 = vadd.f32 %v4920_v7, %v3771_v55 }
 0x3d5   : > { %3800 = vst [vmem:[%s6822_s4 + $0x60] sm:$0xff] %v3784_v5  ;;  %v3785_v35 = vadd.f32 %v4921_v11, %v3769_v32 }
 0x3d6   : > { %3803 = vst [vmem:[%s6822_s4 + $0x78] sm:$0xff] %v3787_v2 }
 0x3d7   : > { %3801 = vst [vmem:[%s6822_s4 + $0x68] sm:$0xff] %v3785_v35 }
 0x3d8   : > { %5081 = shalt.err (!%p5078_p9)
}
 0x3d9   : > { %s5082_s3 = scalar_lea.hbm %s6872_s20, 2048  ;;  %s5086_s4 = scalar_lea.hbm %s7095_s28, 8192 }
 0x3da   : > { %p5083_p11 = scmp.ne.s32.totalorder %s6872_s20, %s5082_s3  ;;  %p5087_p4 = scmp.lt.u32.totalorder %s6872_s20, %s7095_s28 }
 0x3db   : > { %p5088_p10 = scmp.lt.u32.totalorder %s5086_s4, %s5082_s3  ;;  %p5090_p8 = scmp.lt.u32.totalorder %s5082_s3, %s6872_s20 }
 0x3dc   : > { %p5084_p3 = pnand %p5083_p11, %p7096_p0 }
 0x3dd   : > { %p5089_p12 = por %p5088_p10, %p5087_p4 }
 0x3de   : > { %p5085_p7 = pneg %p5084_p3 }
 0x3df   : > { %p5091_p13 = por %p5090_p8, %p5089_p12 }
 0x3e1   : > { %p5092_p1 = pnand %p5091_p13, %p5085_p7 }
 0x3e3   : > { %5095 = shalt.err (!%p5092_p1)
}
 0x3e4   : > { %s5240_s13 = smov 128   ;;  %s5241_s9 = smov 8  }
 0x3e5   : > { %4531 = dma.vmem_to_hbm [thread:$0]  (%p7096_p0), %s6865_s23, 2048, %s6872_s20, %s3805_s21, %s5240_s13, %s5240_s13, %s5241_s9  }
 0x3e6 PF: > { %p4559_p2 = scmp.ge.s32.totalorder %s5226_s22, 2  ;;  %s3836_s7 = sand.u32 1, %s5198_s15  }
 0x3e7   : > { %p7097_p5 = scmp.ne.s32.totalorder %s7042_s11, 0  ;;  %s3837_s8 = scalar_lea.sflag [#allocation4], %s3836_s7 }
 0x3e9   : > { %p4551_p6 = pnand %p4559_p2, %p7097_p5 }
 0x3eb   : > { %5169 = dma.done.wait (!%p4551_p6), %s3837_s8, 2048  }
 0x3ec   : > { %5171 = vsyncadd (!%p4551_p6), %s3837_s8, 4294965248  ;;  %s29_s22 = sadd.s32 1, %s5226_s22   ;;  %s7099_s30 = sld [smem:[#allocation18_spill]] }
 0x3ed   : > { %p6905_p9 = scmp.ge.s32.totalorder %s29_s22, 6   ;;  %s7100_s18 = sld [smem:[#allocation19_spill]] }
 0x3ee   : > { %s7101_s23 = sld [smem:[#allocation20_spill]]  ;;  %s7102_s29 = smov %s5452_s12 }
 0x3ef   : > { %s7103_s20 = sld [smem:[#allocation23_spill]]  ;;  %s7104_s21 = sld [smem:[#allocation24_spill]] }
 0x3f0   : > { %s7105_s26 = sld [smem:[#allocation26_spill]]  ;;  %s7106_s25 = sld [smem:[#allocation27_spill]] }
 0x3f1   : > { %s7109_s11 = smov %s7135_s5  ;;  %s7111_s13 = smov %s5194_s14 }
 0x3f2   : > { %s7112_s14 = smov %s7102_s29  ;;  %s7113_s15 = smov %s5202_s16 }
 0x3f3   : > { %s7108_s10 = smov %s7100_s18  ;;  %s7114_s16 = smov %s5206_s17 }
 0x3f4   : > { %s7110_s12 = smov %s7101_s23  ;;  %s7115_s17 = smov %s5543_s19 }
 0x3f5   : > { %s7116_s18 = smov %s7103_s20  ;;  %s7117_s19 = smov %s7104_s21 }
 0x3f6   : > { %s7118_s20 = smov %s7105_s26  ;;  %s7119_s21 = smov %s7106_s25 }
 0x3f7   :  { %28 = sbr.rel (!%p6905_p9) target bundleno = 24 (0x18), region = 133 }
 0x3fe   :  { %3842 = vsyncpa [#allocation3], 1 }
 0x3ff   :  { %3844 = vsyncpa [#allocation3 + $0x1], 1 }
 0x400   :  { %3845 = vsyncpa [#allocation6], 1 }
 0x401   :  { %3847 = vsyncpa [#allocation6 + $0x1], 1 }
 0x402   :  { %3848 = vsyncpa [#allocation9], 1 }
 0x403   :  { %3849 = vsyncpa [#allocation4], 1 }
 0x404   :  { %3851 = vsyncpa [#allocation4 + $0x1], 1 }

</bundles_post_ra>
